<compile_context>
chip_gen: v7x
topology: tpu7x:2x2x1
jax: 0.10.0
libtpu: 0.0.40
codegen_flags: <defaults>
</compile_context>

<pallas_src>
import functools
import math

import jax
import jax.numpy as jnp
import numpy as np
from jax.experimental import pallas as pl
from jax.experimental.pallas import tpu as pltpu


_SQRT_2_OVER_PI = math.sqrt(2.0 / math.pi)


# ----------------------------- in-kernel helpers -----------------------------

def _gelu_tanh(x):
    # tanh-form GELU: runs on the (otherwise idle) EUP instead of a long VALU
    # polynomial chain.  Deviation from torch's exact erf GELU is ~1e-3 max.
    return 0.5 * x * (1.0 + jnp.tanh(_SQRT_2_OVER_PI * (x + 0.044715 * (x * x * x))))


def _ln_normalize(v, eps=1e-5):
    # Mean/variance normalization only; the LN affine (gamma, beta) has been
    # folded into the following matmul's weight / bias on the host.
    mu = jnp.mean(v, axis=-1, keepdims=True)
    c = v - mu
    var = jnp.mean(c * c, axis=-1, keepdims=True)
    return c * jax.lax.rsqrt(var + eps)


# --------------------------------- kernel ------------------------------------

def _block_kernel(x_ref,
                  w_in_ref, b_in_ref,
                  w_out_ref, b_out_ref,
                  w_fc_ref, b_fc_ref,
                  w_proj_ref, b_proj_ref,
                  o_ref, *, n_head):
    NB, L, D = x_ref.shape            # one tile of NB batch elements, (batch, seq, D)
    H = n_head
    dh = D // H
    M = NB * L                        # (batch, seq) rows folded into the MXU M dim

    x2d = x_ref[...].reshape(M, D)    # layout-trivial: L is a multiple of 8

    # ---- attention branch: x + MHA(LN1(x)) ----
    h = _ln_normalize(x2d).astype(jnp.bfloat16)
    # Dense QKV projection: bf16 inputs, f32 accumulation.  LN1's gamma/beta and
    # the 1/sqrt(d_head) query scale are already folded into w_in / b_in.
    qkv = jnp.dot(h, w_in_ref[...], preferred_element_type=jnp.float32) \
        + b_in_ref[...]                                            # (M, 3D) f32

    def gather_heads(base):
        # Stack per-head lane slices along a new leading (batch) axis, then
        # regroup (H, NB*L, dh) -> (H*NB, L, dh).  The reshape is done in f32
        # (8-row sublane tiles, L % 8 == 0) so it is layout-trivial.
        t = jnp.stack([qkv[:, base + i * dh: base + (i + 1) * dh] for i in range(H)],
                      axis=0)                                      # (H, M, dh)
        return t.reshape(H * NB, L, dh).astype(jnp.bfloat16)

    q = gather_heads(0)               # (H*NB, L, dh), b = h*NB + n
    k = gather_heads(D)
    v = gather_heads(2 * D)

    # One batched contraction for all (head, batch) pairs; contracting the last
    # dims of q and k means no explicit K transpose is materialized.
    s = jnp.einsum("bld,bmd->blm", q, k,
                   preferred_element_type=jnp.float32)             # (H*NB, L, L)
    s = s - jnp.max(s, axis=-1, keepdims=True)
    p = jnp.exp(s)
    denom = jnp.sum(p, axis=-1, keepdims=True)                     # (H*NB, L, 1) f32
    o = jnp.einsum("blm,bmd->bld", p.astype(jnp.bfloat16), v,
                   preferred_element_type=jnp.float32)             # (H*NB, L, dh)
    # Deferred softmax normalization: scale the (L, dh) result instead of the
    # (L, L) probability tile; reciprocal on the EUP.
    o = o * pl.reciprocal(denom, approx=True)

    # Out-projection without re-concatenating the heads: per-head matmul against
    # the host-pre-split (H, dh, D) weight, summed over heads.
    ob = o.reshape(H, M, dh).astype(jnp.bfloat16)
    c = jnp.einsum("hmd,hde->hme", ob, w_out_ref[...],
                   preferred_element_type=jnp.float32)             # (H, M, D)
    attn = jnp.sum(c, axis=0) + b_out_ref[...]                     # (M, D) f32
    x1 = x2d + attn                                                # residual in f32

    # ---- MLP branch: x1 + proj(GELU(fc(LN2(x1)))) ----
    h2 = _ln_normalize(x1).astype(jnp.bfloat16)
    f = jnp.dot(h2, w_fc_ref[...], preferred_element_type=jnp.float32) \
      + b_fc_ref[...]                                              # (M, mlp_width)
    f = _gelu_tanh(f).astype(jnp.bfloat16)
    f = jnp.dot(f, w_proj_ref[...], preferred_element_type=jnp.float32) \
      + b_proj_ref[...]                                            # (M, D)

    o_ref[...] = (x1 + f).reshape(NB, L, D).astype(o_ref.dtype)


# --------------------------------- wrapper -----------------------------------

def _prepare_weights(params, n_head):
    """Host-side weight prep (done once at parameter-load time):
       * fold LN1's gamma/beta and the 1/sqrt(d_head) query scale into W_in/b_in,
       * fold LN2's gamma/beta into W_fc/b_fc,
       * cast matmul weights to bf16 (halves weight VMEM / HBM traffic),
       * pre-split the out-projection weight per head: (D, D) -> (H, dh, D)."""
    D = params["ln1_w"].shape[-1]
    dh = D // n_head
    q_scale = 1.0 / math.sqrt(dh)
    col_scale = jnp.concatenate(
        [jnp.full((D,), q_scale, jnp.float32), jnp.ones((2 * D,), jnp.float32)])

    # LN1 affine + query scale folded into the QKV projection.
    g1 = params["ln1_w"].reshape(D, 1)
    beta1 = params["ln1_b"].reshape(1, D)
    w_in = (g1 * params["w_in_t"]) * col_scale[None, :]
    b_in = (params["b_in"] + beta1 @ params["w_in_t"]) * col_scale[None, :]

    # LN2 affine folded into the MLP fc projection.
    g2 = params["ln2_w"].reshape(D, 1)
    beta2 = params["ln2_b"].reshape(1, D)
    w_fc = g2 * params["w_fc_t"]
    b_fc = params["b_fc"] + beta2 @ params["w_fc_t"]

    w_out = params["w_out_t"].reshape(n_head, dh, D)

    return (w_in.astype(jnp.bfloat16), b_in,
            w_out.astype(jnp.bfloat16), params["b_out"],
            w_fc.astype(jnp.bfloat16), b_fc,
            params["w_proj_t"].astype(jnp.bfloat16), params["b_proj"])


def residual_attention_block(x, params, n_head, batch_tile=None):
    """x: (L, N, D) float32.  Returns (L, N, D)."""
    L, N, D = x.shape
    assert D % n_head == 0
    # L % 8 keeps the in-kernel head regrouping reshapes layout-trivial (f32 sublane tile).
    assert L % 8 == 0, "seq_len must be a multiple of 8"
    if batch_tile is None:
        batch_tile = 8 if N % 8 == 0 else 1
    NB = batch_tile
    assert N % NB == 0

    weights = _prepare_weights(params, n_head)

    # (L, N, D) -> (N, L, D): makes (batch, seq) rows contiguous so batch folds into
    # the MXU M dimension and all in-kernel head regrouping stays layout-trivial.
    xb = jnp.transpose(x, (1, 0, 2))

    def full_spec(arr):
        nd = arr.ndim

        def idx(b):
            return (0,) * nd

        return pl.BlockSpec(arr.shape, idx)

    out = pl.pallas_call(
        functools.partial(_block_kernel, n_head=n_head),
        out_shape=jax.ShapeDtypeStruct((N, L, D), x.dtype),
        grid=(N // NB,),
        in_specs=[pl.BlockSpec((NB, L, D), lambda b: (b, 0, 0))]
                 + [full_spec(w) for w in weights],
        out_specs=pl.BlockSpec((NB, L, D), lambda b: (b, 0, 0)),
        compiler_params=pltpu.CompilerParams(
            dimension_semantics=("parallel",),      # >=2 parallel steps: megacore / v7x
            vmem_limit_bytes=64 * 1024 * 1024,      # explicit scoped-VMEM budget
        ),
    )(xb, *weights)

    return jnp.transpose(out, (1, 0, 2))


# ----------------------------- reference (JAX) --------------------------------

def reference_block(x, p, n_head):
    L, N, D = x.shape
    dh = D // n_head

    def ln(v, w, b):
        mu = v.mean(-1, keepdims=True)
        var = ((v - mu) ** 2).mean(-1, keepdims=True)
        return (v - mu) / jnp.sqrt(var + 1e-5) * w + b

    h = ln(x, p["ln1_w"][0], p["ln1_b"][0])
    qkv = h @ p["w_in_t"] + p["b_in"][0]
    q, k, v = jnp.split(qkv, 3, axis=-1)
    reshape = lambda t: t.reshape(L, N, n_head, dh)
    qh, kh, vh = reshape(q) / math.sqrt(dh), reshape(k), reshape(v)
    s = jnp.einsum("lnhd,mnhd->nhlm", qh, kh)
    pr = jax.nn.softmax(s, axis=-1)
    o = jnp.einsum("nhlm,mnhd->lnhd", pr, vh).reshape(L, N, D)
    o = o @ p["w_out_t"] + p["b_out"][0]
    x1 = x + o
    h2 = ln(x1, p["ln2_w"][0], p["ln2_b"][0])
    f = h2 @ p["w_fc_t"] + p["b_fc"][0]
    f = 0.5 * f * (1.0 + jax.scipy.special.erf(f / math.sqrt(2.0)))   # exact GELU
    f = f @ p["w_proj_t"] + p["b_proj"][0]
    return x1 + f


# ----------------------------------- main -------------------------------------

def init_params(key, d_model, n_head, mlp_ratio=4.0):
    mlp_width = int(d_model * mlp_ratio)
    ks = jax.random.split(key, 12)
    scale = 0.02
    # All linear weights are stored pre-transposed (kernel computes x @ W^T as x @ Wt).
    # LN affines are non-trivial so the host-side gamma/beta folding is exercised.
    return {
        "ln1_w":    1.0 + 0.1 * jax.random.normal(ks[8], (1, d_model), jnp.float32),
        "ln1_b":    0.1 * jax.random.normal(ks[9], (1, d_model), jnp.float32),
        "w_in_t":   scale * jax.random.normal(ks[0], (d_model, 3 * d_model), jnp.float32),
        "b_in":     scale * jax.random.normal(ks[1], (1, 3 * d_model), jnp.float32),
        "w_out_t":  scale * jax.random.normal(ks[2], (d_model, d_model), jnp.float32),
        "b_out":    scale * jax.random.normal(ks[3], (1, d_model), jnp.float32),
        "ln2_w":    1.0 + 0.1 * jax.random.normal(ks[10], (1, d_model), jnp.float32),
        "ln2_b":    0.1 * jax.random.normal(ks[11], (1, d_model), jnp.float32),
        "w_fc_t":   scale * jax.random.normal(ks[4], (d_model, mlp_width), jnp.float32),
        "b_fc":     scale * jax.random.normal(ks[5], (1, mlp_width), jnp.float32),
        "w_proj_t": scale * jax.random.normal(ks[6], (mlp_width, d_model), jnp.float32),
        "b_proj":   scale * jax.random.normal(ks[7], (1, d_model), jnp.float32),
    }


if __name__ == "__main__":
    # seq=8, batch=16 (-> 2 parallel grid steps of 8), d_model=32, n_head=4
    L, N, D, H = 8, 16, 32, 4
    key = jax.random.PRNGKey(0)
    kx, kp = jax.random.split(key)
    x = jax.random.normal(kx, (L, N, D), jnp.float32)
    params = init_params(kp, D, H)

    out = residual_attention_block(x, params, H)
    out = jax.block_until_ready(out)

    ref = reference_block(x, params, H)
    # Tolerance loosened vs. a pure-f32 version: bf16 matmul inputs + tanh GELU
    # + approx softmax reciprocal.
    np.testing.assert_allclose(np.asarray(out), np.asarray(ref), atol=1e-2, rtol=1e-2)

    print("KERNEL_OK")
</pallas_src>

<mosaic_0001>
module attributes {stable_mosaic.version = 11 : i64} {
  func.func @_block_kernel(%arg0: i32, %arg1: memref<8x8x32xf32, #tpu.memory_space<vmem>>, %arg2: memref<32x96xbf16, #tpu.memory_space<vmem>>, %arg3: memref<1x96xf32, #tpu.memory_space<vmem>>, %arg4: memref<4x8x32xbf16, #tpu.memory_space<vmem>>, %arg5: memref<1x32xf32, #tpu.memory_space<vmem>>, %arg6: memref<32x128xbf16, #tpu.memory_space<vmem>>, %arg7: memref<1x128xf32, #tpu.memory_space<vmem>>, %arg8: memref<128x32xbf16, #tpu.memory_space<vmem>>, %arg9: memref<1x32xf32, #tpu.memory_space<vmem>>, %arg10: memref<8x8x32xf32, #tpu.memory_space<vmem>>) attributes {dimension_semantics = [#tpu.dimension_semantics<parallel>], iteration_bounds = array<i64: 2>, scalar_prefetch = 0 : i64, scratch_operands = 0 : i64, tpu.core_type = #tpu.core_type<tc>, window_params = [{transform_indices = @transform_0, window_bounds = array<i64: 8, 8, 32>}, {pipeline_mode = #tpu.pipeline_mode<synchronous>, transform_indices = @transform_1, window_bounds = array<i64: 32, 96>}, {pipeline_mode = #tpu.pipeline_mode<synchronous>, transform_indices = @transform_2, window_bounds = array<i64: 1, 96>}, {pipeline_mode = #tpu.pipeline_mode<synchronous>, transform_indices = @transform_3, window_bounds = array<i64: 4, 8, 32>}, {pipeline_mode = #tpu.pipeline_mode<synchronous>, transform_indices = @transform_4, window_bounds = array<i64: 1, 32>}, {pipeline_mode = #tpu.pipeline_mode<synchronous>, transform_indices = @transform_5, window_bounds = array<i64: 32, 128>}, {pipeline_mode = #tpu.pipeline_mode<synchronous>, transform_indices = @transform_6, window_bounds = array<i64: 1, 128>}, {pipeline_mode = #tpu.pipeline_mode<synchronous>, transform_indices = @transform_7, window_bounds = array<i64: 128, 32>}, {pipeline_mode = #tpu.pipeline_mode<synchronous>, transform_indices = @transform_8, window_bounds = array<i64: 1, 32>}, {transform_indices = @transform_9, window_bounds = array<i64: 8, 8, 32>}]} {
    %c0 = arith.constant 0 : index
    %c0_0 = arith.constant 0 : index
    %c0_1 = arith.constant 0 : index
    %0 = vector.load %arg1[%c0, %c0_0, %c0_1] : memref<8x8x32xf32, #tpu.memory_space<vmem>>, vector<8x8x32xf32>
    %1 = vector.shape_cast %0 : vector<8x8x32xf32> to vector<64x32xf32>
    %cst = arith.constant dense<0.000000e+00> : vector<64xf32>
    %2 = vector.multi_reduction <add>, %1, %cst [1] : vector<64x32xf32> to vector<64xf32>
    %3 = vector.shape_cast %2 : vector<64xf32> to vector<64x1xf32>
    %cst_2 = arith.constant 3.200000e+01 : f32
    %4 = vector.broadcast %cst_2 : f32 to vector<64x1xf32>
    %5 = arith.divf %3, %4 : vector<64x1xf32>
    %6 = vector.broadcast %5 : vector<64x1xf32> to vector<64x32xf32>
    %7 = arith.subf %1, %6 : vector<64x32xf32>
    %8 = arith.mulf %7, %7 : vector<64x32xf32>
    %cst_3 = arith.constant dense<0.000000e+00> : vector<64xf32>
    %9 = vector.multi_reduction <add>, %8, %cst_3 [1] : vector<64x32xf32> to vector<64xf32>
    %10 = vector.shape_cast %9 : vector<64xf32> to vector<64x1xf32>
    %cst_4 = arith.constant 3.200000e+01 : f32
    %11 = vector.broadcast %cst_4 : f32 to vector<64x1xf32>
    %12 = arith.divf %10, %11 : vector<64x1xf32>
    %cst_5 = arith.constant 9.99999974E-6 : f32
    %13 = vector.broadcast %cst_5 : f32 to vector<64x1xf32>
    %14 = arith.addf %12, %13 : vector<64x1xf32>
    %15 = math.rsqrt %14 : vector<64x1xf32>
    %16 = vector.broadcast %15 : vector<64x1xf32> to vector<64x32xf32>
    %17 = arith.mulf %7, %16 : vector<64x32xf32>
    %18 = arith.truncf %17 : vector<64x32xf32> to vector<64x32xbf16>
    %c0_6 = arith.constant 0 : index
    %c0_7 = arith.constant 0 : index
    %19 = vector.load %arg2[%c0_6, %c0_7] : memref<32x96xbf16, #tpu.memory_space<vmem>>, vector<32x96xbf16>
    %cst_8 = arith.constant dense<0.000000e+00> : vector<64x96xf32>
    %20 = tpu.matmul %18, %19, %cst_8 {dimension_numbers = #tpu.dot_dimension_numbers<[1], [0], [0], [1], [0, 0, 1, 1], [], []>} : vector<64x32xbf16>, vector<32x96xbf16>, vector<64x96xf32> -> vector<64x96xf32>
    %c0_9 = arith.constant 0 : index
    %c0_10 = arith.constant 0 : index
    %21 = vector.load %arg3[%c0_9, %c0_10] : memref<1x96xf32, #tpu.memory_space<vmem>>, vector<1x96xf32>
    %22 = vector.broadcast %21 : vector<1x96xf32> to vector<64x96xf32>
    %23 = arith.addf %20, %22 : vector<64x96xf32>
    %24 = vector.extract_strided_slice %23 {offsets = [0, 0], sizes = [64, 8], strides = [1, 1]} : vector<64x96xf32> to vector<64x8xf32>
    %25 = vector.extract_strided_slice %23 {offsets = [0, 8], sizes = [64, 8], strides = [1, 1]} : vector<64x96xf32> to vector<64x8xf32>
    %26 = vector.extract_strided_slice %23 {offsets = [0, 16], sizes = [64, 8], strides = [1, 1]} : vector<64x96xf32> to vector<64x8xf32>
    %27 = vector.extract_strided_slice %23 {offsets = [0, 24], sizes = [64, 8], strides = [1, 1]} : vector<64x96xf32> to vector<64x8xf32>
    %28 = vector.shape_cast %24 : vector<64x8xf32> to vector<1x64x8xf32>
    %29 = vector.shape_cast %25 : vector<64x8xf32> to vector<1x64x8xf32>
    %30 = vector.shape_cast %26 : vector<64x8xf32> to vector<1x64x8xf32>
    %31 = vector.shape_cast %27 : vector<64x8xf32> to vector<1x64x8xf32>
    %32 = tpu.concatenate %28, %29, %30, %31 in 0 : vector<1x64x8xf32>, vector<1x64x8xf32>, vector<1x64x8xf32>, vector<1x64x8xf32> -> vector<4x64x8xf32>
    %33 = vector.shape_cast %32 : vector<4x64x8xf32> to vector<32x8x8xf32>
    %34 = arith.truncf %33 : vector<32x8x8xf32> to vector<32x8x8xbf16>
    %35 = vector.extract_strided_slice %23 {offsets = [0, 32], sizes = [64, 8], strides = [1, 1]} : vector<64x96xf32> to vector<64x8xf32>
    %36 = vector.extract_strided_slice %23 {offsets = [0, 40], sizes = [64, 8], strides = [1, 1]} : vector<64x96xf32> to vector<64x8xf32>
    %37 = vector.extract_strided_slice %23 {offsets = [0, 48], sizes = [64, 8], strides = [1, 1]} : vector<64x96xf32> to vector<64x8xf32>
    %38 = vector.extract_strided_slice %23 {offsets = [0, 56], sizes = [64, 8], strides = [1, 1]} : vector<64x96xf32> to vector<64x8xf32>
    %39 = vector.shape_cast %35 : vector<64x8xf32> to vector<1x64x8xf32>
    %40 = vector.shape_cast %36 : vector<64x8xf32> to vector<1x64x8xf32>
    %41 = vector.shape_cast %37 : vector<64x8xf32> to vector<1x64x8xf32>
    %42 = vector.shape_cast %38 : vector<64x8xf32> to vector<1x64x8xf32>
    %43 = tpu.concatenate %39, %40, %41, %42 in 0 : vector<1x64x8xf32>, vector<1x64x8xf32>, vector<1x64x8xf32>, vector<1x64x8xf32> -> vector<4x64x8xf32>
    %44 = vector.shape_cast %43 : vector<4x64x8xf32> to vector<32x8x8xf32>
    %45 = arith.truncf %44 : vector<32x8x8xf32> to vector<32x8x8xbf16>
    %46 = vector.extract_strided_slice %23 {offsets = [0, 64], sizes = [64, 8], strides = [1, 1]} : vector<64x96xf32> to vector<64x8xf32>
    %47 = vector.extract_strided_slice %23 {offsets = [0, 72], sizes = [64, 8], strides = [1, 1]} : vector<64x96xf32> to vector<64x8xf32>
    %48 = vector.extract_strided_slice %23 {offsets = [0, 80], sizes = [64, 8], strides = [1, 1]} : vector<64x96xf32> to vector<64x8xf32>
    %49 = vector.extract_strided_slice %23 {offsets = [0, 88], sizes = [64, 8], strides = [1, 1]} : vector<64x96xf32> to vector<64x8xf32>
    %50 = vector.shape_cast %46 : vector<64x8xf32> to vector<1x64x8xf32>
    %51 = vector.shape_cast %47 : vector<64x8xf32> to vector<1x64x8xf32>
    %52 = vector.shape_cast %48 : vector<64x8xf32> to vector<1x64x8xf32>
    %53 = vector.shape_cast %49 : vector<64x8xf32> to vector<1x64x8xf32>
    %54 = tpu.concatenate %50, %51, %52, %53 in 0 : vector<1x64x8xf32>, vector<1x64x8xf32>, vector<1x64x8xf32>, vector<1x64x8xf32> -> vector<4x64x8xf32>
    %55 = vector.shape_cast %54 : vector<4x64x8xf32> to vector<32x8x8xf32>
    %56 = arith.truncf %55 : vector<32x8x8xf32> to vector<32x8x8xbf16>
    "tpu.trace_start"() <{level = 10 : i32, message = "bld,bmd->blm"}> : () -> ()
    %cst_11 = arith.constant dense<0.000000e+00> : vector<32x8x8xf32>
    %57 = tpu.matmul %34, %45, %cst_11 {dimension_numbers = #tpu.dot_dimension_numbers<[2], [2], [1], [1], [0, 0, 0, 1, 1, 1], [0], [0]>} : vector<32x8x8xbf16>, vector<32x8x8xbf16>, vector<32x8x8xf32> -> vector<32x8x8xf32>
    "tpu.trace_stop"() : () -> ()
    %cst_12 = arith.constant dense<0xFF800000> : vector<32x8xf32>
    %58 = vector.multi_reduction <maximumf>, %57, %cst_12 [2] : vector<32x8x8xf32> to vector<32x8xf32>
    %59 = vector.shape_cast %58 : vector<32x8xf32> to vector<32x8x1xf32>
    %60 = vector.broadcast %59 : vector<32x8x1xf32> to vector<32x8x8xf32>
    %61 = arith.subf %57, %60 : vector<32x8x8xf32>
    %62 = math.exp %61 : vector<32x8x8xf32>
    %cst_13 = arith.constant dense<0.000000e+00> : vector<32x8xf32>
    %63 = vector.multi_reduction <add>, %62, %cst_13 [2] : vector<32x8x8xf32> to vector<32x8xf32>
    %64 = vector.shape_cast %63 : vector<32x8xf32> to vector<32x8x1xf32>
    %65 = arith.truncf %62 : vector<32x8x8xf32> to vector<32x8x8xbf16>
    "tpu.trace_start"() <{level = 10 : i32, message = "blm,bmd->bld"}> : () -> ()
    %cst_14 = arith.constant dense<0.000000e+00> : vector<32x8x8xf32>
    %66 = tpu.matmul %65, %56, %cst_14 {dimension_numbers = #tpu.dot_dimension_numbers<[2], [1], [1], [2], [0, 0, 0, 1, 1, 2], [0], [0]>} : vector<32x8x8xbf16>, vector<32x8x8xbf16>, vector<32x8x8xf32> -> vector<32x8x8xf32>
    "tpu.trace_stop"() : () -> ()
    %67 = tpu.reciprocal %64 {approx = true} : vector<32x8x1xf32> -> vector<32x8x1xf32>
    %68 = vector.broadcast %67 : vector<32x8x1xf32> to vector<32x8x8xf32>
    %69 = arith.mulf %66, %68 : vector<32x8x8xf32>
    %70 = vector.shape_cast %69 : vector<32x8x8xf32> to vector<4x64x8xf32>
    %71 = arith.truncf %70 : vector<4x64x8xf32> to vector<4x64x8xbf16>
    %c0_15 = arith.constant 0 : index
    %c0_16 = arith.constant 0 : index
    %c0_17 = arith.constant 0 : index
    %72 = vector.load %arg4[%c0_15, %c0_16, %c0_17] : memref<4x8x32xbf16, #tpu.memory_space<vmem>>, vector<4x8x32xbf16>
    "tpu.trace_start"() <{level = 10 : i32, message = "hmd,hde->hme"}> : () -> ()
    %cst_18 = arith.constant dense<0.000000e+00> : vector<4x64x32xf32>
    %73 = tpu.matmul %71, %72, %cst_18 {dimension_numbers = #tpu.dot_dimension_numbers<[2], [1], [1], [2], [0, 0, 0, 1, 1, 2], [0], [0]>} : vector<4x64x8xbf16>, vector<4x8x32xbf16>, vector<4x64x32xf32> -> vector<4x64x32xf32>
    "tpu.trace_stop"() : () -> ()
    %cst_19 = arith.constant dense<0.000000e+00> : vector<64x32xf32>
    %74 = vector.multi_reduction <add>, %73, %cst_19 [0] : vector<4x64x32xf32> to vector<64x32xf32>
    %c0_20 = arith.constant 0 : index
    %c0_21 = arith.constant 0 : index
    %75 = vector.load %arg5[%c0_20, %c0_21] : memref<1x32xf32, #tpu.memory_space<vmem>>, vector<1x32xf32>
    %76 = vector.broadcast %75 : vector<1x32xf32> to vector<64x32xf32>
    %77 = arith.addf %74, %76 : vector<64x32xf32>
    %78 = arith.addf %1, %77 : vector<64x32xf32>
    %cst_22 = arith.constant dense<0.000000e+00> : vector<64xf32>
    %79 = vector.multi_reduction <add>, %78, %cst_22 [1] : vector<64x32xf32> to vector<64xf32>
    %80 = vector.shape_cast %79 : vector<64xf32> to vector<64x1xf32>
    %cst_23 = arith.constant 3.200000e+01 : f32
    %81 = vector.broadcast %cst_23 : f32 to vector<64x1xf32>
    %82 = arith.divf %80, %81 : vector<64x1xf32>
    %83 = vector.broadcast %82 : vector<64x1xf32> to vector<64x32xf32>
    %84 = arith.subf %78, %83 : vector<64x32xf32>
    %85 = arith.mulf %84, %84 : vector<64x32xf32>
    %cst_24 = arith.constant dense<0.000000e+00> : vector<64xf32>
    %86 = vector.multi_reduction <add>, %85, %cst_24 [1] : vector<64x32xf32> to vector<64xf32>
    %87 = vector.shape_cast %86 : vector<64xf32> to vector<64x1xf32>
    %cst_25 = arith.constant 3.200000e+01 : f32
    %88 = vector.broadcast %cst_25 : f32 to vector<64x1xf32>
    %89 = arith.divf %87, %88 : vector<64x1xf32>
    %cst_26 = arith.constant 9.99999974E-6 : f32
    %90 = vector.broadcast %cst_26 : f32 to vector<64x1xf32>
    %91 = arith.addf %89, %90 : vector<64x1xf32>
    %92 = math.rsqrt %91 : vector<64x1xf32>
    %93 = vector.broadcast %92 : vector<64x1xf32> to vector<64x32xf32>
    %94 = arith.mulf %84, %93 : vector<64x32xf32>
    %95 = arith.truncf %94 : vector<64x32xf32> to vector<64x32xbf16>
    %c0_27 = arith.constant 0 : index
    %c0_28 = arith.constant 0 : index
    %96 = vector.load %arg6[%c0_27, %c0_28] : memref<32x128xbf16, #tpu.memory_space<vmem>>, vector<32x128xbf16>
    %cst_29 = arith.constant dense<0.000000e+00> : vector<64x128xf32>
    %97 = tpu.matmul %95, %96, %cst_29 {dimension_numbers = #tpu.dot_dimension_numbers<[1], [0], [0], [1], [0, 0, 1, 1], [], []>} : vector<64x32xbf16>, vector<32x128xbf16>, vector<64x128xf32> -> vector<64x128xf32>
    %c0_30 = arith.constant 0 : index
    %c0_31 = arith.constant 0 : index
    %98 = vector.load %arg7[%c0_30, %c0_31] : memref<1x128xf32, #tpu.memory_space<vmem>>, vector<1x128xf32>
    %99 = vector.broadcast %98 : vector<1x128xf32> to vector<64x128xf32>
    %100 = arith.addf %97, %99 : vector<64x128xf32>
    %cst_32 = arith.constant 5.000000e-01 : f32
    %101 = vector.broadcast %cst_32 : f32 to vector<64x128xf32>
    %102 = arith.mulf %101, %100 : vector<64x128xf32>
    %103 = arith.mulf %100, %100 : vector<64x128xf32>
    %104 = arith.mulf %103, %100 : vector<64x128xf32>
    %cst_33 = arith.constant 4.471500e-02 : f32
    %105 = vector.broadcast %cst_33 : f32 to vector<64x128xf32>
    %106 = arith.mulf %105, %104 : vector<64x128xf32>
    %107 = arith.addf %100, %106 : vector<64x128xf32>
    %cst_34 = arith.constant 0.797884583 : f32
    %108 = vector.broadcast %cst_34 : f32 to vector<64x128xf32>
    %109 = arith.mulf %108, %107 : vector<64x128xf32>
    %110 = math.tanh %109 : vector<64x128xf32>
    %cst_35 = arith.constant 1.000000e+00 : f32
    %111 = vector.broadcast %cst_35 : f32 to vector<64x128xf32>
    %112 = arith.addf %111, %110 : vector<64x128xf32>
    %113 = arith.mulf %102, %112 : vector<64x128xf32>
    %114 = arith.truncf %113 : vector<64x128xf32> to vector<64x128xbf16>
    %c0_36 = arith.constant 0 : index
    %c0_37 = arith.constant 0 : index
    %115 = vector.load %arg8[%c0_36, %c0_37] : memref<128x32xbf16, #tpu.memory_space<vmem>>, vector<128x32xbf16>
    %cst_38 = arith.constant dense<0.000000e+00> : vector<64x32xf32>
    %116 = tpu.matmul %114, %115, %cst_38 {dimension_numbers = #tpu.dot_dimension_numbers<[1], [0], [0], [1], [0, 0, 1, 1], [], []>} : vector<64x128xbf16>, vector<128x32xbf16>, vector<64x32xf32> -> vector<64x32xf32>
    %c0_39 = arith.constant 0 : index
    %c0_40 = arith.constant 0 : index
    %117 = vector.load %arg9[%c0_39, %c0_40] : memref<1x32xf32, #tpu.memory_space<vmem>>, vector<1x32xf32>
    %118 = vector.broadcast %117 : vector<1x32xf32> to vector<64x32xf32>
    %119 = arith.addf %116, %118 : vector<64x32xf32>
    %120 = arith.addf %78, %119 : vector<64x32xf32>
    %121 = vector.shape_cast %120 : vector<64x32xf32> to vector<8x8x32xf32>
    %c0_41 = arith.constant 0 : index
    %c0_42 = arith.constant 0 : index
    %c0_43 = arith.constant 0 : index
    %122 = vector.load %arg10[%c0_41, %c0_42, %c0_43] : memref<8x8x32xf32, #tpu.memory_space<vmem>>, vector<8x8x32xf32>
    tpu.vector_store %arg10[%c0_41, %c0_42, %c0_43], %121 {strides = array<i32>} : memref<8x8x32xf32, #tpu.memory_space<vmem>>, vector<8x8x32xf32>,
    return
  }
  func.func @transform_0(%arg0: i32) -> (i32, i32, i32) {
    %c0_i32 = arith.constant 0 : i32
    %c0_i32_0 = arith.constant 0 : i32
    %c0_i32_1 = arith.constant 0 : i32
    return %arg0, %c0_i32, %c0_i32_0 : i32, i32, i32
  }
  func.func @transform_1(%arg0: i32) -> (i32, i32) {
    %c0_i32 = arith.constant 0 : i32
    %c0_i32_0 = arith.constant 0 : i32
    %c0_i32_1 = arith.constant 0 : i32
    return %c0_i32, %c0_i32_0 : i32, i32
  }
  func.func @transform_2(%arg0: i32) -> (i32, i32) {
    %c0_i32 = arith.constant 0 : i32
    %c0_i32_0 = arith.constant 0 : i32
    %c0_i32_1 = arith.constant 0 : i32
    return %c0_i32, %c0_i32_0 : i32, i32
  }
  func.func @transform_3(%arg0: i32) -> (i32, i32, i32) {
    %c0_i32 = arith.constant 0 : i32
    %c0_i32_0 = arith.constant 0 : i32
    %c0_i32_1 = arith.constant 0 : i32
    %c0_i32_2 = arith.constant 0 : i32
    return %c0_i32, %c0_i32_0, %c0_i32_1 : i32, i32, i32
  }
  func.func @transform_4(%arg0: i32) -> (i32, i32) {
    %c0_i32 = arith.constant 0 : i32
    %c0_i32_0 = arith.constant 0 : i32
    %c0_i32_1 = arith.constant 0 : i32
    return %c0_i32, %c0_i32_0 : i32, i32
  }
  func.func @transform_5(%arg0: i32) -> (i32, i32) {
    %c0_i32 = arith.constant 0 : i32
    %c0_i32_0 = arith.constant 0 : i32
    %c0_i32_1 = arith.constant 0 : i32
    return %c0_i32, %c0_i32_0 : i32, i32
  }
  func.func @transform_6(%arg0: i32) -> (i32, i32) {
    %c0_i32 = arith.constant 0 : i32
    %c0_i32_0 = arith.constant 0 : i32
    %c0_i32_1 = arith.constant 0 : i32
    return %c0_i32, %c0_i32_0 : i32, i32
  }
  func.func @transform_7(%arg0: i32) -> (i32, i32) {
    %c0_i32 = arith.constant 0 : i32
    %c0_i32_0 = arith.constant 0 : i32
    %c0_i32_1 = arith.constant 0 : i32
    return %c0_i32, %c0_i32_0 : i32, i32
  }
  func.func @transform_8(%arg0: i32) -> (i32, i32) {
    %c0_i32 = arith.constant 0 : i32
    %c0_i32_0 = arith.constant 0 : i32
    %c0_i32_1 = arith.constant 0 : i32
    return %c0_i32, %c0_i32_0 : i32, i32
  }
  func.func @transform_9(%arg0: i32) -> (i32, i32, i32) {
    %c0_i32 = arith.constant 0 : i32
    %c0_i32_0 = arith.constant 0 : i32
    %c0_i32_1 = arith.constant 0 : i32
    return %arg0, %c0_i32, %c0_i32_0 : i32, i32, i32
  }
}

</mosaic_0001>

<bundles_post_ra>
// kernel: tpu_custom_call.1
= control target key start
LH: loop header
LB: loop body
LE: loop exit
PB: predicated region body
PF: predicated region fallthrough
CT: control target
= control target key end

     0   :  { %s8530_s0 = inlined_call_operand.hbm [shape: f32[16,8,32], index: 0, kind: input, shape index: {}]   ;;  %s8531_s1 = inlined_call_operand.hbm [shape: bf16[32,96], index: 1, kind: input, shape index: {}]   ;;  %s8532_s2 = inlined_call_operand.hbm [shape: f32[1,96], index: 2, kind: input, shape index: {}]   ;;  %s8533_s3 = inlined_call_operand.hbm [shape: bf16[4,8,32], index: 3, kind: input, shape index: {}]   ;;  %s8534_s4 = inlined_call_operand.hbm [shape: f32[1,32], index: 4, kind: input, shape index: {}]   ;;  %s8535_s5 = inlined_call_operand.hbm [shape: bf16[32,128], index: 5, kind: input, shape index: {}]   ;;  %s8536_s6 = inlined_call_operand.hbm [shape: f32[1,128], index: 6, kind: input, shape index: {}]   ;;  %s8537_s7 = inlined_call_operand.hbm [shape: bf16[128,32], index: 7, kind: input, shape index: {}]   ;;  %s8538_s8 = inlined_call_operand.hbm [shape: f32[1,32], index: 8, kind: input, shape index: {}]   ;;  %s8539_s9 = inlined_call_operand.hbm [shape: f32[16,8,32], index: 9, kind: output, shape index: {}]  }
   0x1   :  { %8547 = sst [smem:[#allocation27_spill]] %s8531_s1 }
   0x2   :  { %8548 = sst [smem:[#allocation28_spill]] %s8539_s9 }
   0x3   :  { %14 = vsyncpa [#allocation3], 0 }
   0x4   :  { %16 = vsyncpa [#allocation3 + $0x1], 0 }
   0x5   :  { %17 = vsyncpa [#allocation6], 0 }
   0x6   :  { %18 = vsyncpa [#allocation9], 0 }
   0x7   :  { %19 = vsyncpa [#allocation12], 0 }
   0x8   :  { %20 = vsyncpa [#allocation15], 0 }
   0x9   :  { %21 = vsyncpa [#allocation4], 0 }
   0xa   :  { %23 = vsyncpa [#allocation4 + $0x1], 0  ;;  %s6891_s30 = smov 0   ;;  %s6893_s10 = smov 0  }
   0xb   :  { %s6895_s11 = smov 0   ;;  %s6897_s12 = smov 0  }
   0xc LB: > { %s6818_s13 = smov [#allocation5]   ;;  %s6912_s15 = sadd.s32 4294967295, %s6816_s12   ;;  %s6816_s12 = sphi %s6897_s12, %s8582_s12   ;;  %s6812_s11 = sphi %s6895_s11, %s8581_s11   ;;  %s6808_s10 = sphi %s6893_s10, %s8580_s10   ;;  %s6804_s30 = sphi %s6891_s30, %s8579_s30  }
   0xd   : > { %s266_s14 = sshll.u32 %s6818_s13, 4  ;;  %p5301_p0 = scmp.ge.s32.totalorder %s6816_s12, 1  ;;  %s6917_s14 = int_to_ptr.vmem [resolvable:$true] %s266_s14 }
   0xe   : > { %p8541_p1 = scmp.eq.s32.totalorder %s6912_s15, 0  ;;  %p254_p2 = scmp.lt.s32.totalorder %s6816_s12, 3 }
   0xf   : > { %s6819_s17 = smov [#allocation8]   ;;  %s6820_s20 = smov [#allocation11]  }
  0x10   : > { %p6919_p3 = pnand %p5301_p0, %p254_p2  ;;  %s290_s18 = sshll.u32 %s6819_s17, 4  ;;  %s6932_s18 = int_to_ptr.vmem [resolvable:$true] %s290_s18 }
  0x11   : > { %s314_s21 = sshll.u32 %s6820_s20, 4  ;;  %s8551_s1 = sld [smem:[#allocation27_spill]]  ;;  %s6934_s21 = int_to_ptr.vmem [resolvable:$true] %s314_s21 }
  0x12   : > { %s8549_s16 = scalar_select %p6919_p3, 1, 0 }
  0x13   : > { %p6120_p5 = pneg %p6919_p3 }
  0x15   : > { %p6928_p6 = pnand %p6120_p5, %p8541_p1 }
  0x17   : > { %s6480_s24 = scalar_lea.hbm %s8551_s1, 256  ;;  %p6944_p8 = pneg %p6928_p6 }
  0x18   : > { %p6481_p7 = scmp.ne.s32.totalorder %s8551_s1, %s6480_s24  ;;  %p6487_p11 = scmp.lt.u32.totalorder %s6480_s24, %s8551_s1 }
  0x1a   : > { %p6483_p9 = pnand %p6944_p8, %p6481_p7 }
  0x1c   : > { %p6484_p10 = pneg %p6483_p9 }
  0x1e   : > { %p6489_p12 = pnand %p6487_p11, %p6484_p10 }
  0x20   : > { %6492 = shalt.err (!%p6489_p12)
}
  0x21   : > { %s6493_s13 = scalar_lea.vmem %s6917_s14, 256  ;;  %p6501_p5 = scmp.lt.s32.totalorder %s6917_s14, %s6917_s14 }
  0x22   : > { %p6494_p13 = scmp.ne.s32.totalorder %s6917_s14, %s6493_s13  ;;  %p6502_p4 = scmp.lt.s32.totalorder %s6493_s13, %s6493_s13 }
  0x24   : > { %p6496_p0 = pnand %p6494_p13, %p6944_p8  ;;  %p6503_p7 = por %p6502_p4, %p6501_p5 }
  0x26   : > { %p6497_p2 = pneg %p6496_p0 }
  0x28   : > { %p6504_p9 = pnand %p6503_p7, %p6497_p2 }
  0x2a   : > { %6507 = shalt.err (!%p6504_p9)
}
  0x2b   : > { %s6821_s17 = smov 64   ;;  %s6822_s20 = smov 4  }
  0x2c   : > { %6123 = dma.hbm_to_vmem [thread:$0]  (!%p6928_p6), %s8551_s1, 256, %s6917_s14, [#allocation6], %s6821_s17, %s6821_s17, %s6822_s20  }
  0x2d   : > { %s6508_s26 = scalar_lea.hbm %s8533_s3, 256 }
  0x2e   : > { %p6509_p4 = scmp.ne.s32.totalorder %s8533_s3, %s6508_s26  ;;  %p6515_p12 = scmp.lt.u32.totalorder %s6508_s26, %s8533_s3 }
  0x30   : > { %p6511_p10 = pnand %p6509_p4, %p6944_p8 }
  0x32   : > { %p6512_p11 = pneg %p6511_p10 }
  0x34   : > { %p6517_p13 = pnand %p6515_p12, %p6512_p11 }
  0x36   : > { %6520 = shalt.err (!%p6517_p13)
}
  0x37   : > { %s6521_s14 = scalar_lea.vmem %s6932_s18, 256  ;;  %p6529_p7 = scmp.lt.s32.totalorder %s6932_s18, %s6932_s18 }
  0x38   : > { %p6522_p0 = scmp.ne.s32.totalorder %s6932_s18, %s6521_s14  ;;  %p6530_p9 = scmp.lt.s32.totalorder %s6521_s14, %s6521_s14 }
  0x3a   : > { %p6524_p2 = pnand %p6522_p0, %p6944_p8  ;;  %p6531_p4 = por %p6530_p9, %p6529_p7 }
  0x3c   : > { %p6525_p5 = pneg %p6524_p2 }
  0x3e   : > { %p6532_p10 = pnand %p6531_p4, %p6525_p5 }
  0x40   : > { %6535 = shalt.err (!%p6532_p10)
}
  0x41   : > { %6129 = dma.hbm_to_vmem [thread:$0]  (!%p6928_p6), %s8533_s3, 256, %s6932_s18, [#allocation9], %s6821_s17, %s6821_s17, %s6822_s20  }
  0x42   : > { %s6536_s25 = scalar_lea.hbm %s8535_s5, 256 }
  0x43   : > { %p6537_p11 = scmp.ne.s32.totalorder %s8535_s5, %s6536_s25  ;;  %p6543_p0 = scmp.lt.u32.totalorder %s6536_s25, %s8535_s5 }
  0x45   : > { %p6539_p12 = pnand %p6537_p11, %p6944_p8 }
  0x47   : > { %p6540_p13 = pneg %p6539_p12 }
  0x49   : > { %p6545_p2 = pnand %p6543_p0, %p6540_p13 }
  0x4b   : > { %6548 = shalt.err (!%p6545_p2)
}
  0x4c   : > { %s6549_s18 = scalar_lea.vmem %s6934_s21, 256  ;;  %p6557_p4 = scmp.lt.s32.totalorder %s6934_s21, %s6934_s21 }
  0x4d   : > { %p6550_p5 = scmp.ne.s32.totalorder %s6934_s21, %s6549_s18  ;;  %p6558_p10 = scmp.lt.s32.totalorder %s6549_s18, %s6549_s18 }
  0x4f   : > { %p6552_p7 = pnand %p6550_p5, %p6944_p8  ;;  %p6559_p11 = por %p6558_p10, %p6557_p4 }
  0x51   : > { %p6553_p9 = pneg %p6552_p7 }
  0x53   : > { %p6560_p12 = pnand %p6559_p11, %p6553_p9 }
  0x55   : > { %6563 = shalt.err (!%p6560_p12)
}
  0x56   : > { %6135 = dma.hbm_to_vmem [thread:$0]  (!%p6928_p6), %s8535_s5, 256, %s6934_s21, [#allocation12], %s6821_s17, %s6821_s17, %s6822_s20  }
  0x57   : > { %s6823_s22 = smov [#allocation14]   ;;  %s6824_s24 = smov [#allocation7]  }
  0x58   : > { %s338_s23 = sshll.u32 %s6823_s22, 4  ;;  %s280_s25 = sshll.u32 %s6824_s24, 4  ;;  %s339_s23 = int_to_ptr.vmem [resolvable:$true] %s338_s23  ;;  %s281_s25 = int_to_ptr.vmem [resolvable:$true] %s280_s25 }
  0x59   : > { %s6564_s29 = scalar_lea.hbm %s8537_s7, 1024 }
  0x5a   : > { %p6565_p13 = scmp.ne.s32.totalorder %s8537_s7, %s6564_s29  ;;  %p6571_p5 = scmp.lt.u32.totalorder %s6564_s29, %s8537_s7 }
  0x5c   : > { %p6567_p0 = pnand %p6565_p13, %p6944_p8 }
  0x5e   : > { %p6568_p2 = pneg %p6567_p0 }
  0x60   : > { %p6573_p7 = pnand %p6571_p5, %p6568_p2 }
  0x62   : > { %6576 = shalt.err (!%p6573_p7)
}
  0x63   : > { %s6577_s21 = scalar_lea.vmem %s339_s23, 1024  ;;  %p6585_p11 = scmp.lt.s32.totalorder %s339_s23, %s339_s23 }
  0x64   : > { %p6578_p9 = scmp.ne.s32.totalorder %s339_s23, %s6577_s21  ;;  %p6586_p12 = scmp.lt.s32.totalorder %s6577_s21, %s6577_s21 }
  0x66   : > { %p6580_p4 = pnand %p6578_p9, %p6944_p8  ;;  %p6587_p1 = por %p6586_p12, %p6585_p11 }
  0x68   : > { %p6581_p10 = pneg %p6580_p4 }
  0x6a   : > { %p6588_p3 = pnand %p6587_p1, %p6581_p10 }
  0x6c   : > { %6591 = shalt.err (!%p6588_p3)
}
  0x6d   : > { %6141 = dma.hbm_to_vmem [thread:$0]  (!%p6928_p6), %s8537_s7, 1024, %s339_s23, [#allocation15], %s6821_s17, %s6821_s17, %s6822_s20  }
  0x6e   : > { %s6592_s26 = scalar_lea.hbm %s8532_s2, 16 }
  0x6f   : > { %p6593_p1 = scmp.ne.s32.totalorder %s8532_s2, %s6592_s26  ;;  %p6599_p0 = scmp.lt.u32.totalorder %s6592_s26, %s8532_s2 }
  0x71   : > { %p6595_p3 = pnand %p6593_p1, %p6944_p8 }
  0x73   : > { %p6596_p13 = pneg %p6595_p3 }
  0x75   : > { %p6601_p2 = pnand %p6599_p0, %p6596_p13 }
  0x77   : > { %6604 = shalt.err (!%p6601_p2)
}
  0x78   : > { %s6605_s14 = scalar_lea.vmem %s281_s25, 16  ;;  %s6612_s17 = scalar_lea.vmem %s281_s25, 32 }
  0x79   : > { %p6606_p5 = scmp.ne.s32.totalorder %s281_s25, %s6605_s14  ;;  %p6613_p4 = scmp.lt.s32.totalorder %s281_s25, %s281_s25 }
  0x7a   : > { %p6614_p10 = scmp.lt.s32.totalorder %s6612_s17, %s6605_s14 }
  0x7b   : > { %p6608_p7 = pnand %p6606_p5, %p6944_p8 }
  0x7c   : > { %p6615_p11 = por %p6614_p10, %p6613_p4 }
  0x7d   : > { %p6609_p9 = pneg %p6608_p7 }
  0x7f   : > { %p6616_p12 = pnand %p6615_p11, %p6609_p9 }
  0x81   : > { %6619 = shalt.err (!%p6616_p12)
}
  0x82   : > { %6126 = dma.hbm_to_vmem [thread:$0]  (!%p6928_p6), %s8532_s2, 16, %s281_s25, [#allocation6]  }
  0x83   : > { %s6825_s21 = smov [#allocation10]   ;;  %s6826_s9 = smov [#allocation13]  }
  0x84   : > { %s304_s1 = sshll.u32 %s6825_s21, 4  ;;  %s328_s22 = sshll.u32 %s6826_s9, 4  ;;  %s305_s1 = int_to_ptr.vmem [resolvable:$true] %s304_s1  ;;  %s329_s22 = int_to_ptr.vmem [resolvable:$true] %s328_s22 }
  0x85   : > { %s6620_s28 = scalar_lea.hbm %s8534_s4, 16 }
  0x86   : > { %p6621_p1 = scmp.ne.s32.totalorder %s8534_s4, %s6620_s28  ;;  %p6627_p0 = scmp.lt.u32.totalorder %s6620_s28, %s8534_s4 }
  0x88   : > { %p6623_p3 = pnand %p6621_p1, %p6944_p8 }
  0x8a   : > { %p6624_p13 = pneg %p6623_p3 }
  0x8c   : > { %p6629_p2 = pnand %p6627_p0, %p6624_p13 }
  0x8e   : > { %6632 = shalt.err (!%p6629_p2)
}
  0x8f   : > { %s6633_s25 = scalar_lea.vmem %s305_s1, 16  ;;  %s6640_s17 = scalar_lea.vmem %s305_s1, 32 }
  0x90   : > { %p6634_p5 = scmp.ne.s32.totalorder %s305_s1, %s6633_s25  ;;  %p6641_p4 = scmp.lt.s32.totalorder %s305_s1, %s305_s1 }
  0x91   : > { %p6642_p10 = scmp.lt.s32.totalorder %s6640_s17, %s6633_s25 }
  0x92   : > { %p6636_p7 = pnand %p6634_p5, %p6944_p8 }
  0x93   : > { %p6643_p11 = por %p6642_p10, %p6641_p4 }
  0x94   : > { %p6637_p9 = pneg %p6636_p7 }
  0x96   : > { %p6644_p12 = pnand %p6643_p11, %p6637_p9 }
  0x98   : > { %6647 = shalt.err (!%p6644_p12)
}
  0x99   : > { %6132 = dma.hbm_to_vmem [thread:$0]  (!%p6928_p6), %s8534_s4, 16, %s305_s1, [#allocation9]  }
  0x9a   : > { %s6648_s24 = scalar_lea.hbm %s8536_s6, 16 }
  0x9b   : > { %p6649_p1 = scmp.ne.s32.totalorder %s8536_s6, %s6648_s24  ;;  %p6655_p0 = scmp.lt.u32.totalorder %s6648_s24, %s8536_s6 }
  0x9d   : > { %p6651_p3 = pnand %p6649_p1, %p6944_p8 }
  0x9f   : > { %p6652_p13 = pneg %p6651_p3 }
  0xa1   : > { %p6657_p2 = pnand %p6655_p0, %p6652_p13 }
  0xa3   : > { %6660 = shalt.err (!%p6657_p2)
}
  0xa4   : > { %s6661_s18 = scalar_lea.vmem %s329_s22, 16  ;;  %s6668_s1 = scalar_lea.vmem %s329_s22, 32 }
  0xa5   : > { %p6662_p5 = scmp.ne.s32.totalorder %s329_s22, %s6661_s18  ;;  %p6669_p4 = scmp.lt.s32.totalorder %s329_s22, %s329_s22 }
  0xa6   : > { %p6670_p10 = scmp.lt.s32.totalorder %s6668_s1, %s6661_s18 }
  0xa7   : > { %p6664_p7 = pnand %p6662_p5, %p6944_p8 }
  0xa8   : > { %p6671_p11 = por %p6670_p10, %p6669_p4 }
  0xa9   : > { %p6665_p9 = pneg %p6664_p7 }
  0xab   : > { %p6672_p12 = pnand %p6671_p11, %p6665_p9 }
  0xad   : > { %6675 = shalt.err (!%p6672_p12)
}
  0xae   : > { %6138 = dma.hbm_to_vmem [thread:$0]  (!%p6928_p6), %s8536_s6, 16, %s329_s22, [#allocation12]  }
  0xaf   : > { %s6827_s17 = smov [#allocation16]   ;;  %s6676_s9 = scalar_lea.hbm %s8538_s8, 16 }
  0xb0   : > { %s352_s20 = sshll.u32 %s6827_s17, 4  ;;  %p6677_p1 = scmp.ne.s32.totalorder %s8538_s8, %s6676_s9  ;;  %s353_s20 = int_to_ptr.vmem [resolvable:$true] %s352_s20 }
  0xb1   : > { %p6683_p0 = scmp.lt.u32.totalorder %s6676_s9, %s8538_s8 }
  0xb2   : > { %p6679_p3 = pnand %p6677_p1, %p6944_p8 }
  0xb4   : > { %p6680_p13 = pneg %p6679_p3 }
  0xb6   : > { %p6685_p2 = pnand %p6683_p0, %p6680_p13 }
  0xb8   : > { %6688 = shalt.err (!%p6685_p2)
}
  0xb9   : > { %s6689_s22 = scalar_lea.vmem %s353_s20, 16  ;;  %s6696_s13 = scalar_lea.vmem %s353_s20, 32 }
  0xba   : > { %p6690_p5 = scmp.ne.s32.totalorder %s353_s20, %s6689_s22  ;;  %p6697_p4 = scmp.lt.s32.totalorder %s353_s20, %s353_s20 }
  0xbb   : > { %p6698_p10 = scmp.lt.s32.totalorder %s6696_s13, %s6689_s22 }
  0xbc   : > { %p6692_p7 = pnand %p6690_p5, %p6944_p8 }
  0xbd   : > { %p6699_p11 = por %p6698_p10, %p6697_p4 }
  0xbe   : > { %p6693_p9 = pneg %p6692_p7 }
  0xc0   : > { %p6700_p12 = pnand %p6699_p11, %p6693_p9 }
  0xc2   : > { %6703 = shalt.err (!%p6700_p12)
}
  0xc3   : > { %6144 = dma.hbm_to_vmem [thread:$0]  (!%p6928_p6), %s8538_s8, 16, %s353_s20, [#allocation15]  }
  0xc4   : > { %s5300_s27 = sadd.s32 4294967294, %s6816_s12   ;;  %s7115_s19 = sadd.s32 1, %s6816_s12  }
  0xc5   : > { %s33_s14 = ssub.s32 %s6816_s12, %s7115_s19  ;;  %s36_s25 = sadd.s32 1, %s6812_s11 }
  0xc6   : > { %p34_p8 = scmp.eq.s32.totalorder %s33_s14, 0  ;;  %p43_p1 = scmp.ne.s32.totalorder %s6812_s11, %s6808_s10 }
  0xc7   : > { %p44_p3 = scmp.eq.s32.totalorder %s6816_s12, 0  ;;  %p49_p13 = scmp.ne.s32.totalorder %s6808_s10, %s6804_s30 }
  0xc8   : > { %s7126_s17 = scalar_select %p34_p8, %s6812_s11, %s36_s25  }
  0xc9   : > { %p7128_p0 = por %p44_p3, %p43_p1  ;;  %p8554_p2 = scmp.eq.s32.totalorder %s6912_s15, 0 }
  0xca   : > { %p241_p5 = scmp.eq.s32.totalorder %s6912_s15, 1  ;;  %p247_p7 = scmp.eq.s32.totalorder %s5300_s27, 1 }
  0xcb   : > { %p7134_p6 = por %p8554_p2, %p49_p13  ;;  %p6161_p9 = scmp.lt.s32.totalorder %s6816_s12, 2 }
  0xcc   : > { %s363_s21 = sand.u32 1, %s6812_s11   ;;  %p7141_p4 = por %p241_p5, %p43_p1 }
  0xcd   : > { %p7145_p10 = por %p247_p7, %p49_p13  ;;  %s5311_s26 = sshll.u32 %s363_s21, 6 }
  0xce   : > { %s8556_s9 = scalar_select %p7141_p4, 1, 0 }
  0xcf   : > { %s8557_s24 = scalar_select %p7145_p10, 1, 0 }
  0xd0   : > { %s5434_s28 = sshll.u32 %s6816_s12, 10  ;;  %s367_s18 = scalar_lea.vmem [#allocation2], %s5311_s26 }
  0xd1   : > { %s7153_s13 = scalar_lea.hbm %s8530_s0, %s5434_s28  ;;  %s374_s1 = sshll.u32 %s367_s18, 4  ;;  %s7155_s1 = int_to_ptr.vmem [resolvable:$true] %s374_s1 }
  0xd2   : > { %p7159_p11 = pnand %p6161_p9, %p7128_p0  ;;  %s7163_s14 = scalar_lea.sflag [#allocation3], %s363_s21 }
  0xd3   : > { %s6704_s25 = scalar_lea.hbm %s7153_s13, 1024  ;;  %s6709_s23 = scalar_lea.hbm %s8530_s0, 2048 }
  0xd4   : > { %p6705_p12 = scmp.ne.s32.totalorder %s7153_s13, %s6704_s25  ;;  %p6706_p8 = pneg %p7159_p11 }
  0xd5   : > { %p6710_p13 = scmp.lt.u32.totalorder %s7153_s13, %s8530_s0  ;;  %p6711_p0 = scmp.lt.u32.totalorder %s6709_s23, %s6704_s25 }
  0xd6   : > { %p6707_p1 = pnand %p6706_p8, %p6705_p12  ;;  %p6713_p5 = scmp.lt.u32.totalorder %s6704_s25, %s7153_s13 }
  0xd7   : > { %p6712_p2 = por %p6711_p0, %p6710_p13 }
  0xd8   : > { %p6708_p3 = pneg %p6707_p1 }
  0xd9   : > { %p6714_p7 = por %p6713_p5, %p6712_p2 }
  0xdb   : > { %p6715_p9 = pnand %p6714_p7, %p6708_p3 }
  0xdd   : > { %6718 = shalt.err (!%p6715_p9)
}
  0xde   : > { %s6719_s21 = scalar_lea.vmem %s7155_s1, 1024  ;;  %s6828_s18 = smov [#allocation2]  }
  0xdf   : > { %p6720_p12 = scmp.ne.s32.totalorder %s7155_s1, %s6719_s21  ;;  %s6724_s26 = sshll.u32 %s6828_s18, 4  ;;  %s6725_s26 = int_to_ptr.vmem [resolvable:$false] %s6724_s26 }
  0xe0   : > { %s6726_s28 = scalar_lea.vmem %s6725_s26, 2048  ;;  %p6727_p4 = scmp.lt.s32.totalorder %s7155_s1, %s6725_s26 }
  0xe1   : > { %p6722_p1 = pnand %p6720_p12, %p6706_p8  ;;  %p6728_p13 = scmp.lt.s32.totalorder %s6726_s28, %s6719_s21 }
  0xe3   : > { %p6723_p10 = pneg %p6722_p1  ;;  %p6729_p0 = por %p6728_p13, %p6727_p4 }
  0xe5   : > { %p6730_p2 = pnand %p6729_p0, %p6723_p10 }
  0xe7   : > { %6733 = shalt.err (!%p6730_p2)
}
  0xe8   : > { %s6829_s25 = smov 128   ;;  %s6830_s23 = smov 8  }
  0xe9   : > { %6148 = dma.hbm_to_vmem [thread:$0]  (!%p7159_p11), %s7153_s13, 1024, %s7155_s1, %s7163_s14, %s6829_s25, %s6829_s25, %s6830_s23  }
  0xea   : > { %p8559_p8 = scmp.ne.s32.totalorder %s8549_s16, 0 }
  0xec   : > { %386 = sbr.rel (%p8559_p8) target bundleno = 2840 (0xb18), region = 56 }
  0xf3   : > { %s7194_s29 = sand.u32 1, %s6808_s10  }
  0xf4   : > { %s5315_s22 = sshll.u32 %s7194_s29, 6  ;;  %s389_s21 = scalar_lea.sflag [#allocation3], %s7194_s29 }
  0xf5   : > { %s7200_s18 = scalar_lea.vmem [#allocation2], %s5315_s22 }
  0xf6   : > { %6779 = dma.done.wait (%p7134_p6), %s389_s21, 1024  }
  0xf7   : > { %6781 = vsyncadd (%p7134_p6), %s389_s21, 4294966272  ;;  %p8560_p4 = scmp.eq.s32.totalorder %s6912_s15, 0 }
  0xf9   : > { %6783 = dma.done.wait (%p8560_p4), [#allocation6], 272   ;;  %p8561_p10 = pmov %p8560_p4 }
  0xfa   : > { %p8562_p11 = pmov %p8560_p4 }
  0xfb   : > { %6785 = vsyncadd (%p8561_p10), [#allocation6], 4294967024 }
  0xfc   : > { %6787 = dma.done.wait (%p8562_p11), [#allocation9], 272   ;;  %p8563_p3 = pmov %p8560_p4 }
  0xfe   : > { %6789 = vsyncadd (%p8563_p3), [#allocation9], 4294967024  ;;  %p8564_p5 = pmov %p8563_p3 }
  0xff   : > { %p8565_p7 = pmov %p8563_p3 }
 0x100   : > { %6791 = dma.done.wait (%p8564_p5), [#allocation12], 272  }
 0x101   : > { %6793 = vsyncadd (%p8565_p7), [#allocation12], 4294967024  ;;  %p8566_p6 = pmov %p8563_p3 }
 0x102   : > { %p8567_p9 = pmov %p8563_p3 }
 0x103   : > { %6795 = dma.done.wait (%p8566_p6), [#allocation15], 1040  }
 0x104   : > { %6797 = vsyncadd (%p8567_p9), [#allocation15], 4294966256  ;;  %vm470_vm0 = vcmask 261120   ;;  %v462_v0 = vld [vmem:[%s7200_s18] sm:$0xff]  ;;  %v464_v1 = vld [vmem:[%s7200_s18 + $0x10] sm:$0xff]  ;;  %vm6832_vm1 = vmmov 0  }
 0x105   : > { %v463_v2 = vld [vmem:[%s7200_s18 + $0x8] sm:$0xff]  ;;  %v471_v3 = vsel %vm470_vm0, %v462_v0, 0.0  ;;  %v477_v4 = vsel %vm470_vm0, %v464_v1, 0.0  ;;  %v465_v5 = vld [vmem:[%s7200_s18 + $0x18] sm:$0xff]  ;;  %v466_v6 = vld [vmem:[%s7200_s18 + $0x20] sm:$0xff]  ;;  %s6833_s16 = smov 120  }
 0x106   : > { %v467_v7 = vld [vmem:[%s7200_s18 + $0x28] sm:$0xff]  ;;  %472 = vadd.xlane.f32.xlu0 %v471_v3  ;;  %478 = vadd.xlane.f32.xlu1 %v477_v4  ;;  %v474_v8 = vsel %vm470_vm0, %v463_v2, 0.0  ;;  %v480_v9 = vsel %vm470_vm0, %v465_v5, 0.0  ;;  %v483_v10 = vsel %vm470_vm0, %v466_v6, 0.0  ;;  %v468_v12 = vld [vmem:[%s7200_s18 + $0x30] sm:$0xff]  ;;  %v469_v13 = vld [vmem:[%s7200_s18 + $0x38] sm:$0xff] }
 0x107   : > { %v486_v11 = vsel %vm470_vm0, %v467_v7, 0.0  ;;  %v489_v14 = vsel %vm470_vm0, %v468_v12, 0.0  ;;  %v492_v15 = vsel %vm470_vm0, %v469_v13, 0.0  ;;  %v6284_v56 = vld [vmem:[#allocation5] sm:$0xff]   ;;  %v6285_v57 = vld [vmem:[#allocation5 + $0x8] sm:$0xff]   ;;  %s6834_s20 = smov 96  }
 0x108   : > { %5608 = vmatprep.subr.bf16.mxu0 %v6284_v56  ;;  %s6835_s13 = smov 112   ;;  %vm795_vm2 = vcmask 64512   ;;  %s6836_s1 = smov 104   ;;  %vm2686_vm3 = vcmask 1043456  }
 0x109   : > { %5609 = vmatpush3.bf16.msra.mxu0 %v6284_v56  ;;  %s6837_s27 = smov 64   ;;  %s458_s14 = scalar_lea.vmem [#allocation17], %s5315_s22 }
 0x10a   : > { %475 = vadd.xlane.f32.xlu0 %v474_v8  ;;  %481 = vadd.xlane.f32.xlu1 %v480_v9  ;;  %s5435_s26 = sshll.u32 %s6912_s15, 10  ;;  %s5151_s28 = sshll.u32 %s458_s14, 4  ;;  %s8482_s28 = int_to_ptr.vmem [resolvable:$true] %s5151_s28 }
 0x10b   : > { %5610 = vmatprep.subr.bf16.mxu0 %v6285_v57  ;;  %s8575_s22 = sld [smem:[#allocation28_spill]]  ;;  %s5138_s15 = scalar_lea.sflag [#allocation4], %s7194_s29 }
 0x10c   : > { %p8576_p1 = scmp.ne.s32.totalorder %s8556_s9, 0 }
 0x10d   : > { %5611 = vmatpush3.bf16.msra.mxu0 %v6285_v57 }
 0x10e   : > { %484 = vadd.xlane.f32.xlu0 %v483_v10  ;;  %487 = vadd.xlane.f32.xlu1 %v486_v11 }
 0x111   : > { %s8480_s21 = scalar_lea.hbm %s8575_s22, %s5435_s26 }
 0x112   : > { %490 = vadd.xlane.f32.xlu0 %v489_v14  ;;  %493 = vadd.xlane.f32.xlu1 %v492_v15 }
 0x193   : > { %v473_v16 = vpop.xlane.xlu0 %472  ;;  %v479_v17 = vpop.xlane.xlu1 %478 }
 0x194   : > { %v496_v18 = vmul.f32 0.03125, %v473_v16  ;;  %v498_v19 = vmul.f32 0.03125, %v479_v17 }
 0x196   : > { %v7238_v20 = vsub.f32 %v462_v0, %v496_v18  ;;  %v7240_v21 = vsub.f32 %v464_v1, %v498_v19 }
 0x197   : > { %v476_v22 = vpop.xlane.xlu0 %475  ;;  %v482_v23 = vpop.xlane.xlu1 %481 }
 0x198   : > { %v497_v24 = vmul.f32 0.03125, %v476_v22  ;;  %v499_v25 = vmul.f32 0.03125, %v482_v23  ;;  %v512_v26 = vmul.f32 %v7238_v20, %v7238_v20  ;;  %v514_v27 = vmul.f32 %v7240_v21, %v7240_v21 }
 0x19a   : > { %v7246_v28 = vsub.f32 %v463_v2, %v497_v24  ;;  %v7248_v29 = vsub.f32 %v465_v5, %v499_v25  ;;  %v520_v30 = vsel %vm470_vm0, %v512_v26, 0.0  ;;  %v526_v33 = vsel %vm470_vm0, %v514_v27, 0.0 }
 0x19b   : > { %521 = vadd.xlane.f32.xlu0 %v520_v30  ;;  %v485_v31 = vpop.xlane.xlu0 %484  ;;  %v488_v32 = vpop.xlane.xlu1 %487 }
 0x19c   : > { %v500_v34 = vmul.f32 0.03125, %v485_v31  ;;  %v501_v35 = vmul.f32 0.03125, %v488_v32  ;;  %v513_v36 = vmul.f32 %v7246_v28, %v7246_v28  ;;  %v515_v37 = vmul.f32 %v7248_v29, %v7248_v29 }
 0x19e   : > { %v7256_v38 = vsub.f32 %v466_v6, %v500_v34  ;;  %v7258_v39 = vsub.f32 %v467_v7, %v501_v35  ;;  %v523_v40 = vsel %vm470_vm0, %v513_v36, 0.0  ;;  %v529_v43 = vsel %vm470_vm0, %v515_v37, 0.0 }
 0x19f   : > { %527 = vadd.xlane.f32.xlu0 %v526_v33  ;;  %524 = vadd.xlane.f32.xlu1 %v523_v40  ;;  %v491_v41 = vpop.xlane.xlu0 %490  ;;  %v494_v42 = vpop.xlane.xlu1 %493 }
 0x1a0   : > { %v502_v44 = vmul.f32 0.03125, %v491_v41  ;;  %v503_v45 = vmul.f32 0.03125, %v494_v42  ;;  %v516_v46 = vmul.f32 %v7256_v38, %v7256_v38  ;;  %v517_v47 = vmul.f32 %v7258_v39, %v7258_v39  ;;  %v5325_v41 = vld [vmem:[#allocation7] ss:$0 sm:$0xff] }
 0x1a1   : > { %v8544_v42 = vmov 0.0  }
 0x1a2   : > { %v7266_v48 = vsub.f32 %v468_v12, %v502_v44  ;;  %v7268_v49 = vsub.f32 %v469_v13, %v503_v45  ;;  %v532_v50 = vsel %vm470_vm0, %v516_v46, 0.0  ;;  %v535_v51 = vsel %vm470_vm0, %v517_v47, 0.0  ;;  %5620 = vmatprep.subr.bf16.mxu0 %v8544_v42  ;;  %5626 = vmatprep.subr.bf16.mxu1 %v8544_v42 }
 0x1a3   : > { %530 = vadd.xlane.f32.xlu1 %v529_v43  ;;  %533 = vadd.xlane.f32.xlu0 %v532_v50 }
 0x1a4   : > { %v518_v52 = vmul.f32 %v7266_v48, %v7266_v48  ;;  %v519_v53 = vmul.f32 %v7268_v49, %v7268_v49  ;;  %5628 = vmatprep.mubr.msk.bf16.mxu1 %vm6832_vm1, %v8544_v42 }
 0x1a6   : > { %v538_v54 = vsel %vm470_vm0, %v518_v52, 0.0  ;;  %v541_v55 = vsel %vm470_vm0, %v519_v53, 0.0 }
 0x1a7   : > { %536 = vadd.xlane.f32.xlu1 %v535_v51  ;;  %539 = vadd.xlane.f32.xlu0 %v538_v54 }
 0x1ab   : > { %542 = vadd.xlane.f32.xlu1 %v541_v55 }
 0x228   : > { %v522_v58 = vpop.xlane.xlu0 %521 }
 0x229   : > { %v544_v59 = vmul.f32 0.03125, %v522_v58 }
 0x22b   : > { %v552_v60 = vadd.f32 1e-05, %v544_v59 }
 0x22c   : > { %v525_v61 = vpop.xlane.xlu1 %524  ;;  %v528_v62 = vpop.xlane.xlu0 %527 }
 0x22d   : > { %v545_v63 = vmul.f32 0.03125, %v525_v61  ;;  %v546_v0 = vmul.f32 0.03125, %v528_v62  ;;  %6296 = vrsqrt.f32 %v552_v60 }
 0x22f   : > { %v553_v1 = vadd.f32 1e-05, %v545_v63  ;;  %v554_v2 = vadd.f32 1e-05, %v546_v0 }
 0x230   : > { %v531_v3 = vpop.xlane.xlu1 %530  ;;  %v534_v4 = vpop.xlane.xlu0 %533 }
 0x231   : > { %6298 = vrsqrt.f32 %v553_v1  ;;  %v547_v5 = vmul.f32 0.03125, %v531_v3  ;;  %v548_v6 = vmul.f32 0.03125, %v534_v4 }
 0x232   : > { %6300 = vrsqrt.f32 %v554_v2 }
 0x233   : > { %v555_v7 = vadd.f32 1e-05, %v547_v5  ;;  %v556_v8 = vadd.f32 1e-05, %v548_v6 }
 0x234   : > { %v537_v9 = vpop.xlane.xlu1 %536  ;;  %v540_v10 = vpop.xlane.xlu0 %539 }
 0x235   : > { %6302 = vrsqrt.f32 %v555_v7  ;;  %v549_v11 = vmul.f32 0.03125, %v537_v9  ;;  %v550_v12 = vmul.f32 0.03125, %v540_v10 }
 0x236   : > { %6304 = vrsqrt.f32 %v556_v8 }
 0x237   : > { %v557_v13 = vadd.f32 1e-05, %v549_v11  ;;  %v558_v14 = vadd.f32 1e-05, %v550_v12  ;;  %v6297_v16 = vpop.eup %6296 }
 0x238   : > { %v543_v15 = vpop.xlane.xlu1 %542  ;;  %v568_v22 = vmul.f32 %v6297_v16, %v7238_v20 }
 0x239   : > { %6306 = vrsqrt.f32 %v557_v13  ;;  %v551_v17 = vmul.f32 0.03125, %v543_v15 }
 0x23a   : > { %6308 = vrsqrt.f32 %v558_v14 }
 0x23b   : > { %v6299_v18 = vpop.eup %6298  ;;  %v559_v19 = vadd.f32 1e-05, %v551_v17 }
 0x23c   : > { %v569_v23 = vmul.f32 %v6299_v18, %v7246_v28  ;;  %v6301_v24 = vpop.eup %6300 }
 0x23d   : > { %6310 = vrsqrt.f32 %v559_v19  ;;  %v570_v27 = vmul.f32 %v6301_v24, %v7240_v21 }
 0x23e   : > { %v576_v25 = vpack.c.bf16 %v569_v23, %v568_v22 }
 0x23f   : > { %v6303_v26 = vpop.eup %6302 }
 0x240   : > { %5612 = vmatprep.mubr.msk.bf16.mxu0 %vm470_vm0, %v576_v25  ;;  %v571_v30 = vmul.f32 %v6303_v26, %v7248_v29  ;;  %v6305_v31 = vpop.eup %6304 }
 0x241   : > { %v572_v34 = vmul.f32 %v6305_v31, %v7256_v38 }
 0x242   : > { %v577_v32 = vpack.c.bf16 %v571_v30, %v570_v27 }
 0x243   : > { %v6307_v33 = vpop.eup %6306 }
 0x244   : > { %5613 = vmatmul.mubr.msk.bf16.vlgmr.msra.gmra.mrb[0].mxu0 %vm470_vm0, %v577_v32  ;;  %v573_v20 = vmul.f32 %v6307_v33, %v7258_v39  ;;  %v6309_v28 = vpop.eup %6308 }
 0x245   : > { %v574_v37 = vmul.f32 %v6309_v28, %v7266_v48 }
 0x246   : > { %v578_v35 = vpack.c.bf16 %v573_v20, %v572_v34 }
 0x247   : > { %v6311_v36 = vpop.eup %6310 }
 0x248   : > { %5616 = vmatprep.mubr.msk.bf16.mxu0 %vm470_vm0, %v578_v35  ;;  %v575_v21 = vmul.f32 %v6311_v36, %v7268_v49 }
 0x24a   : > { %v579_v40 = vpack.c.bf16 %v575_v21, %v574_v37 }
 0x24c   : > { %5617 = vmatmul.mubr.msk.bf16.gmra.mrb[4].mxu0 %vm470_vm0, %v579_v40 }
 0x24d   : > { %5622 = vmatprep.mubr.msk.bf16.mxu0 %vm6832_vm1, %v8544_v42 }
 0x317   : > { %v5614_v29 = vpop.f32.mrb[0].mxu0 }
 0x318   : > { %v649_v38 = vpop.f32.mrb[1].mxu0  ;;  %v658_v43 = vadd.f32 %v5614_v29, %v5325_v41 }
 0x319   : > { %v5615_v39 = vpop.f32.mrb[2].mxu0  ;;  %v650_v46 = vadd.f32 %v5325_v41, %v649_v38 }
 0x31a   : > { %v661_v44 = vadd.f32 %v5615_v39, %v5325_v41  ;;  %v652_v45 = vpop.f32.mrb[3].mxu0  ;;  %v7321_v0 = vpack.c.bf16 %v658_v43, %v658_v43 }
 0x31b   : > { %v653_v47 = vadd.f32 %v5325_v41, %v652_v45  ;;  %v7299_v53 = vpack.c.bf16 %v650_v46, %v650_v46 }
 0x31c   : > { %v7296_v48 = vpack.i.bf16 %v661_v44, %v658_v43  ;;  %v7308_v61 = vpack.c.bf16 %v661_v44, %v661_v44 }
 0x31d   : > { %v6224_v49 = vpack.i.bf16 %v653_v47, %v650_v46  ;;  %v7313_v62 = vpack.c.bf16 %v653_v47, %v653_v47 }
 0x31e   : > { %6230 = vrot.lane.b32.xlu1 %v7296_v48, %s6833_s16 }
 0x31f   : > { %6225 = vrot.lane.b32.xlu0 %v6224_v49, %s6833_s16  ;;  %v5618_v50 = vpop.f32.mrb[4].mxu0 }
 0x320   : > { %v665_v51 = vpop.f32.mrb[5].mxu0  ;;  %v674_v54 = vadd.f32 %v5618_v50, %v5325_v41 }
 0x321   : > { %v5619_v52 = vpop.f32.mrb[6].mxu0  ;;  %v666_v57 = vadd.f32 %v5325_v41, %v665_v51 }
 0x322   : > { %v677_v55 = vadd.f32 %v5619_v52, %v5325_v41  ;;  %v668_v56 = vpop.f32.mrb[7].mxu0  ;;  %v7335_v3 = vpack.c.bf16 %v674_v54, %v674_v54 }
 0x323   : > { %v669_v58 = vadd.f32 %v5325_v41, %v668_v56  ;;  %793 = vrot.lane.b32.xlu0 %v7299_v53, %s6834_s20  ;;  %v7315_v63 = vpack.c.bf16 %v666_v57, %v666_v57 }
 0x324   : > { %v7303_v59 = vpack.i.bf16 %v677_v55, %v674_v54  ;;  %v7326_v1 = vpack.c.bf16 %v677_v55, %v677_v55 }
 0x325   : > { %v7305_v60 = vpack.i.bf16 %v669_v58, %v666_v57  ;;  %v7331_v2 = vpack.c.bf16 %v669_v58, %v669_v58 }
 0x327   : > { %6245 = vrot.lane.b32.xlu0 %v6224_v49, %s6835_s13  ;;  %6235 = vrot.lane.b32.xlu1 %v7305_v60, %s6833_s16 }
 0x32b   : > { %941 = vrot.lane.b32.xlu0 %v7308_v61, %s6834_s20  ;;  %6240 = vrot.lane.b32.xlu1 %v7303_v59, %s6833_s16  ;;  %s6838_s16 = smov [#allocation17]  }
 0x32f   : > { %843 = vrot.lane.b32.xlu1 %v7313_v62, %s6834_s20  ;;  %990 = vrot.lane.b32.xlu0 %v7315_v63, %s6834_s20 }
 0x333   : > { %892 = vrot.lane.b32.xlu1 %v7321_v0, %s6834_s20  ;;  %6255 = vrot.lane.b32.xlu0 %v7305_v60, %s6835_s13 }
 0x337   : > { %6250 = vrot.lane.b32.xlu1 %v7296_v48, %s6835_s13  ;;  %1137 = vrot.lane.b32.xlu0 %v7326_v1, %s6834_s20 }
 0x33b   : > { %1039 = vrot.lane.b32.xlu1 %v7331_v2, %s6834_s20 }
 0x33f   : > { %1088 = vrot.lane.b32.xlu1 %v7335_v3, %s6834_s20 }
 0x343   : > { %6260 = vrot.lane.b32.xlu1 %v7303_v59, %s6835_s13 }
 0x390   : > { %v6231_v4 = vpop.permute.xlu1 %6230 }
 0x391   : > { %v6226_v5 = vpop.permute.xlu0 %6225  ;;  %v6232_v8 = vunpack.i.l.bf16 %v6231_v4  ;;  %v6233_v14 = vunpack.i.h.bf16 %v6231_v4 }
 0x392   : > { %v6228_v6 = vunpack.i.h.bf16 %v6226_v5  ;;  %v6227_v7 = vunpack.i.l.bf16 %v6226_v5 }
 0x393   : > { %v7349_v13 = vpack.c.bf16 %v6232_v8, %v6232_v8  ;;  %v7355_v22 = vpack.c.bf16 %v6233_v14, %v6233_v14 }
 0x394   : > { %v7340_v9 = vpack.c.bf16 %v6228_v6, %v6228_v6  ;;  %v7342_v10 = vpack.c.bf16 %v6227_v7, %v6227_v7 }
 0x395   : > { %v794_v11 = vpop.permute.xlu0 %793 }
 0x396   : > { %v800_v12 = vsel %vm795_vm2, %v794_v11, 0  ;;  %1235 = vrot.lane.b32.xlu1 %v7340_v9, %s6834_s20  ;;  %1186 = vrot.lane.b32.xlu0 %v7342_v10, %s6834_s20 }
 0x397   : > { %5621 = vmatpush3.bf16.xpose.msra.mxu0 %v800_v12 }
 0x398   : > { %5632 = vmatprep.subr.bf16.mxu0 %v8544_v42 }
 0x399   : > { %v6236_v15 = vpop.permute.xlu1 %6235  ;;  %v6246_v16 = vpop.permute.xlu0 %6245 }
 0x39a   : > { %1284 = vrot.lane.b32.xlu1 %v7349_v13, %s6834_s20  ;;  %6265 = vrot.lane.b32.xlu0 %v6224_v49, %s6836_s1  ;;  %v6238_v17 = vunpack.i.h.bf16 %v6236_v15  ;;  %v6237_v18 = vunpack.i.l.bf16 %v6236_v15  ;;  %v6248_v28 = vunpack.i.h.bf16 %v6246_v16  ;;  %v6247_v35 = vunpack.i.l.bf16 %v6246_v16 }
 0x39c   : > { %v7365_v24 = vpack.c.bf16 %v6238_v17, %v6238_v17  ;;  %v7367_v27 = vpack.c.bf16 %v6237_v18, %v6237_v18  ;;  %v7392_v29 = vpack.c.bf16 %v6248_v28, %v6248_v28  ;;  %v7397_v43 = vpack.c.bf16 %v6247_v35, %v6247_v35 }
 0x39d   : > { %v6241_v19 = vpop.permute.xlu1 %6240  ;;  %v942_v25 = vpop.permute.xlu0 %941 }
 0x39e   : > { %5623 = vmatmul.mubr.msk.bf16.vlgmr.msra.gmra.mrb[8].mxu0 %vm795_vm2, %v7299_v53  ;;  %6270 = vrot.lane.b32.xlu1 %v7296_v48, %s6836_s1  ;;  %v6242_v23 = vunpack.i.l.bf16 %v6241_v19  ;;  %v6243_v32 = vunpack.i.h.bf16 %v6241_v19  ;;  %v947_v21 = vsel %vm795_vm2, %v942_v25, 0 }
 0x39f   : > { %1333 = vrot.lane.b32.xlu0 %v7355_v22, %s6834_s20  ;;  %5634 = vmatprep.mubr.msk.bf16.mxu0 %vm6832_vm1, %v8544_v42 }
 0x3a0   : > { %v7374_v31 = vpack.c.bf16 %v6242_v23, %v6242_v23  ;;  %v7383_v37 = vpack.c.bf16 %v6243_v32, %v6243_v32 }
 0x3a1   : > { %v844_v26 = vpop.permute.xlu1 %843  ;;  %v991_v20 = vpop.permute.xlu0 %990 }
 0x3a2   : > { %1431 = vrot.lane.b32.xlu1 %v7365_v24, %s6834_s20  ;;  %v849_v30 = vsel %vm795_vm2, %v844_v26, 0  ;;  %v996_v44 = vsel %vm795_vm2, %v991_v20, 0 }
 0x3a3   : > { %1382 = vrot.lane.b32.xlu0 %v7367_v27, %s6834_s20  ;;  %5627 = vmatpush3.bf16.xpose.msra.mxu1 %v849_v30 }
 0x3a4   : > { %5638 = vmatprep.subr.bf16.mxu1 %v8544_v42 }
 0x3a5   : > { %v893_v33 = vpop.permute.xlu1 %892  ;;  %v6256_v41 = vpop.permute.xlu0 %6255 }
 0x3a6   : > { %v898_v34 = vsel %vm795_vm2, %v893_v33, 0  ;;  %1480 = vrot.lane.b32.xlu1 %v7374_v31, %s6834_s20  ;;  %v6258_v45 = vunpack.i.h.bf16 %v6256_v41  ;;  %v6257_v47 = vunpack.i.l.bf16 %v6256_v41 }
 0x3a7   : > { %6275 = vrot.lane.b32.xlu0 %v7305_v60, %s6836_s1  ;;  %5633 = vmatpush3.bf16.xpose.msra.mxu0 %v898_v34 }
 0x3a8   : > { %5644 = vmatprep.subr.bf16.mxu0 %v8544_v42  ;;  %v7420_v51 = vpack.c.bf16 %v6258_v45, %v6258_v45  ;;  %v7425_v54 = vpack.c.bf16 %v6257_v47, %v6257_v47 }
 0x3a9   : > { %v6251_v36 = vpop.permute.xlu1 %6250  ;;  %v1138_v58 = vpop.permute.xlu0 %1137 }
 0x3aa   : > { %5629 = vmatmul.mubr.msk.bf16.vlgmr.msra.gmra.mrb[0].mxu1 %vm795_vm2, %v7313_v62  ;;  %6280 = vrot.lane.b32.xlu1 %v7303_v59, %s6836_s1  ;;  %v6253_v40 = vunpack.i.h.bf16 %v6251_v36  ;;  %v6252_v38 = vunpack.i.l.bf16 %v6251_v36  ;;  %v1143_v4 = vsel %vm795_vm2, %v1138_v58, 0 }
 0x3ab   : > { %1529 = vrot.lane.b32.xlu0 %v7383_v37, %s6834_s20  ;;  %5639 = vmatpush3.bf16.xpose.msra.mxu1 %v947_v21 }
 0x3ac   : > { %5640 = vmatprep.mubr.msk.bf16.mxu1 %vm6832_vm1, %v8544_v42  ;;  %5650 = vmatprep.subr.bf16.mxu1 %v8544_v42  ;;  %v7406_v46 = vpack.c.bf16 %v6253_v40, %v6253_v40  ;;  %v7411_v49 = vpack.c.bf16 %v6252_v38, %v6252_v38 }
 0x3ad   : > { %v1040_v39 = vpop.permute.xlu1 %1039 }
 0x3ae   : > { %5635 = vmatmul.mubr.msk.bf16.vlgmr.msra.gmra.mrb[12].mxu0 %vm795_vm2, %v7321_v0  ;;  %1627 = vrot.lane.b32.xlu1 %v7392_v29, %s6834_s20  ;;  %v1045_v50 = vsel %vm795_vm2, %v1040_v39, 0 }
 0x3af   : > { %1578 = vrot.lane.b32.xlu0 %v7397_v43, %s6834_s20  ;;  %5645 = vmatpush3.bf16.xpose.msra.mxu0 %v996_v44 }
 0x3b0   : > { %5646 = vmatprep.mubr.msk.bf16.mxu0 %vm6832_vm1, %v8544_v42  ;;  %5656 = vmatprep.subr.bf16.mxu0 %v8544_v42 }
 0x3b1   : > { %v1089_v48 = vpop.permute.xlu1 %1088 }
 0x3b2   : > { %5641 = vmatmul.mubr.msk.bf16.vlgmr.msra.gmra.mrb[4].mxu1 %vm795_vm2, %v7308_v61  ;;  %1725 = vrot.lane.b32.xlu1 %v7406_v46, %s6834_s20  ;;  %v1094_v55 = vsel %vm795_vm2, %v1089_v48, 0 }
 0x3b3   : > { %1676 = vrot.lane.b32.xlu0 %v7411_v49, %s6834_s20  ;;  %5651 = vmatpush3.bf16.xpose.msra.mxu1 %v1045_v50 }
 0x3b4   : > { %5652 = vmatprep.mubr.msk.bf16.mxu1 %vm6832_vm1, %v8544_v42  ;;  %5662 = vmatprep.subr.bf16.mxu1 %v8544_v42 }
 0x3b5   : > { %v6261_v52 = vpop.permute.xlu1 %6260 }
 0x3b6   : > { %v6263_v56 = vunpack.i.h.bf16 %v6261_v52  ;;  %v6262_v57 = vunpack.i.l.bf16 %v6261_v52  ;;  %5647 = vmatmul.mubr.msk.bf16.vlgmr.msra.gmra.mrb[16].mxu0 %vm795_vm2, %v7315_v63  ;;  %1823 = vrot.lane.b32.xlu1 %v7420_v51, %s6834_s20 }
 0x3b7   : > { %1774 = vrot.lane.b32.xlu0 %v7425_v54, %s6834_s20  ;;  %5657 = vmatpush3.bf16.xpose.msra.mxu0 %v1094_v55 }
 0x3b8   : > { %v7434_v59 = vpack.c.bf16 %v6263_v56, %v6263_v56  ;;  %v7436_v60 = vpack.c.bf16 %v6262_v57, %v6262_v57  ;;  %5658 = vmatprep.mubr.msk.bf16.mxu0 %vm6832_vm1, %v8544_v42  ;;  %5668 = vmatprep.subr.bf16.mxu0 %v8544_v42 }
 0x3ba   : > { %5653 = vmatmul.mubr.msk.bf16.vlgmr.msra.gmra.mrb[8].mxu1 %vm795_vm2, %v7331_v2  ;;  %1921 = vrot.lane.b32.xlu1 %v7434_v59, %s6834_s20 }
 0x3bb   : > { %1872 = vrot.lane.b32.xlu0 %v7436_v60, %s6834_s20  ;;  %5663 = vmatpush3.bf16.xpose.msra.mxu1 %v1143_v4 }
 0x3bc   : > { %5664 = vmatprep.mubr.msk.bf16.mxu1 %vm6832_vm1, %v8544_v42  ;;  %5674 = vmatprep.subr.bf16.mxu1 %v8544_v42 }
 0x3be   : > { %5659 = vmatmul.mubr.msk.bf16.vlgmr.msra.gmra.mrb[20].mxu0 %vm795_vm2, %v7335_v3 }
 0x3bf   : > { %5670 = vmatprep.mubr.msk.bf16.mxu0 %vm6832_vm1, %v8544_v42 }
 0x3c2   : > { %5665 = vmatmul.mubr.msk.bf16.vlgmr.msra.gmra.mrb[12].mxu1 %vm795_vm2, %v7326_v1 }
 0x3c3   : > { %5676 = vmatprep.mubr.msk.bf16.mxu1 %vm6832_vm1, %v8544_v42 }
 0x408   : > { %v1236_v5 = vpop.permute.xlu1 %1235  ;;  %v1187_v6 = vpop.permute.xlu0 %1186 }
 0x409   : > { %v1241_v7 = vsel %vm795_vm2, %v1236_v5, 0  ;;  %v1192_v8 = vsel %vm795_vm2, %v1187_v6, 0 }
 0x40a   : > { %5669 = vmatpush3.bf16.xpose.msra.mxu0 %v1192_v8  ;;  %5675 = vmatpush3.bf16.xpose.msra.mxu1 %v1241_v7 }
 0x40b   : > { %5680 = vmatprep.subr.bf16.mxu0 %v8544_v42  ;;  %5686 = vmatprep.subr.bf16.mxu1 %v8544_v42 }
 0x40c   : > { %v1285_v11 = vpop.permute.xlu1 %1284  ;;  %v6266_v12 = vpop.permute.xlu0 %6265 }
 0x40d   : > { %v6268_v14 = vunpack.i.h.bf16 %v6266_v12  ;;  %v6267_v15 = vunpack.i.l.bf16 %v6266_v12  ;;  %v1290_v26 = vsel %vm795_vm2, %v1285_v11, 0 }
 0x40f   : > { %v7463_v16 = vpack.c.bf16 %v6268_v14, %v6268_v14  ;;  %v7465_v17 = vpack.c.bf16 %v6267_v15, %v6267_v15 }
 0x410   : > { %v6271_v18 = vpop.permute.xlu1 %6270 }
 0x411   : > { %v6273_v19 = vunpack.i.h.bf16 %v6271_v18  ;;  %v6272_v23 = vunpack.i.l.bf16 %v6271_v18  ;;  %v1334_v25 = vpop.permute.xlu0 %1333  ;;  %5671 = vmatmul.mubr.msk.bf16.vlgmr.msra.gmra.mrb[24].mxu0 %vm795_vm2, %v7342_v10  ;;  %5677 = vmatmul.mubr.msk.bf16.vlgmr.msra.gmra.mrb[16].mxu1 %vm795_vm2, %v7340_v9 }
 0x412   : > { %v1339_v30 = vsel %vm795_vm2, %v1334_v25, 0  ;;  %2019 = vrot.lane.b32.xlu1 %v7463_v16, %s6834_s20  ;;  %1970 = vrot.lane.b32.xlu0 %v7465_v17, %s6834_s20 }
 0x413   : > { %5681 = vmatpush3.bf16.xpose.msra.mxu0 %v1290_v26  ;;  %5687 = vmatpush3.bf16.xpose.msra.mxu1 %v1339_v30  ;;  %v7477_v32 = vpack.c.bf16 %v6273_v19, %v6273_v19  ;;  %v7479_v33 = vpack.c.bf16 %v6272_v23, %v6272_v23 }
 0x414   : > { %v1432_v34 = vpop.permute.xlu1 %1431  ;;  %5688 = vmatprep.mubr.msk.bf16.mxu1 %vm6832_vm1, %v8544_v42  ;;  %5682 = vmatprep.mubr.msk.bf16.mxu0 %vm6832_vm1, %v8544_v42 }
 0x415   : > { %v1383_v20 = vpop.permute.xlu0 %1382  ;;  %5692 = vmatprep.subr.bf16.mxu0 %v8544_v42  ;;  %5698 = vmatprep.subr.bf16.mxu1 %v8544_v42  ;;  %v1437_v36 = vsel %vm795_vm2, %v1432_v34, 0 }
 0x416   : > { %2117 = vrot.lane.b32.xlu1 %v7477_v32, %s6834_s20  ;;  %2068 = vrot.lane.b32.xlu0 %v7479_v33, %s6834_s20  ;;  %v1388_v21 = vsel %vm795_vm2, %v1383_v20, 0 }
 0x418   : > { %v1481_v28 = vpop.permute.xlu1 %1480 }
 0x419   : > { %v6276_v35 = vpop.permute.xlu0 %6275  ;;  %v1486_v55 = vsel %vm795_vm2, %v1481_v28, 0 }
 0x41a   : > { %v6278_v40 = vunpack.i.h.bf16 %v6276_v35  ;;  %v6277_v41 = vunpack.i.l.bf16 %v6276_v35  ;;  %5683 = vmatmul.mubr.msk.bf16.vlgmr.msra.gmra.mrb[28].mxu0 %vm795_vm2, %v7349_v13  ;;  %5689 = vmatmul.mubr.msk.bf16.vlgmr.msra.gmra.mrb[20].mxu1 %vm795_vm2, %v7355_v22 }
 0x41b   : > { %5693 = vmatpush3.bf16.xpose.msra.mxu0 %v1388_v21  ;;  %5699 = vmatpush3.bf16.xpose.msra.mxu1 %v1437_v36 }
 0x41c   : > { %v6281_v38 = vpop.permute.xlu1 %6280  ;;  %v7497_v39 = vpack.c.bf16 %v6278_v40, %v6278_v40  ;;  %v7499_v44 = vpack.c.bf16 %v6277_v41, %v6277_v41  ;;  %5694 = vmatprep.mubr.msk.bf16.mxu0 %vm6832_vm1, %v8544_v42  ;;  %5700 = vmatprep.mubr.msk.bf16.mxu1 %vm6832_vm1, %v8544_v42 }
 0x41d   : > { %v6283_v45 = vunpack.i.h.bf16 %v6281_v38  ;;  %v6282_v47 = vunpack.i.l.bf16 %v6281_v38  ;;  %5704 = vmatprep.subr.bf16.mxu0 %v8544_v42  ;;  %5710 = vmatprep.subr.bf16.mxu1 %v8544_v42  ;;  %v1530_v52 = vpop.permute.xlu0 %1529 }
 0x41e   : > { %2215 = vrot.lane.b32.xlu1 %v7497_v39, %s6834_s20  ;;  %2166 = vrot.lane.b32.xlu0 %v7499_v44, %s6834_s20  ;;  %v1535_v56 = vsel %vm795_vm2, %v1530_v52, 0 }
 0x41f   : > { %v7511_v48 = vpack.c.bf16 %v6283_v45, %v6283_v45  ;;  %v7513_v50 = vpack.c.bf16 %v6282_v47, %v6282_v47 }
 0x420   : > { %v1628_v57 = vpop.permute.xlu1 %1627 }
 0x421   : > { %v1579_v58 = vpop.permute.xlu0 %1578  ;;  %v1633_v4 = vsel %vm795_vm2, %v1628_v57, 0 }
 0x422   : > { %5695 = vmatmul.mubr.msk.bf16.vlgmr.msra.gmra.mrb[32].mxu0 %vm795_vm2, %v7367_v27  ;;  %5701 = vmatmul.mubr.msk.bf16.vlgmr.msra.gmra.mrb[24].mxu1 %vm795_vm2, %v7365_v24  ;;  %v1584_v5 = vsel %vm795_vm2, %v1579_v58, 0 }
 0x423   : > { %2313 = vrot.lane.b32.xlu1 %v7511_v48, %s6834_s20  ;;  %2264 = vrot.lane.b32.xlu0 %v7513_v50, %s6834_s20  ;;  %s6738_s20 = sshll.u32 %s6838_s16, 4  ;;  %s6739_s20 = int_to_ptr.vmem [resolvable:$false] %s6738_s20 }
 0x424   : > { %5705 = vmatpush3.bf16.xpose.msra.mxu0 %v1486_v55  ;;  %5711 = vmatpush3.bf16.xpose.msra.mxu1 %v1535_v56  ;;  %s6740_s13 = scalar_lea.vmem %s6739_s20, 2048  ;;  %p6741_p2 = scmp.lt.s32.totalorder %s8482_s28, %s6739_s20 }
 0x425   : > { %5706 = vmatprep.mubr.msk.bf16.mxu0 %vm6832_vm1, %v8544_v42  ;;  %5712 = vmatprep.mubr.msk.bf16.mxu1 %vm6832_vm1, %v8544_v42 }
 0x426   : > { %5716 = vmatprep.subr.bf16.mxu0 %v8544_v42  ;;  %5722 = vmatprep.subr.bf16.mxu1 %v8544_v42 }
 0x427   : > { %2730 = vrot.lane.b32.xlu1 %v7313_v62, %s6837_s27  ;;  %2681 = vrot.lane.b32.xlu0 %v7299_v53, %s6837_s27  ;;  %v1726_v53 = vpop.permute.xlu1 %1725 }
 0x428   : > { %v1731_v62 = vsel %vm795_vm2, %v1726_v53, 0 }
 0x42b   : > { %5707 = vmatmul.mubr.msk.bf16.vlgmr.msra.gmra.mrb[36].mxu0 %vm795_vm2, %v7374_v31  ;;  %5713 = vmatmul.mubr.msk.bf16.vlgmr.msra.gmra.mrb[28].mxu1 %vm795_vm2, %v7383_v37 }
 0x42c   : > { %2826 = vrot.lane.b32.xlu1 %v7308_v61, %s6837_s27  ;;  %2778 = vrot.lane.b32.xlu0 %v7321_v0, %s6837_s27  ;;  %v1677_v61 = vpop.permute.xlu0 %1676 }
 0x42d   : > { %5717 = vmatpush3.bf16.xpose.msra.mxu0 %v1584_v5  ;;  %5723 = vmatpush3.bf16.xpose.msra.mxu1 %v1633_v4  ;;  %v1682_v0 = vsel %vm795_vm2, %v1677_v61, 0 }
 0x42e   : > { %5718 = vmatprep.mubr.msk.bf16.mxu0 %vm6832_vm1, %v8544_v42  ;;  %5724 = vmatprep.mubr.msk.bf16.mxu1 %vm6832_vm1, %v8544_v42 }
 0x42f   : > { %5728 = vmatprep.subr.bf16.mxu0 %v8544_v42  ;;  %5734 = vmatprep.subr.bf16.mxu1 %v8544_v42 }
 0x430   : > { %2922 = vrot.lane.b32.xlu1 %v7331_v2, %s6837_s27  ;;  %2874 = vrot.lane.b32.xlu0 %v7315_v63, %s6837_s27  ;;  %v1824_v63 = vpop.permute.xlu1 %1823 }
 0x431   : > { %v1829_v2 = vsel %vm795_vm2, %v1824_v63, 0 }
 0x434   : > { %5719 = vmatmul.mubr.msk.bf16.vlgmr.msra.gmra.mrb[40].mxu0 %vm795_vm2, %v7397_v43  ;;  %5725 = vmatmul.mubr.msk.bf16.vlgmr.msra.gmra.mrb[32].mxu1 %vm795_vm2, %v7392_v29 }
 0x435   : > { %3018 = vrot.lane.b32.xlu1 %v7326_v1, %s6837_s27  ;;  %2970 = vrot.lane.b32.xlu0 %v7335_v3, %s6837_s27  ;;  %v1775_v1 = vpop.permute.xlu0 %1774 }
 0x436   : > { %5729 = vmatpush3.bf16.xpose.msra.mxu0 %v1682_v0  ;;  %5735 = vmatpush3.bf16.xpose.msra.mxu1 %v1731_v62  ;;  %v1780_v3 = vsel %vm795_vm2, %v1775_v1, 0 }
 0x437   : > { %5730 = vmatprep.mubr.msk.bf16.mxu0 %vm6832_vm1, %v8544_v42  ;;  %5736 = vmatprep.mubr.msk.bf16.mxu1 %vm6832_vm1, %v8544_v42 }
 0x438   : > { %5740 = vmatprep.subr.bf16.mxu0 %v8544_v42  ;;  %5746 = vmatprep.subr.bf16.mxu1 %v8544_v42 }
 0x439   : > { %3114 = vrot.lane.b32.xlu1 %v7340_v9, %s6837_s27  ;;  %3066 = vrot.lane.b32.xlu0 %v7342_v10, %s6837_s27  ;;  %v1922_v9 = vpop.permute.xlu1 %1921  ;;  %v1873_v10 = vpop.permute.xlu0 %1872 }
 0x43d   : > { %5731 = vmatmul.mubr.msk.bf16.vlgmr.msra.gmra.mrb[44].mxu0 %vm795_vm2, %v7411_v49  ;;  %5737 = vmatmul.mubr.msk.bf16.vlgmr.msra.gmra.mrb[36].mxu1 %vm795_vm2, %v7406_v46 }
 0x43e   : > { %3210 = vrot.lane.b32.xlu1 %v7355_v22, %s6837_s27  ;;  %3162 = vrot.lane.b32.xlu0 %v7349_v13, %s6837_s27  ;;  %v1927_v13 = vsel %vm795_vm2, %v1922_v9, 0  ;;  %v1878_v22 = vsel %vm795_vm2, %v1873_v10, 0 }
 0x43f   : > { %5741 = vmatpush3.bf16.xpose.msra.mxu0 %v1780_v3  ;;  %5747 = vmatpush3.bf16.xpose.msra.mxu1 %v1829_v2 }
 0x440   : > { %5742 = vmatprep.mubr.msk.bf16.mxu0 %vm6832_vm1, %v8544_v42  ;;  %5748 = vmatprep.mubr.msk.bf16.mxu1 %vm6832_vm1, %v8544_v42 }
 0x441   : > { %5752 = vmatprep.subr.bf16.mxu0 %v8544_v42  ;;  %5758 = vmatprep.subr.bf16.mxu1 %v8544_v42 }
 0x442   : > { %3402 = vrot.lane.b32.xlu1 %v7383_v37, %s6837_s27  ;;  %3258 = vrot.lane.b32.xlu0 %v7367_v27, %s6837_s27 }
 0x446   : > { %5743 = vmatmul.mubr.msk.bf16.vlgmr.msra.gmra.mrb[48].mxu0 %vm795_vm2, %v7425_v54  ;;  %5749 = vmatmul.mubr.msk.bf16.vlgmr.msra.gmra.mrb[40].mxu1 %vm795_vm2, %v7420_v51 }
 0x447   : > { %3498 = vrot.lane.b32.xlu1 %v7392_v29, %s6837_s27  ;;  %3354 = vrot.lane.b32.xlu0 %v7374_v31, %s6837_s27 }
 0x448   : > { %5753 = vmatpush3.bf16.xpose.msra.mxu0 %v1878_v22  ;;  %5759 = vmatpush3.bf16.xpose.msra.mxu1 %v1927_v13 }
 0x449   : > { %5754 = vmatprep.mubr.msk.bf16.mxu0 %vm6832_vm1, %v8544_v42  ;;  %5760 = vmatprep.mubr.msk.bf16.mxu1 %vm6832_vm1, %v8544_v42 }
 0x44a   : > { %5764 = vmatprep.subr.bf16.mxu0 %v8544_v42  ;;  %5770 = vmatprep.subr.bf16.mxu1 %v8544_v42 }
 0x44b   : > { %3594 = vrot.lane.b32.xlu1 %v7406_v46, %s6837_s27  ;;  %3450 = vrot.lane.b32.xlu0 %v7397_v43, %s6837_s27 }
 0x44f   : > { %5755 = vmatmul.mubr.msk.bf16.vlgmr.msra.gmra.mrb[52].mxu0 %vm795_vm2, %v7436_v60  ;;  %5761 = vmatmul.mubr.msk.bf16.vlgmr.msra.gmra.mrb[44].mxu1 %vm795_vm2, %v7434_v59 }
 0x450   : > { %3786 = vrot.lane.b32.xlu1 %v7434_v59, %s6837_s27  ;;  %3546 = vrot.lane.b32.xlu0 %v7411_v49, %s6837_s27 }
 0x451   : > { %5766 = vmatprep.mubr.msk.bf16.mxu0 %vm6832_vm1, %v8544_v42  ;;  %5772 = vmatprep.mubr.msk.bf16.mxu1 %vm6832_vm1, %v8544_v42 }
 0x454   : > { %3306 = vrot.lane.b32.xlu1 %v7365_v24, %s6837_s27  ;;  %3642 = vrot.lane.b32.xlu0 %v7425_v54, %s6837_s27 }
 0x458   : > { %3690 = vrot.lane.b32.xlu1 %v7420_v51, %s6837_s27  ;;  %3738 = vrot.lane.b32.xlu0 %v7436_v60, %s6837_s27 }
 0x471   : > { %v7635_v27 = vpop.f32.mrb[8].mxu0 }
 0x472   : > { %v5624_v31 = vpop.f32.mrb[9].mxu0  ;;  %v2361_v29 = vsel %vm795_vm2, %v7635_v27, -inf }
 0x473   : > { %v839_v37 = vpop.f32.mrb[10].mxu0 }
 0x474   : > { %v5625_v43 = vpop.f32.mrb[11].mxu0 }
 0x477   : > { %2362 = vmax.xlane.f32.xlu0 %v2361_v29 }
 0x47d   : > { %v7639_v46 = vpop.f32.mrb[0].mxu1 }
 0x47e   : > { %v5630_v24 = vpop.f32.mrb[1].mxu1  ;;  %v2364_v49 = vsel %vm795_vm2, %v7639_v46, -inf }
 0x47f   : > { %v888_v54 = vpop.f32.mrb[2].mxu1  ;;  %2365 = vmax.xlane.f32.xlu1 %v2364_v49 }
 0x480   : > { %v5631_v51 = vpop.f32.mrb[3].mxu1 }
 0x481   : > { %v7643_v59 = vpop.f32.mrb[12].mxu0 }
 0x482   : > { %v5636_v60 = vpop.f32.mrb[13].mxu0  ;;  %v2367_v6 = vsel %vm795_vm2, %v7643_v59, -inf }
 0x483   : > { %v937_v7 = vpop.f32.mrb[14].mxu0  ;;  %2368 = vmax.xlane.f32.xlu0 %v2367_v6 }
 0x484   : > { %v2020_v8 = vpop.permute.xlu1 %2019  ;;  %v1971_v11 = vpop.permute.xlu0 %1970 }
 0x485   : > { %v2025_v12 = vsel %vm795_vm2, %v2020_v8, 0  ;;  %v1976_v14 = vsel %vm795_vm2, %v1971_v11, 0  ;;  %v5637_v15 = vpop.f32.mrb[15].mxu0  ;;  %v7649_v18 = vpop.f32.mrb[4].mxu1 }
 0x486   : > { %5765 = vmatpush3.bf16.xpose.msra.mxu0 %v1976_v14  ;;  %5771 = vmatpush3.bf16.xpose.msra.mxu1 %v2025_v12  ;;  %v5642_v19 = vpop.f32.mrb[5].mxu1  ;;  %v2370_v23 = vsel %vm795_vm2, %v7649_v18, -inf }
 0x487   : > { %v986_v25 = vpop.f32.mrb[6].mxu1  ;;  %2371 = vmax.xlane.f32.xlu0 %v2370_v23  ;;  %5776 = vmatprep.subr.bf16.mxu0 %v8544_v42 }
 0x488   : > { %v2118_v26 = vpop.permute.xlu1 %2117  ;;  %5782 = vmatprep.subr.bf16.mxu1 %v8544_v42  ;;  %v5643_v30 = vpop.f32.mrb[7].mxu1 }
 0x489   : > { %v7655_v34 = vpop.f32.mrb[16].mxu0  ;;  %v2069_v20 = vpop.permute.xlu0 %2068  ;;  %v2123_v21 = vsel %vm795_vm2, %v2118_v26, 0 }
 0x48a   : > { %v5648_v28 = vpop.f32.mrb[17].mxu0  ;;  %v2074_v40 = vsel %vm795_vm2, %v2069_v20, 0  ;;  %v2373_v22 = vsel %vm795_vm2, %v7655_v34, -inf }
 0x48b   : > { %v1035_v35 = vpop.f32.mrb[18].mxu0 }
 0x48c   : > { %v5649_v36 = vpop.f32.mrb[19].mxu0 }
 0x48d   : > { %5767 = vmatmul.mubr.msk.bf16.vlgmr.msra.gmra.mrb[56].mxu0 %vm795_vm2, %v7465_v17  ;;  %5773 = vmatmul.mubr.msk.bf16.vlgmr.msra.gmra.mrb[48].mxu1 %vm795_vm2, %v7463_v16  ;;  %v7663_v41 = vpop.f32.mrb[8].mxu1 }
 0x48e   : > { %5777 = vmatpush3.bf16.xpose.msra.mxu0 %v2074_v40  ;;  %5783 = vmatpush3.bf16.xpose.msra.mxu1 %v2123_v21  ;;  %v5654_v38 = vpop.f32.mrb[9].mxu1  ;;  %v2376_v13 = vsel %vm795_vm2, %v7663_v41, -inf }
 0x48f   : > { %v1084_v45 = vpop.f32.mrb[10].mxu1  ;;  %5784 = vmatprep.mubr.msk.bf16.mxu1 %vm6832_vm1, %v8544_v42  ;;  %5778 = vmatprep.mubr.msk.bf16.mxu0 %vm6832_vm1, %v8544_v42 }
 0x490   : > { %v2216_v47 = vpop.permute.xlu1 %2215  ;;  %3882 = vrot.lane.b32.xlu1 %v7463_v16, %s6837_s27  ;;  %5788 = vmatprep.subr.bf16.mxu0 %v8544_v42  ;;  %v5655_v52 = vpop.f32.mrb[11].mxu1 }
 0x491   : > { %v7672_v55 = vpop.f32.mrb[20].mxu0  ;;  %5794 = vmatprep.subr.bf16.mxu1 %v8544_v42  ;;  %v2167_v56 = vpop.permute.xlu0 %2166  ;;  %v2221_v5 = vsel %vm795_vm2, %v2216_v47, 0 }
 0x492   : > { %v5660_v57 = vpop.f32.mrb[21].mxu0  ;;  %v2172_v53 = vsel %vm795_vm2, %v2167_v56, 0  ;;  %v2379_v43 = vsel %vm795_vm2, %v7672_v55, -inf }
 0x493   : > { %v1133_v58 = vpop.f32.mrb[22].mxu0 }
 0x494   : > { %v5661_v4 = vpop.f32.mrb[23].mxu0  ;;  %3930 = vrot.lane.b32.xlu1 %v7479_v33, %s6837_s27 }
 0x495   : > { %5779 = vmatmul.mubr.msk.bf16.vlgmr.msra.gmra.mrb[60].mxu0 %vm795_vm2, %v7479_v33  ;;  %5785 = vmatmul.mubr.msk.bf16.vlgmr.msra.gmra.mrb[52].mxu1 %vm795_vm2, %v7477_v32  ;;  %v7683_v16 = vpop.f32.mrb[12].mxu1  ;;  %v2314_v33 = vpop.permute.xlu1 %2313 }
 0x496   : > { %5789 = vmatpush3.bf16.xpose.msra.mxu0 %v2172_v53  ;;  %5795 = vmatpush3.bf16.xpose.msra.mxu1 %v2221_v5  ;;  %v5666_v61 = vpop.f32.mrb[13].mxu1  ;;  %v2265_v63 = vpop.permute.xlu0 %2264  ;;  %v2319_v1 = vsel %vm795_vm2, %v2314_v33, 0  ;;  %v2382_v29 = vsel %vm795_vm2, %v7683_v16, -inf }
 0x497   : > { %5796 = vmatprep.mubr.msk.bf16.mxu1 %vm6832_vm1, %v8544_v42  ;;  %5790 = vmatprep.mubr.msk.bf16.mxu0 %vm6832_vm1, %v8544_v42  ;;  %v1182_v62 = vpop.f32.mrb[14].mxu1  ;;  %v2270_v2 = vsel %vm795_vm2, %v2265_v63, 0 }
 0x498   : > { %3978 = vrot.lane.b32.xlu1 %v7477_v32, %s6837_s27  ;;  %5800 = vmatprep.subr.bf16.mxu0 %v8544_v42  ;;  %v5667_v0 = vpop.f32.mrb[15].mxu1 }
 0x499   : > { %5806 = vmatprep.subr.bf16.mxu1 %v8544_v42  ;;  %v2731_v32 = vpop.permute.xlu1 %2730 }
 0x49a   : > { %v2682_v3 = vpop.permute.xlu0 %2681  ;;  %v2736_v9 = vsel %vm2686_vm3, %v2731_v32, 0 }
 0x49d   : > { %5791 = vmatmul.mubr.msk.bf16.vlgmr.msra.gmra.mrb[64].mxu0 %vm795_vm2, %v7499_v44  ;;  %5797 = vmatmul.mubr.msk.bf16.vlgmr.msra.gmra.mrb[56].mxu1 %vm795_vm2, %v7497_v39 }
 0x49e   : > { %5807 = vmatpush3.bf16.xpose.msra.mxu1 %v2319_v1  ;;  %3834 = vrot.lane.b32.xlu0 %v7465_v17, %s6837_s27  ;;  %v2688_v17 = vsel %vm2686_vm3, %v2682_v3, 0  ;;  %v7719_v10 = vpop.permute.xlu0 %2778  ;;  %v7725_v31 = vpop.permute.xlu1 %2826 }
 0x49f   : > { %5801 = vmatpush3.bf16.xpose.msra.mxu0 %v2270_v2  ;;  %5808 = vmatprep.mubr.msk.bf16.mxu1 %vm6832_vm1, %v8544_v42 }
 0x4a0   : > { %5802 = vmatprep.mubr.msk.bf16.mxu0 %vm6832_vm1, %v8544_v42  ;;  %5812 = vmatprep.subr.bf16.mxu0 %v8544_v42 }
 0x4a1   : > { %5818 = vmatprep.subr.bf16.mxu1 %v8544_v42 }
 0x4a2   : > { %v7727_v37 = vpop.permute.xlu0 %2874  ;;  %v7733_v24 = vpop.permute.xlu1 %2922 }
 0x4a5   : > { %5809 = vmatmul.mubr.msk.bf16.vlgmr.msra.gmra.mrb[60].mxu1 %vm795_vm2, %v7511_v48 }
 0x4a6   : > { %5803 = vmatmul.mubr.msk.bf16.vlgmr.msra.gmra.mrb[68].mxu0 %vm795_vm2, %v7513_v50  ;;  %5819 = vmatpush3.bf16.msra.mxu1 %v2736_v9 }
 0x4a7   : > { %5813 = vmatpush3.bf16.msra.mxu0 %v2688_v17  ;;  %5814 = vmatprep.mubr.msk.bf16.mxu0 %vm6832_vm1, %v8544_v42  ;;  %v7735_v49 = vpop.permute.xlu0 %2970  ;;  %v7737_v54 = vpop.permute.xlu1 %3018 }
 0x4a8   : > { %5824 = vmatprep.subr.bf16.mxu0 %v8544_v42  ;;  %5820 = vmatprep.mubr.msk.bf16.mxu1 %vm6832_vm1, %v8544_v42 }
 0x4a9   : > { %5830 = vmatprep.subr.bf16.mxu1 %v8544_v42 }
 0x4ab   : > { %v7739_v51 = vpop.permute.xlu0 %3066  ;;  %v7741_v60 = vpop.permute.xlu1 %3114 }
 0x4b0   : > { %v7743_v6 = vpop.permute.xlu0 %3162  ;;  %v7745_v7 = vpop.permute.xlu1 %3210 }
 0x4b4   : > { %v7747_v8 = vpop.permute.xlu0 %3258  ;;  %v7749_v11 = vpop.permute.xlu1 %3402 }
 0x4b9   : > { %v7751_v12 = vpop.permute.xlu0 %3354  ;;  %v7753_v14 = vpop.permute.xlu1 %3498 }
 0x4bc   : > { %2377 = vmax.xlane.f32.xlu1 %v2376_v13 }
 0x4bd   : > { %2374 = vmax.xlane.f32.xlu0 %v2373_v22  ;;  %v7755_v15 = vpop.permute.xlu0 %3450  ;;  %v7765_v40 = vpop.permute.xlu1 %3594 }
 0x4c0   : > { %2383 = vmax.xlane.f32.xlu1 %v2382_v29 }
 0x4c1   : > { %2380 = vmax.xlane.f32.xlu0 %v2379_v43 }
 0x4c2   : > { %v7767_v38 = vpop.permute.xlu0 %3546  ;;  %v7777_v62 = vpop.permute.xlu1 %3786 }
 0x4c6   : > { %v7779_v33 = vpop.permute.xlu0 %3642  ;;  %v7789_v29 = vpop.permute.xlu1 %3306 }
 0x4ca   : > { %v7791_v43 = vpop.permute.xlu0 %3738 }
 0x4e4   : > { %v7757_v19 = vpop.f32.mrb[24].mxu0  ;;  %v7759_v23 = vpop.f32.mrb[16].mxu1 }
 0x4e5   : > { %v5672_v25 = vpop.f32.mrb[25].mxu0  ;;  %v5678_v26 = vpop.f32.mrb[17].mxu1  ;;  %v2385_v30 = vsel %vm795_vm2, %v7757_v19, -inf  ;;  %v2388_v20 = vsel %vm795_vm2, %v7759_v23, -inf }
 0x4e6   : > { %v1231_v28 = vpop.f32.mrb[26].mxu0  ;;  %v1280_v35 = vpop.f32.mrb[18].mxu1  ;;  %2386 = vmax.xlane.f32.xlu1 %v2385_v30  ;;  %2389 = vmax.xlane.f32.xlu0 %v2388_v20 }
 0x4e7   : > { %v5673_v36 = vpop.f32.mrb[27].mxu0  ;;  %v5679_v21 = vpop.f32.mrb[19].mxu1 }
 0x4ed   : > { %v7769_v45 = vpop.f32.mrb[28].mxu0  ;;  %v7771_v47 = vpop.f32.mrb[20].mxu1 }
 0x4ee   : > { %v5684_v52 = vpop.f32.mrb[29].mxu0  ;;  %v5690_v56 = vpop.f32.mrb[21].mxu1  ;;  %v2391_v57 = vsel %vm795_vm2, %v7769_v45, -inf  ;;  %v2394_v58 = vsel %vm795_vm2, %v7771_v47, -inf }
 0x4ef   : > { %v1329_v4 = vpop.f32.mrb[30].mxu0  ;;  %v1378_v5 = vpop.f32.mrb[22].mxu1  ;;  %2392 = vmax.xlane.f32.xlu1 %v2391_v57  ;;  %2395 = vmax.xlane.f32.xlu0 %v2394_v58 }
 0x4f0   : > { %v5685_v53 = vpop.f32.mrb[31].mxu0  ;;  %v5691_v61 = vpop.f32.mrb[23].mxu1 }
 0x4f1   : > { %v7802_v4 = vpop.permute.xlu1 %3690 }
 0x4f5   : > { %v7781_v0 = vpop.f32.mrb[32].mxu0  ;;  %v7783_v63 = vpop.f32.mrb[24].mxu1 }
 0x4f6   : > { %v5696_v1 = vpop.f32.mrb[33].mxu0  ;;  %v5702_v2 = vpop.f32.mrb[25].mxu1  ;;  %v2397_v32 = vsel %vm795_vm2, %v7781_v0, -inf  ;;  %v2400_v3 = vsel %vm795_vm2, %v7783_v63, -inf }
 0x4f7   : > { %v1427_v9 = vpop.f32.mrb[34].mxu0  ;;  %v1476_v17 = vpop.f32.mrb[26].mxu1  ;;  %2398 = vmax.xlane.f32.xlu1 %v2397_v32  ;;  %2401 = vmax.xlane.f32.xlu0 %v2400_v3 }
 0x4f8   : > { %v5697_v13 = vpop.f32.mrb[35].mxu0  ;;  %v5703_v22 = vpop.f32.mrb[27].mxu1 }
 0x4fe   : > { %v7793_v25 = vpop.f32.mrb[36].mxu0  ;;  %v7795_v26 = vpop.f32.mrb[28].mxu1 }
 0x4ff   : > { %v5708_v30 = vpop.f32.mrb[37].mxu0  ;;  %v5714_v20 = vpop.f32.mrb[29].mxu1  ;;  %v2403_v28 = vsel %vm795_vm2, %v7793_v25, -inf  ;;  %v2406_v35 = vsel %vm795_vm2, %v7795_v26, -inf }
 0x500   : > { %v1525_v36 = vpop.f32.mrb[38].mxu0  ;;  %v1574_v21 = vpop.f32.mrb[30].mxu1  ;;  %2404 = vmax.xlane.f32.xlu1 %v2403_v28  ;;  %2407 = vmax.xlane.f32.xlu0 %v2406_v35 }
 0x501   : > { %v5709_v52 = vpop.f32.mrb[39].mxu0  ;;  %v5715_v56 = vpop.f32.mrb[31].mxu1 }
 0x504   : > { %v2363_v57 = vpop.xlane.xlu0 %2362 }
 0x505   : > { %v2457_v58 = vsub.f32 %v7635_v27, %v2363_v57 }
 0x507   : > { %v2489_v5 = vmul.f32 1.442695, %v2457_v58  ;;  %v7804_v53 = vpop.f32.mrb[40].mxu0  ;;  %v7806_v61 = vpop.f32.mrb[32].mxu1 }
 0x508   : > { %v5720_v1 = vpop.f32.mrb[41].mxu0  ;;  %v5726_v2 = vpop.f32.mrb[33].mxu1  ;;  %v2409_v32 = vsel %vm795_vm2, %v7804_v53, -inf  ;;  %v2412_v3 = vsel %vm795_vm2, %v7806_v61, -inf }
 0x509   : > { %6312 = vpow2.f32 %v2489_v5  ;;  %v1623_v9 = vpop.f32.mrb[42].mxu0  ;;  %v1672_v17 = vpop.f32.mrb[34].mxu1  ;;  %2410 = vmax.xlane.f32.xlu1 %v2409_v32  ;;  %2413 = vmax.xlane.f32.xlu0 %v2412_v3 }
 0x50a   : > { %v5721_v27 = vpop.f32.mrb[43].mxu0  ;;  %v5727_v13 = vpop.f32.mrb[35].mxu1  ;;  %v2784_v9 = vsel %vm2686_vm3, %v7719_v10, 0 }
 0x50c   : > { %v2366_v22 = vpop.xlane.xlu1 %2365 }
 0x50d   : > { %v2458_v30 = vsub.f32 %v7639_v46, %v2366_v22 }
 0x50f   : > { %v2491_v20 = vmul.f32 1.442695, %v2458_v30 }
 0x510   : > { %v7813_v28 = vpop.f32.mrb[44].mxu0  ;;  %v7815_v35 = vpop.f32.mrb[36].mxu1 }
 0x511   : > { %6314 = vpow2.f32 %v2491_v20  ;;  %v5732_v36 = vpop.f32.mrb[45].mxu0  ;;  %v5738_v21 = vpop.f32.mrb[37].mxu1  ;;  %v2415_v52 = vsel %vm795_vm2, %v7813_v28, -inf  ;;  %v2418_v56 = vsel %vm795_vm2, %v7815_v35, -inf }
 0x512   : > { %v1721_v57 = vpop.f32.mrb[46].mxu0  ;;  %v1770_v58 = vpop.f32.mrb[38].mxu1  ;;  %2416 = vmax.xlane.f32.xlu1 %v2415_v52  ;;  %2419 = vmax.xlane.f32.xlu0 %v2418_v56 }
 0x513   : > { %v7821_v5 = vpop.eup %6312  ;;  %v5733_v46 = vpop.f32.mrb[47].mxu0 }
 0x514   : > { %v5739_v1 = vpop.f32.mrb[39].mxu1  ;;  %v2369_v2 = vpop.xlane.xlu0 %2368  ;;  %v2649_v32 = vpack.c.bf16 %v7821_v5, %v7821_v5 }
 0x515   : > { %v2459_v3 = vsub.f32 %v7643_v59, %v2369_v2  ;;  %v2832_v1 = vsel %vm2686_vm3, %v7725_v31, 0 }
 0x516   : > { %5815 = vmatmul.mubr.msk.bf16.vlgmr.msra.gmra.mrb[72].mxu0 %vm795_vm2, %v2649_v32 }
 0x517   : > { %v2493_v17 = vmul.f32 1.442695, %v2459_v3  ;;  %5825 = vmatpush3.bf16.msra.mxu0 %v2784_v9  ;;  %5826 = vmatprep.mubr.msk.bf16.mxu0 %vm6832_vm1, %v8544_v42 }
 0x518   : > { %v2372_v27 = vpop.xlane.xlu0 %2371  ;;  %5836 = vmatprep.subr.bf16.mxu0 %v8544_v42 }
 0x519   : > { %6316 = vpow2.f32 %v2493_v17  ;;  %v7832_v13 = vpop.f32.mrb[48].mxu0  ;;  %v7834_v22 = vpop.f32.mrb[40].mxu1  ;;  %v2460_v59 = vsub.f32 %v7649_v18, %v2372_v27 }
 0x51a   : > { %v5744_v30 = vpop.f32.mrb[49].mxu0  ;;  %v5750_v20 = vpop.f32.mrb[41].mxu1  ;;  %v2421_v10 = vsel %vm795_vm2, %v7832_v13, -inf  ;;  %v2424_v36 = vsel %vm795_vm2, %v7834_v22, -inf }
 0x51b   : > { %v7841_v21 = vpop.eup %6314  ;;  %v2495_v52 = vmul.f32 1.442695, %v2460_v59  ;;  %v1819_v56 = vpop.f32.mrb[50].mxu0  ;;  %2422 = vmax.xlane.f32.xlu1 %v2421_v10  ;;  %2425 = vmax.xlane.f32.xlu0 %v2424_v36 }
 0x51c   : > { %v1868_v57 = vpop.f32.mrb[42].mxu1  ;;  %v5745_v58 = vpop.f32.mrb[51].mxu0  ;;  %v2650_v18 = vpack.c.bf16 %v7841_v21, %v7841_v21 }
 0x51d   : > { %v5751_v46 = vpop.f32.mrb[43].mxu1  ;;  %6318 = vpow2.f32 %v2495_v52  ;;  %v2880_v52 = vsel %vm2686_vm3, %v7727_v37, 0  ;;  %v2928_v58 = vsel %vm2686_vm3, %v7733_v24, 0  ;;  %v7879_v37 = vpop.permute.xlu1 %3882 }
 0x51e   : > { %5821 = vmatmul.mubr.msk.bf16.vlgmr.msra.gmra.mrb[64].mxu1 %vm795_vm2, %v2650_v18 }
 0x51f   : > { %5831 = vmatpush3.bf16.msra.mxu1 %v2832_v1  ;;  %5832 = vmatprep.mubr.msk.bf16.mxu1 %vm6832_vm1, %v8544_v42  ;;  %v7885_v1 = vpop.permute.xlu0 %3834 }
 0x520   : > { %5842 = vmatprep.subr.bf16.mxu1 %v8544_v42 }
 0x521   : > { %v7881_v46 = vpop.permute.xlu1 %3930 }
 0x522   : > { %v7851_v2 = vpop.f32.mrb[52].mxu0  ;;  %v7853_v32 = vpop.f32.mrb[44].mxu1  ;;  %8568 = vst [vmem:[#allocation24_spill] sm:$0xff] %v7881_v46 }
 0x523   : > { %v7855_v3 = vpop.eup %6316  ;;  %v5756_v9 = vpop.f32.mrb[53].mxu0  ;;  %v2427_v27 = vsel %vm795_vm2, %v7851_v2, -inf  ;;  %v2430_v31 = vsel %vm795_vm2, %v7853_v32, -inf }
 0x524   : > { %v5762_v17 = vpop.f32.mrb[45].mxu1  ;;  %v1917_v59 = vpop.f32.mrb[54].mxu0  ;;  %2428 = vmax.xlane.f32.xlu1 %v2427_v27  ;;  %2431 = vmax.xlane.f32.xlu0 %v2430_v31  ;;  %v2651_v20 = vpack.c.bf16 %v7855_v3, %v7855_v3 }
 0x525   : > { %v1966_v30 = vpop.f32.mrb[46].mxu1  ;;  %v5757_v10 = vpop.f32.mrb[55].mxu0 }
 0x526   : > { %v5763_v36 = vpop.f32.mrb[47].mxu1  ;;  %5827 = vmatmul.mubr.msk.bf16.vlgmr.msra.gmra.mrb[76].mxu0 %vm795_vm2, %v2651_v20  ;;  %v7883_v18 = vpop.permute.xlu1 %3978 }
 0x527   : > { %v7866_v56 = vpop.eup %6318  ;;  %5837 = vmatpush3.bf16.msra.mxu0 %v2880_v52  ;;  %5838 = vmatprep.mubr.msk.bf16.mxu0 %vm6832_vm1, %v8544_v42  ;;  %8569 = vst [vmem:[#allocation25_spill] sm:$0xff] %v7883_v18 }
 0x528   : > { %v2652_v57 = vpack.c.bf16 %v7866_v56, %v7866_v56  ;;  %5848 = vmatprep.subr.bf16.mxu0 %v8544_v42 }
 0x52a   : > { %5833 = vmatmul.mubr.msk.bf16.vlgmr.msra.gmra.mrb[68].mxu1 %vm795_vm2, %v2652_v57 }
 0x52b   : > { %5843 = vmatpush3.bf16.msra.mxu1 %v2928_v58  ;;  %5844 = vmatprep.mubr.msk.bf16.mxu1 %vm6832_vm1, %v8544_v42 }
 0x52c   : > { %5854 = vmatprep.subr.bf16.mxu1 %v8544_v42 }
 0x549   : > { %v2378_v9 = vpop.xlane.xlu1 %2377 }
 0x54a   : > { %v2462_v17 = vsub.f32 %v7663_v41, %v2378_v9  ;;  %v2375_v24 = vpop.xlane.xlu0 %2374 }
 0x54b   : > { %v2461_v27 = vsub.f32 %v7655_v34, %v2375_v24 }
 0x54c   : > { %v2499_v31 = vmul.f32 1.442695, %v2462_v17 }
 0x54d   : > { %v2497_v59 = vmul.f32 1.442695, %v2461_v27  ;;  %v2384_v30 = vpop.xlane.xlu1 %2383 }
 0x54e   : > { %6320 = vpow2.f32 %v2499_v31  ;;  %v2464_v20 = vsub.f32 %v7683_v16, %v2384_v30  ;;  %v2381_v10 = vpop.xlane.xlu0 %2380  ;;  %v3024_v16 = vsel %vm2686_vm3, %v7737_v54, 0 }
 0x54f   : > { %6322 = vpow2.f32 %v2497_v59  ;;  %v2463_v36 = vsub.f32 %v7672_v55, %v2381_v10  ;;  %v2976_v55 = vsel %vm2686_vm3, %v7735_v49, 0 }
 0x550   : > { %v2503_v52 = vmul.f32 1.442695, %v2464_v20 }
 0x551   : > { %v2501_v57 = vmul.f32 1.442695, %v2463_v36 }
 0x552   : > { %6324 = vpow2.f32 %v2503_v52 }
 0x553   : > { %6326 = vpow2.f32 %v2501_v57  ;;  %v3120_v57 = vsel %vm2686_vm3, %v7741_v60, 0 }
 0x558   : > { %v7891_v58 = vpop.eup %6320 }
 0x559   : > { %v7893_v41 = vpop.eup %6322  ;;  %v2654_v34 = vpack.c.bf16 %v7891_v58, %v7891_v58 }
 0x55a   : > { %v2653_v9 = vpack.c.bf16 %v7893_v41, %v7893_v41 }
 0x55b   : > { %5845 = vmatmul.mubr.msk.bf16.vlgmr.msra.gmra.mrb[72].mxu1 %vm795_vm2, %v2654_v34 }
 0x55c   : > { %5839 = vmatmul.mubr.msk.bf16.vlgmr.msra.gmra.mrb[80].mxu0 %vm795_vm2, %v2653_v9  ;;  %5855 = vmatpush3.bf16.msra.mxu1 %v3024_v16  ;;  %v7907_v17 = vpop.eup %6324  ;;  %v3072_v16 = vsel %vm2686_vm3, %v7739_v51, 0 }
 0x55d   : > { %5849 = vmatpush3.bf16.msra.mxu0 %v2976_v55  ;;  %5850 = vmatprep.mubr.msk.bf16.mxu0 %vm6832_vm1, %v8544_v42  ;;  %v7912_v54 = vpop.eup %6326  ;;  %v2656_v20 = vpack.c.bf16 %v7907_v17, %v7907_v17 }
 0x55e   : > { %5856 = vmatprep.mubr.msk.bf16.mxu1 %vm6832_vm1, %v8544_v42  ;;  %5860 = vmatprep.subr.bf16.mxu0 %v8544_v42  ;;  %v2655_v52 = vpack.c.bf16 %v7912_v54, %v7912_v54 }
 0x55f   : > { %5866 = vmatprep.subr.bf16.mxu1 %v8544_v42 }
 0x560   : > { %v7915_v24 = vpop.f32.mrb[56].mxu0  ;;  %v7917_v49 = vpop.f32.mrb[48].mxu1 }
 0x561   : > { %v5768_v27 = vpop.f32.mrb[57].mxu0  ;;  %v5774_v31 = vpop.f32.mrb[49].mxu1  ;;  %v2436_v59 = vsel %vm795_vm2, %v7917_v49, -inf  ;;  %v2433_v30 = vsel %vm795_vm2, %v7915_v24, -inf }
 0x562   : > { %v2064_v10 = vpop.f32.mrb[50].mxu1  ;;  %2437 = vmax.xlane.f32.xlu0 %v2436_v59  ;;  %2434 = vmax.xlane.f32.xlu1 %v2433_v30  ;;  %v2015_v36 = vpop.f32.mrb[58].mxu0 }
 0x563   : > { %v5769_v34 = vpop.f32.mrb[59].mxu0  ;;  %v5775_v9 = vpop.f32.mrb[51].mxu1  ;;  %5857 = vmatmul.mubr.msk.bf16.vlgmr.msra.gmra.mrb[76].mxu1 %vm795_vm2, %v2656_v20 }
 0x564   : > { %5851 = vmatmul.mubr.msk.bf16.vlgmr.msra.gmra.mrb[84].mxu0 %vm795_vm2, %v2655_v52  ;;  %5867 = vmatpush3.bf16.msra.mxu1 %v3120_v57 }
 0x565   : > { %5861 = vmatpush3.bf16.msra.mxu0 %v3072_v16  ;;  %5862 = vmatprep.mubr.msk.bf16.mxu0 %vm6832_vm1, %v8544_v42 }
 0x566   : > { %5868 = vmatprep.mubr.msk.bf16.mxu1 %vm6832_vm1, %v8544_v42  ;;  %5872 = vmatprep.subr.bf16.mxu0 %v8544_v42 }
 0x567   : > { %5878 = vmatprep.subr.bf16.mxu1 %v8544_v42 }
 0x568   : > { %v7939_v60 = vpop.f32.mrb[60].mxu0  ;;  %v7941_v55 = vpop.f32.mrb[52].mxu1 }
 0x569   : > { %8570 = vst [vmem:[#allocation26_spill] sm:$0xff] %v7941_v55  ;;  %v5780_v27 = vpop.f32.mrb[61].mxu0  ;;  %v5786_v51 = vpop.f32.mrb[53].mxu1  ;;  %v2442_v31 = vsel %vm795_vm2, %v7941_v55, -inf  ;;  %v2439_v59 = vsel %vm795_vm2, %v7939_v60, -inf }
 0x56a   : > { %v2162_v30 = vpop.f32.mrb[54].mxu1  ;;  %2443 = vmax.xlane.f32.xlu0 %v2442_v31  ;;  %2440 = vmax.xlane.f32.xlu1 %v2439_v59  ;;  %v2113_v20 = vpop.f32.mrb[62].mxu0 }
 0x56b   : > { %v5781_v10 = vpop.f32.mrb[63].mxu0  ;;  %v5787_v36 = vpop.f32.mrb[55].mxu1 }
 0x570   : > { %v7947_v52 = vpop.f32.mrb[64].mxu0  ;;  %v7949_v57 = vpop.f32.mrb[56].mxu1 }
 0x571   : > { %v5792_v34 = vpop.f32.mrb[65].mxu0  ;;  %v5798_v9 = vpop.f32.mrb[57].mxu1 }
 0x572   : > { %v2211_v16 = vpop.f32.mrb[66].mxu0  ;;  %v2260_v27 = vpop.f32.mrb[58].mxu1 }
 0x573   : > { %v5793_v51 = vpop.f32.mrb[67].mxu0  ;;  %v5799_v42 = vpop.f32.mrb[59].mxu1 }
 0x574   : > { %v2387_v18 = vpop.xlane.xlu1 %2386  ;;  %v2390_v46 = vpop.xlane.xlu0 %2389 }
 0x575   : > { %v2465_v55 = vsub.f32 %v7757_v19, %v2387_v18  ;;  %v2466_v31 = vsub.f32 %v7759_v23, %v2390_v46 }
 0x577   : > { %v2505_v59 = vmul.f32 1.442695, %v2465_v55  ;;  %v2507_v30 = vmul.f32 1.442695, %v2466_v31 }
 0x578   : > { %v7953_v20 = vpop.f32.mrb[60].mxu1 }
 0x579   : > { %6328 = vpow2.f32 %v2505_v59  ;;  %v7955_v10 = vpop.f32.mrb[68].mxu0  ;;  %v5810_v36 = vpop.f32.mrb[61].mxu1 }
 0x57a   : > { %6330 = vpow2.f32 %v2507_v30  ;;  %v5804_v34 = vpop.f32.mrb[69].mxu0  ;;  %v2358_v9 = vpop.f32.mrb[62].mxu1 }
 0x57b   : > { %v2309_v16 = vpop.f32.mrb[70].mxu0  ;;  %v5811_v27 = vpop.f32.mrb[63].mxu1  ;;  %4074 = vrot.lane.b32.xlu1 %v7497_v39, %s6837_s27  ;;  %v3216_v9 = vsel %vm2686_vm3, %v7745_v7, 0 }
 0x57c   : > { %v5805_v42 = vpop.f32.mrb[71].mxu0  ;;  %v2393_v19 = vpop.xlane.xlu1 %2392 }
 0x57d   : > { %v2467_v23 = vsub.f32 %v7769_v45, %v2393_v19  ;;  %v2396_v46 = vpop.xlane.xlu0 %2395 }
 0x57e   : > { %v2468_v18 = vsub.f32 %v7771_v47, %v2396_v46  ;;  %v3264_v46 = vsel %vm2686_vm3, %v7747_v8, 0 }
 0x57f   : > { %v2509_v55 = vmul.f32 1.442695, %v2467_v23 }
 0x580   : > { %v2511_v51 = vmul.f32 1.442695, %v2468_v18  ;;  %4026 = vrot.lane.b32.xlu0 %v7499_v44, %s6837_s27  ;;  %v3168_v44 = vsel %vm2686_vm3, %v7743_v6, 0 }
 0x581   : > { %6332 = vpow2.f32 %v2509_v55 }
 0x582   : > { %6334 = vpow2.f32 %v2511_v51  ;;  %v3312_v51 = vsel %vm2686_vm3, %v7789_v29, 0 }
 0x583   : > { %v7963_v31 = vpop.eup %6328 }
 0x584   : > { %v7965_v59 = vpop.eup %6330  ;;  %v2399_v30 = vpop.xlane.xlu1 %2398  ;;  %v2657_v36 = vpack.c.bf16 %v7963_v31, %v7963_v31 }
 0x585   : > { %v2402_v39 = vpop.xlane.xlu0 %2401  ;;  %v2469_v45 = vsub.f32 %v7781_v0, %v2399_v30  ;;  %v2658_v34 = vpack.c.bf16 %v7965_v59, %v7965_v59  ;;  %v8571_v0 = vmov 0.0  }
 0x586   : > { %v2470_v47 = vsub.f32 %v7783_v63, %v2402_v39  ;;  %5863 = vmatmul.mubr.msk.bf16.vlgmr.msra.gmra.mrb[88].mxu0 %vm795_vm2, %v2657_v36  ;;  %v3360_v36 = vsel %vm2686_vm3, %v7751_v12, 0 }
 0x587   : > { %v2513_v16 = vmul.f32 1.442695, %v2469_v45  ;;  %5869 = vmatmul.mubr.msk.bf16.vlgmr.msra.gmra.mrb[80].mxu1 %vm795_vm2, %v2658_v34  ;;  %5873 = vmatpush3.bf16.msra.mxu0 %v3168_v44  ;;  %v3408_v34 = vsel %vm2686_vm3, %v7749_v11, 0 }
 0x588   : > { %v2515_v27 = vmul.f32 1.442695, %v2470_v47  ;;  %5879 = vmatpush3.bf16.msra.mxu1 %v3216_v9  ;;  %5874 = vmatprep.mubr.msk.bf16.mxu0 %vm6832_vm1, %v8571_v0 }
 0x589   : > { %6336 = vpow2.f32 %v2513_v16  ;;  %5880 = vmatprep.mubr.msk.bf16.mxu1 %vm6832_vm1, %v8571_v0  ;;  %5884 = vmatprep.subr.bf16.mxu0 %v8571_v0 }
 0x58a   : > { %6338 = vpow2.f32 %v2515_v27  ;;  %5890 = vmatprep.subr.bf16.mxu1 %v8571_v0 }
 0x58b   : > { %v7985_v6 = vpop.eup %6332 }
 0x58c   : > { %v7987_v7 = vpop.eup %6334  ;;  %v2659_v63 = vpack.c.bf16 %v7985_v6, %v7985_v6 }
 0x58d   : > { %v2405_v42 = vpop.xlane.xlu1 %2404  ;;  %v2408_v19 = vpop.xlane.xlu0 %2407  ;;  %v2660_v23 = vpack.c.bf16 %v7987_v7, %v7987_v7 }
 0x58e   : > { %v2471_v18 = vsub.f32 %v7793_v25, %v2405_v42  ;;  %v2472_v55 = vsub.f32 %v7795_v26, %v2408_v19  ;;  %5875 = vmatmul.mubr.msk.bf16.vlgmr.msra.gmra.mrb[92].mxu0 %vm795_vm2, %v2659_v63  ;;  %v2448_v63 = vsel %vm795_vm2, %v7949_v57, -inf  ;;  %v3456_v42 = vsel %vm2686_vm3, %v7755_v15, 0 }
 0x58f   : > { %5881 = vmatmul.mubr.msk.bf16.vlgmr.msra.gmra.mrb[84].mxu1 %vm795_vm2, %v2660_v23  ;;  %5885 = vmatpush3.bf16.msra.mxu0 %v3264_v46  ;;  %v3504_v46 = vsel %vm2686_vm3, %v7753_v14, 0  ;;  %v2451_v14 = vsel %vm795_vm2, %v7955_v10, -inf }
 0x590   : > { %v2517_v30 = vmul.f32 1.442695, %v2471_v18  ;;  %v2519_v39 = vmul.f32 1.442695, %v2472_v55  ;;  %5891 = vmatpush3.bf16.msra.mxu1 %v3312_v51  ;;  %5886 = vmatprep.mubr.msk.bf16.mxu0 %vm6832_vm1, %v8571_v0  ;;  %v2445_v51 = vsel %vm795_vm2, %v7947_v52, -inf }
 0x591   : > { %5892 = vmatprep.mubr.msk.bf16.mxu1 %vm6832_vm1, %v8571_v0  ;;  %5896 = vmatprep.subr.bf16.mxu0 %v8571_v0 }
 0x592   : > { %6340 = vpow2.f32 %v2517_v30  ;;  %5902 = vmatprep.subr.bf16.mxu1 %v8571_v0 }
 0x593   : > { %v8007_v8 = vpop.eup %6336  ;;  %6342 = vpow2.f32 %v2519_v39  ;;  %v2454_v39 = vsel %vm795_vm2, %v7953_v20, -inf }
 0x594   : > { %v8009_v29 = vpop.eup %6338  ;;  %v2661_v25 = vpack.c.bf16 %v8007_v8, %v8007_v8 }
 0x595   : > { %v2662_v26 = vpack.c.bf16 %v8009_v29, %v8009_v29 }
 0x596   : > { %v2411_v45 = vpop.xlane.xlu1 %2410  ;;  %v2414_v47 = vpop.xlane.xlu0 %2413  ;;  %5887 = vmatmul.mubr.msk.bf16.vlgmr.msra.gmra.mrb[96].mxu0 %vm795_vm2, %v2661_v25 }
 0x597   : > { %v2473_v44 = vsub.f32 %v7804_v53, %v2411_v45  ;;  %v2474_v9 = vsub.f32 %v7806_v61, %v2414_v47  ;;  %5893 = vmatmul.mubr.msk.bf16.vlgmr.msra.gmra.mrb[88].mxu1 %vm795_vm2, %v2662_v26  ;;  %5897 = vmatpush3.bf16.msra.mxu0 %v3360_v36  ;;  %v3552_v36 = vsel %vm2686_vm3, %v7767_v38, 0 }
 0x598   : > { %5903 = vmatpush3.bf16.msra.mxu1 %v3408_v34  ;;  %5898 = vmatprep.mubr.msk.bf16.mxu0 %vm6832_vm1, %v8571_v0  ;;  %v3600_v34 = vsel %vm2686_vm3, %v7765_v40, 0 }
 0x599   : > { %v2521_v16 = vmul.f32 1.442695, %v2473_v44  ;;  %v2523_v12 = vmul.f32 1.442695, %v2474_v9  ;;  %5904 = vmatprep.mubr.msk.bf16.mxu1 %vm6832_vm1, %v8571_v0  ;;  %5908 = vmatprep.subr.bf16.mxu0 %v8571_v0 }
 0x59a   : > { %5914 = vmatprep.subr.bf16.mxu1 %v8571_v0 }
 0x59b   : > { %6344 = vpow2.f32 %v2521_v16 }
 0x59c   : > { %v8029_v11 = vpop.eup %6340  ;;  %6346 = vpow2.f32 %v2523_v12 }
 0x59d   : > { %v8031_v53 = vpop.eup %6342  ;;  %v2663_v61 = vpack.c.bf16 %v8029_v11, %v8029_v11 }
 0x59e   : > { %v2664_v27 = vpack.c.bf16 %v8031_v53, %v8031_v53 }
 0x59f   : > { %v2417_v19 = vpop.xlane.xlu1 %2416  ;;  %v2420_v23 = vpop.xlane.xlu0 %2419  ;;  %5899 = vmatmul.mubr.msk.bf16.vlgmr.msra.gmra.mrb[100].mxu0 %vm795_vm2, %v2663_v61  ;;  %2449 = vmax.xlane.f32.xlu0 %v2448_v63  ;;  %v3648_v61 = vsel %vm2686_vm3, %v7779_v33, 0 }
 0x5a0   : > { %v2475_v18 = vsub.f32 %v7813_v28, %v2417_v19  ;;  %v2476_v55 = vsub.f32 %v7815_v35, %v2420_v23  ;;  %5905 = vmatmul.mubr.msk.bf16.vlgmr.msra.gmra.mrb[92].mxu1 %vm795_vm2, %v2664_v27  ;;  %5909 = vmatpush3.bf16.msra.mxu0 %v3456_v42  ;;  %v3696_v42 = vsel %vm2686_vm3, %v7802_v4, 0 }
 0x5a1   : > { %5915 = vmatpush3.bf16.msra.mxu1 %v3504_v46  ;;  %2446 = vmax.xlane.f32.xlu1 %v2445_v51 }
 0x5a2   : > { %v2525_v15 = vmul.f32 1.442695, %v2475_v18  ;;  %v2527_v30 = vmul.f32 1.442695, %v2476_v55  ;;  %5910 = vmatprep.mubr.msk.bf16.mxu0 %vm6832_vm1, %v8571_v0  ;;  %5916 = vmatprep.mubr.msk.bf16.mxu1 %vm6832_vm1, %v8571_v0  ;;  %v3744_v55 = vsel %vm2686_vm3, %v7791_v43, 0 }
 0x5a3   : > { %2455 = vmax.xlane.f32.xlu0 %v2454_v39  ;;  %5920 = vmatprep.subr.bf16.mxu0 %v8571_v0  ;;  %v2559_v39 = vsel %vm795_vm2, %v7855_v3, 0.0  ;;  %v2580_v3 = vsel %vm795_vm2, %v7965_v59, 0.0  ;;  %v2592_v59 = vsel %vm795_vm2, %v8009_v29, 0.0 }
 0x5a4   : > { %6348 = vpow2.f32 %v2525_v15  ;;  %5926 = vmatprep.subr.bf16.mxu1 %v8571_v0  ;;  %v3840_v15 = vsel %vm2686_vm3, %v7885_v1, 0  ;;  %v2553_v1 = vsel %vm795_vm2, %v7821_v5, 0.0  ;;  %v2574_v5 = vsel %vm795_vm2, %v7907_v17, 0.0 }
 0x5a5   : > { %v8059_v28 = vpop.eup %6344  ;;  %6350 = vpow2.f32 %v2527_v30  ;;  %2452 = vmax.xlane.f32.xlu1 %v2451_v14  ;;  %v3888_v30 = vsel %vm2686_vm3, %v7879_v37, 0  ;;  %v2556_v37 = vsel %vm795_vm2, %v7841_v21, 0.0  ;;  %v2568_v14 = vsel %vm795_vm2, %v7891_v58, 0.0 }
 0x5a6   : > { %v8061_v35 = vpop.eup %6346  ;;  %v2665_v25 = vpack.c.bf16 %v8059_v28, %v8059_v28  ;;  %v2565_v21 = vsel %vm795_vm2, %v7893_v41, 0.0  ;;  %v2571_v58 = vsel %vm795_vm2, %v7912_v54, 0.0  ;;  %v2577_v41 = vsel %vm795_vm2, %v7963_v31, 0.0 }
 0x5a7   : > { %v2666_v26 = vpack.c.bf16 %v8061_v35, %v8061_v35 }
 0x5a8   : > { %v2423_v45 = vpop.xlane.xlu1 %2422  ;;  %v2426_v47 = vpop.xlane.xlu0 %2425  ;;  %5911 = vmatmul.mubr.msk.bf16.vlgmr.msra.gmra.mrb[104].mxu0 %vm795_vm2, %v2665_v25  ;;  %v2562_v25 = vsel %vm795_vm2, %v7866_v56, 0.0  ;;  %v2586_v56 = vsel %vm795_vm2, %v7987_v7, 0.0 }
 0x5a9   : > { %v2477_v44 = vsub.f32 %v7832_v13, %v2423_v45  ;;  %v2478_v9 = vsub.f32 %v7834_v22, %v2426_v47  ;;  %5917 = vmatmul.mubr.msk.bf16.vlgmr.msra.gmra.mrb[96].mxu1 %vm795_vm2, %v2666_v26  ;;  %5921 = vmatpush3.bf16.msra.mxu0 %v3552_v36 }
 0x5aa   : > { %5927 = vmatpush3.bf16.msra.mxu1 %v3600_v34  ;;  %5922 = vmatprep.mubr.msk.bf16.mxu0 %vm6832_vm1, %v8571_v0  ;;  %v2583_v34 = vsel %vm795_vm2, %v7985_v6, 0.0 }
 0x5ab   : > { %v2529_v16 = vmul.f32 1.442695, %v2477_v44  ;;  %v2531_v38 = vmul.f32 1.442695, %v2478_v9  ;;  %5928 = vmatprep.mubr.msk.bf16.mxu1 %vm6832_vm1, %v8571_v0  ;;  %5932 = vmatprep.subr.bf16.mxu0 %v8571_v0  ;;  %v2598_v9 = vsel %vm795_vm2, %v8031_v53, 0.0 }
 0x5ac   : > { %5938 = vmatprep.subr.bf16.mxu1 %v8571_v0 }
 0x5ad   : > { %6352 = vpow2.f32 %v2529_v16 }
 0x5ae   : > { %v8081_v40 = vpop.eup %6348  ;;  %6354 = vpow2.f32 %v2531_v38 }
 0x5af   : > { %v8083_v13 = vpop.eup %6350  ;;  %v2667_v22 = vpack.c.bf16 %v8081_v40, %v8081_v40 }
 0x5b0   : > { %v2668_v12 = vpack.c.bf16 %v8083_v13, %v8083_v13 }
 0x5b1   : > { %v2429_v27 = vpop.xlane.xlu1 %2428  ;;  %v2432_v63 = vpop.xlane.xlu0 %2431  ;;  %5923 = vmatmul.mubr.msk.bf16.vlgmr.msra.gmra.mrb[108].mxu0 %vm795_vm2, %v2667_v22 }
 0x5b2   : > { %v2479_v19 = vsub.f32 %v7851_v2, %v2429_v27  ;;  %v2480_v23 = vsub.f32 %v7853_v32, %v2432_v63  ;;  %5929 = vmatmul.mubr.msk.bf16.vlgmr.msra.gmra.mrb[100].mxu1 %vm795_vm2, %v2668_v12  ;;  %5933 = vmatpush3.bf16.msra.mxu0 %v3648_v61  ;;  %v2589_v12 = vsel %vm795_vm2, %v8007_v8, 0.0  ;;  %v2595_v61 = vsel %vm795_vm2, %v8029_v11, 0.0  ;;  %v8572_v63 = vld [vmem:[#allocation26_spill] sm:$0xff] }
 0x5b3   : > { %5939 = vmatpush3.bf16.msra.mxu1 %v3696_v42  ;;  %5934 = vmatprep.mubr.msk.bf16.mxu0 %vm6832_vm1, %v8571_v0  ;;  %v2610_v8 = vsel %vm795_vm2, %v8083_v13, 0.0 }
 0x5b4   : > { %v2533_v46 = vmul.f32 1.442695, %v2479_v19  ;;  %v2535_v33 = vmul.f32 1.442695, %v2480_v23  ;;  %5940 = vmatprep.mubr.msk.bf16.mxu1 %vm6832_vm1, %v8571_v0  ;;  %5944 = vmatprep.subr.bf16.mxu0 %v8571_v0 }
 0x5b5   : > { %5950 = vmatprep.subr.bf16.mxu1 %v8571_v0 }
 0x5b6   : > { %6356 = vpow2.f32 %v2533_v46  ;;  %4170 = vrot.lane.b32.xlu1 %v7511_v48, %s6837_s27  ;;  %v3792_v48 = vsel %vm2686_vm3, %v7777_v62, 0 }
 0x5b7   : > { %v8105_v4 = vpop.eup %6352  ;;  %6358 = vpow2.f32 %v2535_v33 }
 0x5b8   : > { %v8107_v2 = vpop.eup %6354  ;;  %v2669_v32 = vpack.c.bf16 %v8105_v4, %v8105_v4 }
 0x5b9   : > { %v2670_v18 = vpack.c.bf16 %v8107_v2, %v8107_v2  ;;  %4122 = vrot.lane.b32.xlu0 %v7513_v50, %s6837_s27 }
 0x5ba   : > { %5935 = vmatmul.mubr.msk.bf16.vlgmr.msra.gmra.mrb[112].mxu0 %vm795_vm2, %v2669_v32  ;;  %v2601_v32 = vsel %vm795_vm2, %v8059_v28, 0.0 }
 0x5bb   : > { %5941 = vmatmul.mubr.msk.bf16.vlgmr.msra.gmra.mrb[104].mxu1 %vm795_vm2, %v2670_v18  ;;  %5945 = vmatpush3.bf16.msra.mxu0 %v3744_v55  ;;  %v2616_v18 = vsel %vm795_vm2, %v8107_v2, 0.0 }
 0x5bc   : > { %5951 = vmatpush3.bf16.msra.mxu1 %v3792_v48  ;;  %5946 = vmatprep.mubr.msk.bf16.mxu0 %vm6832_vm1, %v8571_v0 }
 0x5bd   : > { %5952 = vmatprep.mubr.msk.bf16.mxu1 %vm6832_vm1, %v8571_v0  ;;  %5956 = vmatprep.subr.bf16.mxu0 %v8571_v0 }
 0x5be   : > { %5962 = vmatprep.subr.bf16.mxu1 %v8571_v0 }
 0x5c0   : > { %v8127_v50 = vpop.eup %6356 }
 0x5c1   : > { %v8129_v43 = vpop.eup %6358  ;;  %v2671_v62 = vpack.c.bf16 %v8127_v50, %v8127_v50 }
 0x5c2   : > { %v2672_v51 = vpack.c.bf16 %v8129_v43, %v8129_v43 }
 0x5c3   : > { %5947 = vmatmul.mubr.msk.bf16.vlgmr.msra.gmra.mrb[116].mxu0 %vm795_vm2, %v2671_v62 }
 0x5c4   : > { %5953 = vmatmul.mubr.msk.bf16.vlgmr.msra.gmra.mrb[108].mxu1 %vm795_vm2, %v2672_v51  ;;  %5957 = vmatpush3.bf16.msra.mxu0 %v3840_v15  ;;  %v2607_v51 = vsel %vm795_vm2, %v8081_v40, 0.0  ;;  %v2613_v40 = vsel %vm795_vm2, %v8105_v4, 0.0  ;;  %v2619_v4 = vsel %vm795_vm2, %v8127_v50, 0.0 }
 0x5c5   : > { %5963 = vmatpush3.bf16.msra.mxu1 %v3888_v30  ;;  %5958 = vmatprep.mubr.msk.bf16.mxu0 %vm6832_vm1, %v8571_v0 }
 0x5c6   : > { %5968 = vmatprep.subr.bf16.mxu0 %v8571_v0  ;;  %5964 = vmatprep.mubr.msk.bf16.mxu1 %vm6832_vm1, %v8571_v0 }
 0x5c7   : > { %5974 = vmatprep.subr.bf16.mxu1 %v8571_v0 }
 0x5d8   : > { %2554 = vadd.xlane.f32.xlu0 %v2553_v1  ;;  %v2622_v1 = vsel %vm795_vm2, %v8129_v43, 0.0 }
 0x5da   : > { %2557 = vadd.xlane.f32.xlu1 %v2556_v37  ;;  %v8573_v37 = vld [vmem:[#allocation24_spill] sm:$0xff] }
 0x5db   : > { %v3936_v2 = vsel %vm2686_vm3, %v8573_v37, 0  ;;  %v4299_v37 = vld [vmem:[#allocation8 + $0x4] sm:$0xf] }
 0x5dc   : > { %2560 = vadd.xlane.f32.xlu0 %v2559_v39  ;;  %v8574_v39 = vld [vmem:[#allocation25_spill] sm:$0xff] }
 0x5de   : > { %2569 = vadd.xlane.f32.xlu1 %v2568_v14  ;;  %v3984_v14 = vsel %vm2686_vm3, %v8574_v39, 0 }
 0x5e0   : > { %2563 = vadd.xlane.f32.xlu0 %v2562_v25 }
 0x5e2   : > { %2575 = vadd.xlane.f32.xlu1 %v2574_v5 }
 0x5e4   : > { %2566 = vadd.xlane.f32.xlu0 %v2565_v21 }
 0x5e6   : > { %2581 = vadd.xlane.f32.xlu1 %v2580_v3 }
 0x5e8   : > { %2572 = vadd.xlane.f32.xlu0 %v2571_v58 }
 0x5e9   : > { %v8165_v26 = vpop.f32.mrb[72].mxu0 }
 0x5ea   : > { %v5816_v36 = vpop.f32.mrb[73].mxu0  ;;  %2587 = vadd.xlane.f32.xlu1 %v2586_v56 }
 0x5eb   : > { %v2727_v17 = vpop.f32.mrb[74].mxu0 }
 0x5ec   : > { %v5817_v45 = vpop.f32.mrb[75].mxu0  ;;  %2578 = vadd.xlane.f32.xlu0 %v2577_v41 }
 0x5ee   : > { %2593 = vadd.xlane.f32.xlu1 %v2592_v59 }
 0x5ef   : > { %v2435_v47 = vpop.xlane.xlu1 %2434  ;;  %v2438_v54 = vpop.xlane.xlu0 %2437 }
 0x5f0   : > { %v2481_v44 = vsub.f32 %v7915_v24, %v2435_v47  ;;  %v2482_v7 = vsub.f32 %v7917_v49, %v2438_v54  ;;  %2584 = vadd.xlane.f32.xlu0 %v2583_v34  ;;  %v2604_v24 = vsel %vm795_vm2, %v8061_v35, 0.0 }
 0x5f1   : > { %v8179_v31 = vpop.f32.mrb[64].mxu1 }
 0x5f2   : > { %v2537_v16 = vmul.f32 1.442695, %v2481_v44  ;;  %v2539_v38 = vmul.f32 1.442695, %v2482_v7  ;;  %2599 = vadd.xlane.f32.xlu1 %v2598_v9  ;;  %v5822_v29 = vpop.f32.mrb[65].mxu1 }
 0x5f3   : > { %v2775_v22 = vpop.f32.mrb[66].mxu1 }
 0x5f4   : > { %6360 = vpow2.f32 %v2537_v16  ;;  %2590 = vadd.xlane.f32.xlu0 %v2589_v12  ;;  %v5823_v6 = vpop.f32.mrb[67].mxu1 }
 0x5f5   : > { %6362 = vpow2.f32 %v2539_v38 }
 0x5f6   : > { %2605 = vadd.xlane.f32.xlu1 %v2604_v24 }
 0x5f7   : > { %v2441_v49 = vpop.xlane.xlu1 %2440  ;;  %v2444_v53 = vpop.xlane.xlu0 %2443 }
 0x5f8   : > { %v2483_v27 = vsub.f32 %v7939_v60, %v2441_v49  ;;  %v2484_v42 = vsub.f32 %v8572_v63, %v2444_v53  ;;  %2596 = vadd.xlane.f32.xlu0 %v2595_v61 }
 0x5f9   : > { %v8189_v19 = vpop.f32.mrb[76].mxu0 }
 0x5fa   : > { %v2541_v23 = vmul.f32 1.442695, %v2483_v27  ;;  %v5828_v46 = vpop.f32.mrb[77].mxu0  ;;  %v2543_v33 = vmul.f32 1.442695, %v2484_v42  ;;  %2611 = vadd.xlane.f32.xlu1 %v2610_v8 }
 0x5fb   : > { %v2823_v35 = vpop.f32.mrb[78].mxu0  ;;  %v4075_v21 = vpop.permute.xlu1 %4074 }
 0x5fc   : > { %6364 = vpow2.f32 %v2541_v23  ;;  %v5829_v11 = vpop.f32.mrb[79].mxu0  ;;  %2602 = vadd.xlane.f32.xlu0 %v2601_v32  ;;  %v4027_v3 = vpop.permute.xlu0 %4026  ;;  %v4080_v17 = vsel %vm2686_vm3, %v4075_v21, 0 }
 0x5fd   : > { %6366 = vpow2.f32 %v2543_v33  ;;  %v8195_v60 = vpop.f32.mrb[68].mxu1  ;;  %v4032_v41 = vsel %vm2686_vm3, %v4027_v3, 0 }
 0x5fe   : > { %v6361_v55 = vpop.eup %6360  ;;  %v5834_v48 = vpop.f32.mrb[69].mxu1  ;;  %2617 = vadd.xlane.f32.xlu1 %v2616_v18 }
 0x5ff   : > { %v6363_v13 = vpop.eup %6362  ;;  %v2871_v62 = vpop.f32.mrb[70].mxu1  ;;  %v2673_v15 = vpack.c.bf16 %v6361_v55, %v6361_v55  ;;  %v2625_v45 = vsel %vm795_vm2, %v6361_v55, 0.0 }
 0x600   : > { %v5835_v30 = vpop.f32.mrb[71].mxu1  ;;  %2608 = vadd.xlane.f32.xlu0 %v2607_v51  ;;  %v2674_v28 = vpack.c.bf16 %v6363_v13, %v6363_v13  ;;  %v2628_v43 = vsel %vm795_vm2, %v6363_v13, 0.0 }
 0x601   : > { %5959 = vmatmul.mubr.msk.bf16.vlgmr.msra.gmra.mrb[120].mxu0 %vm795_vm2, %v2673_v15  ;;  %v4298_v30 = vld [vmem:[#allocation8] sm:$0xf] }
 0x602   : > { %2623 = vadd.xlane.f32.xlu1 %v2622_v1  ;;  %5965 = vmatmul.mubr.msk.bf16.vlgmr.msra.gmra.mrb[112].mxu1 %vm795_vm2, %v2674_v28 }
 0x603   : > { %5969 = vmatpush3.bf16.msra.mxu0 %v3936_v2  ;;  %5975 = vmatpush3.bf16.msra.mxu1 %v3984_v14 }
 0x604   : > { %2614 = vadd.xlane.f32.xlu0 %v2613_v40  ;;  %5970 = vmatprep.mubr.msk.bf16.mxu0 %vm6832_vm1, %v8571_v0  ;;  %v4395_v40 = vsel %vm2686_vm3, %v4299_v37, 0 }
 0x605   : > { %5980 = vmatprep.subr.bf16.mxu0 %v8571_v0  ;;  %5976 = vmatprep.mubr.msk.bf16.mxu1 %vm6832_vm1, %v8571_v0 }
 0x606   : > { %v6365_v25 = vpop.eup %6364  ;;  %2629 = vadd.xlane.f32.xlu1 %v2628_v43  ;;  %5986 = vmatprep.subr.bf16.mxu1 %v8571_v0 }
 0x607   : > { %v6367_v5 = vpop.eup %6366  ;;  %v2675_v58 = vpack.c.bf16 %v6365_v25, %v6365_v25  ;;  %v2631_v50 = vsel %vm795_vm2, %v6365_v25, 0.0  ;;  %v4315_v25 = vsel %vm2686_vm3, %v4298_v30, 0 }
 0x608   : > { %2620 = vadd.xlane.f32.xlu0 %v2619_v4  ;;  %v2634_v56 = vsel %vm795_vm2, %v6367_v5, 0.0  ;;  %v2676_v36 = vpack.c.bf16 %v6367_v5, %v6367_v5  ;;  %v8262_v5 = vld [vmem:[#allocation8 + $0x8] sm:$0xf] }
 0x609   : > { %5971 = vmatmul.mubr.msk.bf16.vlgmr.msra.gmra.mrb[124].mxu0 %vm795_vm2, %v2675_v58 }
 0x60a   : > { %2635 = vadd.xlane.f32.xlu1 %v2634_v56  ;;  %5977 = vmatmul.mubr.msk.bf16.vlgmr.msra.gmra.mrb[116].mxu1 %vm795_vm2, %v2676_v36 }
 0x60b   : > { %5981 = vmatpush3.bf16.msra.mxu0 %v4032_v41  ;;  %5987 = vmatpush3.bf16.msra.mxu1 %v4080_v17  ;;  %v8271_v41 = vld [vmem:[#allocation8 + $0xc] sm:$0xf] }
 0x60c   : > { %2626 = vadd.xlane.f32.xlu0 %v2625_v45  ;;  %5982 = vmatprep.mubr.msk.bf16.mxu0 %vm6832_vm1, %v8571_v0 }
 0x60d   : > { %5988 = vmatprep.mubr.msk.bf16.mxu1 %vm6832_vm1, %v8571_v0  ;;  %5992 = vmatprep.subr.bf16.mxu0 %v8571_v0 }
 0x60e   : > { %5998 = vmatprep.subr.bf16.mxu1 %v8571_v0 }
 0x610   : > { %2632 = vadd.xlane.f32.xlu0 %v2631_v50 }
 0x62c   : > { %v2450_v59 = vpop.xlane.xlu0 %2449 }
 0x62d   : > { %v2486_v47 = vsub.f32 %v7949_v57, %v2450_v59 }
 0x62e   : > { %v2447_v54 = vpop.xlane.xlu1 %2446  ;;  %v8234_v34 = vpop.f32.mrb[72].mxu1 }
 0x62f   : > { %v2485_v44 = vsub.f32 %v7947_v52, %v2447_v54  ;;  %v2547_v7 = vmul.f32 1.442695, %v2486_v47  ;;  %v8237_v9 = vpop.f32.mrb[80].mxu0  ;;  %v5846_v16 = vpop.f32.mrb[73].mxu1 }
 0x630   : > { %v5840_v38 = vpop.f32.mrb[81].mxu0  ;;  %v2456_v29 = vpop.xlane.xlu0 %2455 }
 0x631   : > { %v2545_v22 = vmul.f32 1.442695, %v2485_v44  ;;  %6368 = vpow2.f32 %v2547_v7  ;;  %v2488_v12 = vsub.f32 %v7953_v20, %v2456_v29  ;;  %v2919_v6 = vpop.f32.mrb[82].mxu0  ;;  %v2967_v24 = vpop.f32.mrb[74].mxu1 }
 0x632   : > { %v2453_v49 = vpop.xlane.xlu1 %2452  ;;  %v5841_v53 = vpop.f32.mrb[83].mxu0 }
 0x633   : > { %6370 = vpow2.f32 %v2545_v22  ;;  %v2487_v57 = vsub.f32 %v7955_v10, %v2453_v49  ;;  %v2551_v61 = vmul.f32 1.442695, %v2488_v12  ;;  %v5847_v27 = vpop.f32.mrb[75].mxu1 }
 0x634   : > { %v4123_v48 = vpop.permute.xlu0 %4122 }
 0x635   : > { %v2549_v52 = vmul.f32 1.442695, %v2487_v57  ;;  %6372 = vpow2.f32 %v2551_v61  ;;  %v4128_v28 = vsel %vm2686_vm3, %v4123_v48, 0 }
 0x636   : > { %v8241_v63 = vpop.f32.mrb[76].mxu1  ;;  %v4171_v11 = vpop.permute.xlu1 %4170 }
 0x637   : > { %6374 = vpow2.f32 %v2549_v52  ;;  %v8243_v42 = vpop.f32.mrb[84].mxu0  ;;  %v5858_v8 = vpop.f32.mrb[77].mxu1  ;;  %v4176_v13 = vsel %vm2686_vm3, %v4171_v11, 0 }
 0x638   : > { %v5852_v23 = vpop.f32.mrb[85].mxu0  ;;  %v3063_v46 = vpop.f32.mrb[78].mxu1 }
 0x639   : > { %v3015_v20 = vpop.f32.mrb[86].mxu0  ;;  %v5859_v33 = vpop.f32.mrb[79].mxu1 }
 0x63a   : > { %v5853_v35 = vpop.f32.mrb[87].mxu0 }
 0x63b   : > { %v6369_v32 = vpop.eup %6368 }
 0x63c   : > { %v2640_v18 = vsel %vm795_vm2, %v6369_v32, 0.0  ;;  %v2678_v10 = vpack.c.bf16 %v6369_v32, %v6369_v32 }
 0x63d   : > { %v6371_v55 = vpop.eup %6370  ;;  %2641 = vadd.xlane.f32.xlu1 %v2640_v18 }
 0x63e   : > { %v2637_v62 = vsel %vm795_vm2, %v6371_v55, 0.0  ;;  %v2677_v51 = vpack.c.bf16 %v6371_v55, %v6371_v55  ;;  %5989 = vmatmul.mubr.msk.bf16.vlgmr.msra.gmra.mrb[120].mxu1 %vm795_vm2, %v2678_v10 }
 0x63f   : > { %v6373_v15 = vpop.eup %6372  ;;  %2638 = vadd.xlane.f32.xlu0 %v2637_v62  ;;  %5999 = vmatpush3.bf16.msra.mxu1 %v4176_v13 }
 0x640   : > { %5983 = vmatmul.mubr.msk.bf16.vlgmr.msra.gmra.mrb[128].mxu0 %vm795_vm2, %v2677_v51  ;;  %v2646_v1 = vsel %vm795_vm2, %v6373_v15, 0.0  ;;  %6000 = vmatprep.mubr.msk.bf16.mxu1 %vm6832_vm1, %v8571_v0  ;;  %v2680_v14 = vpack.c.bf16 %v6373_v15, %v6373_v15 }
 0x641   : > { %v6375_v2 = vpop.eup %6374  ;;  %5993 = vmatpush3.bf16.msra.mxu0 %v4128_v28  ;;  %2647 = vadd.xlane.f32.xlu1 %v2646_v1 }
 0x642   : > { %v2643_v39 = vsel %vm795_vm2, %v6375_v2, 0.0  ;;  %5994 = vmatprep.mubr.msk.bf16.mxu0 %vm6832_vm1, %v8571_v0  ;;  %6080 = vmatprep.subr.msk.bf16.mxu0 %vm2686_vm3, %v4298_v30  ;;  %v2679_v43 = vpack.c.bf16 %v6375_v2, %v6375_v2 }
 0x643   : > { %2644 = vadd.xlane.f32.xlu0 %v2643_v39  ;;  %6081 = vmatprep.subr.msk.bf16.mxu1 %vm2686_vm3, %v4299_v37 }
 0x646   : > { %6001 = vmatmul.mubr.msk.bf16.vlgmr.msra.gmra.mrb[124].mxu1 %vm795_vm2, %v2680_v14 }
 0x647   : > { %6015 = vmatpush3.bf16.msra.mxu1 %v4395_v40 }
 0x648   : > { %5995 = vmatmul.mubr.msk.bf16.vlgmr.msra.gmra.mrb[132].mxu0 %vm795_vm2, %v2679_v43  ;;  %6083 = vmatprep.subr.msk.bf16.mxu1 %vm2686_vm3, %v8271_v41 }
 0x649   : > { %6005 = vmatpush3.bf16.msra.mxu0 %v4315_v25 }
 0x64a   : > { %6082 = vmatprep.subr.msk.bf16.mxu0 %vm2686_vm3, %v8262_v5 }
 0x659   : > { %v8267_v0 = vpop.f32.mrb[88].mxu0 }
 0x65a   : > { %v8269_v21 = vpop.f32.mrb[80].mxu1  ;;  %v5864_v3 = vpop.f32.mrb[89].mxu0 }
 0x65b   : > { %v5870_v4 = vpop.f32.mrb[81].mxu1  ;;  %v3111_v58 = vpop.f32.mrb[90].mxu0 }
 0x65c   : > { %v3159_v56 = vpop.f32.mrb[82].mxu1  ;;  %v5865_v36 = vpop.f32.mrb[91].mxu0  ;;  %v4475_v4 = vsel %vm2686_vm3, %v8262_v5, 0 }
 0x65d   : > { %v5871_v17 = vpop.f32.mrb[83].mxu1 }
 0x661   : > { %v8273_v45 = vpop.f32.mrb[92].mxu0 }
 0x662   : > { %v8277_v50 = vpop.f32.mrb[84].mxu1  ;;  %v5876_v59 = vpop.f32.mrb[93].mxu0 }
 0x663   : > { %v5882_v47 = vpop.f32.mrb[85].mxu1  ;;  %v3207_v54 = vpop.f32.mrb[94].mxu0 }
 0x664   : > { %v3255_v44 = vpop.f32.mrb[86].mxu1  ;;  %v5877_v7 = vpop.f32.mrb[95].mxu0 }
 0x665   : > { %v5883_v16 = vpop.f32.mrb[87].mxu1  ;;  %v2555_v38 = vpop.xlane.xlu0 %2554 }
 0x666   : > { %6376 = vrcp.f32 %v2555_v38 }
 0x667   : > { %v2558_v29 = vpop.xlane.xlu1 %2557 }
 0x668   : > { %6378 = vrcp.f32 %v2558_v29 }
 0x669   : > { %v8279_v22 = vpop.f32.mrb[96].mxu0  ;;  %v2561_v12 = vpop.xlane.xlu0 %2560 }
 0x66a   : > { %v8281_v6 = vpop.f32.mrb[88].mxu1  ;;  %v5888_v24 = vpop.f32.mrb[97].mxu0  ;;  %6380 = vrcp.f32 %v2561_v12 }
 0x66b   : > { %v2570_v49 = vpop.xlane.xlu1 %2569  ;;  %v5894_v53 = vpop.f32.mrb[89].mxu1 }
 0x66c   : > { %v3303_v57 = vpop.f32.mrb[98].mxu0  ;;  %v3351_v61 = vpop.f32.mrb[90].mxu1 }
 0x66d   : > { %v5889_v27 = vpop.f32.mrb[99].mxu0  ;;  %v5895_v52 = vpop.f32.mrb[91].mxu1 }
 0x66e   : > { %v2564_v8 = vpop.xlane.xlu0 %2563 }
 0x66f   : > { %v2576_v23 = vpop.xlane.xlu1 %2575  ;;  %6382 = vrcp.f32 %v2564_v8 }
 0x670   : > { %v6377_v46 = vpop.eup %6376  ;;  %6384 = vrcp.f32 %v2570_v49 }
 0x671   : > { %v4250_v20 = vmul.f32 %v6377_v46, %v8165_v26 }
 0x672   : > { %v6379_v33 = vpop.eup %6378  ;;  %v8284_v35 = vpop.f32.mrb[100].mxu0 }
 0x673   : > { %v2567_v32 = vpop.xlane.xlu0 %2566  ;;  %v2582_v11 = vpop.xlane.xlu1 %2581  ;;  %v4251_v10 = vmul.f32 %v6379_v33, %v8179_v31 }
 0x674   : > { %v8286_v18 = vpop.f32.mrb[92].mxu1  ;;  %6386 = vrcp.f32 %v2567_v32  ;;  %v5900_v55 = vpop.f32.mrb[101].mxu0 }
 0x675   : > { %v5906_v48 = vpop.f32.mrb[93].mxu1  ;;  %v3399_v13 = vpop.f32.mrb[102].mxu0  ;;  %v4282_v51 = vpack.c.bf16 %v4251_v10, %v4250_v20  ;;  %6388 = vrcp.f32 %v2576_v23 }
 0x676   : > { %v3447_v62 = vpop.f32.mrb[94].mxu1  ;;  %v5901_v15 = vpop.f32.mrb[103].mxu0 }
 0x677   : > { %v5907_v30 = vpop.f32.mrb[95].mxu1  ;;  %v6381_v28 = vpop.eup %6380  ;;  %6006 = vmatprep.mubr.msk.bf16.mxu0 %vm795_vm2, %v4282_v51 }
 0x678   : > { %v2588_v26 = vpop.xlane.xlu1 %2587  ;;  %v2573_v1 = vpop.xlane.xlu0 %2572  ;;  %v4252_v2 = vmul.f32 %v6381_v28, %v8189_v19 }
 0x679   : > { %v6383_v37 = vpop.eup %6382  ;;  %6390 = vrcp.f32 %v2573_v1  ;;  %v4555_v1 = vsel %vm2686_vm3, %v8271_v41, 0 }
 0x67a   : > { %v4253_v39 = vmul.f32 %v6383_v37, %v8195_v60  ;;  %v6385_v31 = vpop.eup %6384  ;;  %6392 = vrcp.f32 %v2582_v11 }
 0x67b   : > { %v8292_v14 = vpop.f32.mrb[104].mxu0  ;;  %v4255_v59 = vmul.f32 %v6385_v31, %v8234_v34 }
 0x67c   : > { %v2594_v40 = vpop.xlane.xlu1 %2593  ;;  %v8294_v43 = vpop.f32.mrb[96].mxu1  ;;  %v4283_v3 = vpack.c.bf16 %v4253_v39, %v4252_v2 }
 0x67d   : > { %v2579_v25 = vpop.xlane.xlu0 %2578  ;;  %v5912_v56 = vpop.f32.mrb[105].mxu0 }
 0x67e   : > { %v6387_v58 = vpop.eup %6386  ;;  %6394 = vrcp.f32 %v2579_v25  ;;  %v5918_v36 = vpop.f32.mrb[97].mxu1  ;;  %6007 = vmatmul.mubr.msk.bf16.vlgmr.msra.gmra.mrb[136].mxu0 %vm795_vm2, %v4283_v3 }
 0x67f   : > { %v3495_v17 = vpop.f32.mrb[106].mxu0  ;;  %v3543_v19 = vpop.f32.mrb[98].mxu1  ;;  %v4254_v60 = vmul.f32 %v6387_v58, %v8237_v9  ;;  %6025 = vmatpush3.bf16.msra.mxu0 %v4475_v4  ;;  %6396 = vrcp.f32 %v2588_v26 }
 0x680   : > { %v5913_v47 = vpop.f32.mrb[107].mxu0  ;;  %v5919_v54 = vpop.f32.mrb[99].mxu1 }
 0x681   : > { %v2600_v44 = vpop.xlane.xlu1 %2599  ;;  %v2585_v7 = vpop.xlane.xlu0 %2584  ;;  %v4284_v16 = vpack.c.bf16 %v4255_v59, %v4254_v60 }
 0x682   : > { %v6389_v5 = vpop.eup %6388  ;;  %6398 = vrcp.f32 %v2585_v7 }
 0x683   : > { %6010 = vmatprep.mubr.msk.bf16.mxu0 %vm795_vm2, %v4284_v16  ;;  %v6391_v38 = vpop.eup %6390  ;;  %6400 = vrcp.f32 %v2594_v40  ;;  %v4257_v34 = vmul.f32 %v6389_v5, %v8241_v63 }
 0x684   : > { %v8302_v29 = vpop.f32.mrb[108].mxu0  ;;  %v4256_v9 = vmul.f32 %v6391_v38, %v8243_v42  ;;  %v6393_v24 = vpop.eup %6392 }
 0x685   : > { %v2606_v12 = vpop.xlane.xlu1 %2605  ;;  %v8306_v49 = vpop.f32.mrb[100].mxu1  ;;  %v4259_v42 = vmul.f32 %v6393_v24, %v8269_v21 }
 0x686   : > { %v2591_v53 = vpop.xlane.xlu0 %2590  ;;  %v5924_v57 = vpop.f32.mrb[109].mxu0  ;;  %v4285_v27 = vpack.c.bf16 %v4257_v34, %v4256_v9 }
 0x687   : > { %6402 = vrcp.f32 %v2591_v53  ;;  %v5930_v61 = vpop.f32.mrb[101].mxu1  ;;  %v3591_v8 = vpop.f32.mrb[110].mxu0 }
 0x688   : > { %v6395_v52 = vpop.eup %6394  ;;  %v3639_v23 = vpop.f32.mrb[102].mxu1  ;;  %6011 = vmatmul.mubr.msk.bf16.gmra.mrb[140].mxu0 %vm795_vm2, %v4285_v27  ;;  %6404 = vrcp.f32 %v2600_v44 }
 0x689   : > { %v5925_v46 = vpop.f32.mrb[111].mxu0  ;;  %v5931_v20 = vpop.f32.mrb[103].mxu1  ;;  %v4258_v33 = vmul.f32 %v6395_v52, %v8267_v0 }
 0x68a   : > { %v2612_v63 = vpop.xlane.xlu1 %2611  ;;  %v2597_v32 = vpop.xlane.xlu0 %2596 }
 0x68b   : > { %v6397_v11 = vpop.eup %6396  ;;  %v4286_v10 = vpack.c.bf16 %v4259_v42, %v4258_v33  ;;  %6406 = vrcp.f32 %v2597_v32 }
 0x68c   : > { %v6399_v55 = vpop.eup %6398  ;;  %v4261_v48 = vmul.f32 %v6397_v11, %v8277_v50  ;;  %6408 = vrcp.f32 %v2606_v12 }
 0x68d   : > { %6016 = vmatprep.mubr.msk.bf16.mxu1 %vm795_vm2, %v4286_v10  ;;  %v4260_v13 = vmul.f32 %v6399_v55, %v8273_v45  ;;  %v3684_v62 = vpop.f32.mrb[112].mxu0  ;;  %v6401_v15 = vpop.eup %6400 }
 0x68e   : > { %v2618_v51 = vpop.xlane.xlu1 %2617  ;;  %v3732_v0 = vpop.f32.mrb[104].mxu1  ;;  %v4263_v40 = vmul.f32 %v6401_v15, %v8281_v6 }
 0x68f   : > { %v2603_v30 = vpop.xlane.xlu0 %2602  ;;  %v5936_v21 = vpop.f32.mrb[113].mxu0  ;;  %v4287_v26 = vpack.c.bf16 %v4261_v48, %v4260_v13 }
 0x690   : > { %6410 = vrcp.f32 %v2603_v30  ;;  %v5942_v28 = vpop.f32.mrb[105].mxu1  ;;  %v3687_v2 = vpop.f32.mrb[114].mxu0 }
 0x691   : > { %v6403_v37 = vpop.eup %6402  ;;  %v3735_v39 = vpop.f32.mrb[106].mxu1  ;;  %6017 = vmatmul.mubr.msk.bf16.vlgmr.msra.gmra.mrb[128].mxu1 %vm795_vm2, %v4287_v26  ;;  %6412 = vrcp.f32 %v2612_v63 }
 0x692   : > { %v5937_v31 = vpop.f32.mrb[115].mxu0  ;;  %v5943_v50 = vpop.f32.mrb[107].mxu1  ;;  %v4262_v45 = vmul.f32 %v6403_v37, %v8279_v22  ;;  %6035 = vmatpush3.bf16.msra.mxu1 %v4555_v1 }
 0x693   : > { %v2609_v25 = vpop.xlane.xlu0 %2608  ;;  %v6405_v3 = vpop.eup %6404 }
 0x694   : > { %v4288_v4 = vpack.c.bf16 %v4263_v40, %v4262_v45  ;;  %6414 = vrcp.f32 %v2609_v25  ;;  %v2624_v41 = vpop.xlane.xlu1 %2623  ;;  %v4265_v17 = vmul.f32 %v6405_v3, %v8286_v18 }
 0x695   : > { %v6407_v58 = vpop.eup %6406  ;;  %6416 = vrcp.f32 %v2618_v51 }
 0x696   : > { %6020 = vmatprep.mubr.msk.bf16.mxu1 %vm795_vm2, %v4288_v4  ;;  %v3780_v56 = vpop.f32.mrb[116].mxu0  ;;  %v4264_v36 = vmul.f32 %v6407_v58, %v8284_v35  ;;  %v6409_v19 = vpop.eup %6408 }
 0x697   : > { %v3828_v22 = vpop.f32.mrb[108].mxu1  ;;  %v2615_v60 = vpop.xlane.xlu0 %2614  ;;  %v4267_v35 = vmul.f32 %v6409_v19, %v8294_v43 }
 0x698   : > { %6418 = vrcp.f32 %v2615_v60  ;;  %v5948_v6 = vpop.f32.mrb[117].mxu0  ;;  %v5954_v59 = vpop.f32.mrb[109].mxu1  ;;  %v4289_v47 = vpack.c.bf16 %v4265_v17, %v4264_v36 }
 0x699   : > { %v3783_v44 = vpop.f32.mrb[118].mxu0  ;;  %v3831_v7 = vpop.f32.mrb[110].mxu1  ;;  %6420 = vrcp.f32 %v2624_v41 }
 0x69a   : > { %v6411_v54 = vpop.eup %6410  ;;  %v5949_v16 = vpop.f32.mrb[119].mxu0  ;;  %6021 = vmatmul.mubr.msk.bf16.gmra.mrb[132].mxu1 %vm795_vm2, %v4289_v47 }
 0x69b   : > { %v5955_v5 = vpop.f32.mrb[111].mxu1  ;;  %v4266_v38 = vmul.f32 %v6411_v54, %v8292_v14  ;;  %v2621_v18 = vpop.xlane.xlu0 %2620 }
 0x69c   : > { %v6413_v12 = vpop.eup %6412  ;;  %6422 = vrcp.f32 %v2621_v18  ;;  %v2630_v42 = vpop.xlane.xlu1 %2629 }
 0x69d   : > { %v4290_v9 = vpack.c.bf16 %v4267_v35, %v4266_v38  ;;  %v4269_v24 = vmul.f32 %v6413_v12, %v8306_v49 }
 0x69e   : > { %v6415_v34 = vpop.eup %6414 }
 0x69f   : > { %6026 = vmatprep.mubr.msk.bf16.mxu0 %vm795_vm2, %v4290_v9  ;;  %v4268_v53 = vmul.f32 %v6415_v34, %v8302_v29  ;;  %v6417_v57 = vpop.eup %6416  ;;  %v2627_v49 = vpop.xlane.xlu0 %2626 }
 0x6a0   : > { %v4271_v52 = vmul.f32 %v6417_v57, %v3732_v0  ;;  %6424 = vrcp.f32 %v2627_v49  ;;  %v2636_v63 = vpop.xlane.xlu1 %2635 }
 0x6a1   : > { %v4291_v61 = vpack.c.bf16 %v4269_v24, %v4268_v53  ;;  %6426 = vrcp.f32 %v2630_v42 }
 0x6a2   : > { %v6419_v27 = vpop.eup %6418 }
 0x6a3   : > { %6027 = vmatmul.mubr.msk.bf16.vlgmr.msra.gmra.mrb[144].mxu0 %vm795_vm2, %v4291_v61  ;;  %v4270_v14 = vmul.f32 %v6419_v27, %v3684_v62  ;;  %v6421_v43 = vpop.eup %6420  ;;  %v2633_v29 = vpop.xlane.xlu0 %2632 }
 0x6a4   : > { %v4273_v46 = vmul.f32 %v6421_v43, %v3828_v22  ;;  %6428 = vrcp.f32 %v2633_v29 }
 0x6a5   : > { %v4292_v8 = vpack.c.bf16 %v4271_v52, %v4270_v14  ;;  %6430 = vrcp.f32 %v2636_v63 }
 0x6a6   : > { %v6423_v23 = vpop.eup %6422 }
 0x6a7   : > { %6030 = vmatprep.mubr.msk.bf16.mxu0 %vm795_vm2, %v4292_v8  ;;  %v4272_v20 = vmul.f32 %v6423_v23, %v3780_v56 }
 0x6a9   : > { %v4293_v33 = vpack.c.bf16 %v4273_v46, %v4272_v20 }
 0x6aa   : > { %v6425_v32 = vpop.eup %6424 }
 0x6ab   : > { %6031 = vmatmul.mubr.msk.bf16.gmra.mrb[148].mxu0 %vm795_vm2, %v4293_v33  ;;  %v6427_v10 = vpop.eup %6426 }
 0x6ae   : > { %v6429_v26 = vpop.eup %6428 }
 0x6af   : > { %v6431_v37 = vpop.eup %6430 }
 0x6ca   : > { %v2642_v41 = vpop.xlane.xlu1 %2641 }
 0x6cb   : > { %6432 = vrcp.f32 %v2642_v41 }
 0x6cc   : > { %v2639_v56 = vpop.xlane.xlu0 %2638 }
 0x6cd   : > { %6434 = vrcp.f32 %v2639_v56 }
 0x6ce   : > { %v2648_v36 = vpop.xlane.xlu1 %2647 }
 0x6cf   : > { %6436 = vrcp.f32 %v2648_v36 }
 0x6d0   : > { %v2645_v17 = vpop.xlane.xlu0 %2644 }
 0x6d1   : > { %6438 = vrcp.f32 %v2645_v17 }
 0x6d4   : > { %v3876_v11 = vpop.f32.mrb[120].mxu0 }
 0x6d5   : > { %v4274_v55 = vmul.f32 %v6425_v32, %v3876_v11  ;;  %v3924_v48 = vpop.f32.mrb[112].mxu1  ;;  %v5960_v13 = vpop.f32.mrb[121].mxu0 }
 0x6d6   : > { %v4275_v62 = vmul.f32 %v6427_v10, %v3924_v48  ;;  %v5966_v51 = vpop.f32.mrb[113].mxu1  ;;  %v3879_v15 = vpop.f32.mrb[122].mxu0 }
 0x6d7   : > { %v3927_v0 = vpop.f32.mrb[114].mxu1  ;;  %v5961_v30 = vpop.f32.mrb[123].mxu0 }
 0x6d8   : > { %v4294_v21 = vpack.c.bf16 %v4275_v62, %v4274_v55  ;;  %v5967_v28 = vpop.f32.mrb[115].mxu1  ;;  %v6433_v19 = vpop.eup %6432 }
 0x6d9   : > { %v6435_v59 = vpop.eup %6434 }
 0x6da   : > { %6036 = vmatprep.mubr.msk.bf16.mxu1 %vm795_vm2, %v4294_v21  ;;  %v6437_v18 = vpop.eup %6436 }
 0x6db   : > { %v6439_v24 = vpop.eup %6438 }
 0x6dc   : > { %v3972_v1 = vpop.f32.mrb[124].mxu0 }
 0x6dd   : > { %v4276_v2 = vmul.f32 %v6429_v26, %v3972_v1  ;;  %v4020_v39 = vpop.f32.mrb[116].mxu1  ;;  %v5972_v31 = vpop.f32.mrb[125].mxu0 }
 0x6de   : > { %v4277_v50 = vmul.f32 %v6431_v37, %v4020_v39  ;;  %v5978_v45 = vpop.f32.mrb[117].mxu1  ;;  %v3975_v40 = vpop.f32.mrb[126].mxu0 }
 0x6df   : > { %v4023_v25 = vpop.f32.mrb[118].mxu1  ;;  %v5973_v3 = vpop.f32.mrb[127].mxu0 }
 0x6e0   : > { %v4295_v4 = vpack.c.bf16 %v4277_v50, %v4276_v2  ;;  %v5979_v58 = vpop.f32.mrb[119].mxu1 }
 0x6e2   : > { %6037 = vmatmul.mubr.msk.bf16.vlgmr.msra.gmra.mrb[136].mxu1 %vm795_vm2, %v4295_v4 }
 0x711   : > { %v4116_v22 = vpop.f32.mrb[120].mxu1 }
 0x712   : > { %v4279_v60 = vmul.f32 %v6433_v19, %v4116_v22  ;;  %v5990_v6 = vpop.f32.mrb[121].mxu1 }
 0x713   : > { %v4068_v47 = vpop.f32.mrb[128].mxu0  ;;  %v4119_v54 = vpop.f32.mrb[122].mxu1 }
 0x714   : > { %v4278_v44 = vmul.f32 %v6435_v59, %v4068_v47  ;;  %v5984_v7 = vpop.f32.mrb[129].mxu0  ;;  %v5991_v16 = vpop.f32.mrb[123].mxu1 }
 0x715   : > { %v4071_v5 = vpop.f32.mrb[130].mxu0 }
 0x716   : > { %v4296_v38 = vpack.c.bf16 %v4279_v60, %v4278_v44  ;;  %v5985_v35 = vpop.f32.mrb[131].mxu0 }
 0x718   : > { %6040 = vmatprep.mubr.msk.bf16.mxu1 %vm795_vm2, %v4296_v38 }
 0x719   : > { %v4212_v12 = vpop.f32.mrb[124].mxu1 }
 0x71a   : > { %v4281_v9 = vmul.f32 %v6437_v18, %v4212_v12  ;;  %v6002_v34 = vpop.f32.mrb[125].mxu1 }
 0x71b   : > { %v4164_v53 = vpop.f32.mrb[132].mxu0  ;;  %v4215_v57 = vpop.f32.mrb[126].mxu1 }
 0x71c   : > { %v4280_v61 = vmul.f32 %v6439_v24, %v4164_v53  ;;  %v5996_v27 = vpop.f32.mrb[133].mxu0  ;;  %v6003_v14 = vpop.f32.mrb[127].mxu1 }
 0x71d   : > { %v4167_v52 = vpop.f32.mrb[134].mxu0 }
 0x71e   : > { %v4297_v43 = vpack.c.bf16 %v4281_v9, %v4280_v61  ;;  %v5997_v8 = vpop.f32.mrb[135].mxu0 }
 0x720   : > { %6041 = vmatmul.mubr.msk.bf16.gmra.mrb[140].mxu1 %vm795_vm2, %v4297_v43 }
 0x751   : > { %v6008_v23 = vpop.f32.mrb[136].mxu0 }
 0x752   : > { %v4351_v46 = vpop.f32.mrb[137].mxu0  ;;  %v4636_v11 = vsel %vm470_vm0, %v6008_v23, 0.0 }
 0x753   : > { %v6009_v20 = vpop.f32.mrb[138].mxu0  ;;  %v4622_v48 = vsel %vm470_vm0, %v4351_v46, 0.0 }
 0x754   : > { %v4354_v33 = vpop.f32.mrb[139].mxu0  ;;  %v4643_v15 = vsel %vm470_vm0, %v6009_v20, 0.0 }
 0x755   : > { %v4629_v28 = vsel %vm470_vm0, %v4354_v33, 0.0 }
 0x75b   : > { %v6012_v49 = vpop.f32.mrb[140].mxu0 }
 0x75c   : > { %v4367_v42 = vpop.f32.mrb[141].mxu0  ;;  %v4664_v39 = vsel %vm470_vm0, %v6012_v49, 0.0  ;;  %v5412_v49 = vld [vmem:[#allocation10] ss:$0 sm:$0xff] }
 0x75d   : > { %v6013_v29 = vpop.f32.mrb[142].mxu0  ;;  %v4650_v45 = vsel %vm470_vm0, %v4367_v42, 0.0 }
 0x75e   : > { %v4370_v63 = vpop.f32.mrb[143].mxu0  ;;  %v4671_v4 = vsel %vm470_vm0, %v6013_v29, 0.0 }
 0x75f   : > { %v4657_v36 = vsel %vm470_vm0, %v4370_v63, 0.0 }
 0x764   : > { %v6018_v32 = vpop.f32.mrb[128].mxu1 }
 0x765   : > { %v4637_v10 = vsel %vm470_vm0, %v6018_v32, 0.0  ;;  %v4431_v55 = vpop.f32.mrb[129].mxu1 }
 0x766   : > { %v4638_v13 = vadd.f32 %v4637_v10, %v4636_v11  ;;  %v4623_v62 = vsel %vm470_vm0, %v4431_v55, 0.0  ;;  %v6019_v51 = vpop.f32.mrb[130].mxu1 }
 0x767   : > { %v4624_v0 = vadd.f32 %v4623_v62, %v4622_v48  ;;  %v4644_v30 = vsel %vm470_vm0, %v6019_v51, 0.0  ;;  %v4434_v21 = vpop.f32.mrb[131].mxu1  ;;  %v6472_v51 = vld [vmem:[%s7200_s18] sm:$0xff] }
 0x768   : > { %v4645_v26 = vadd.f32 %v4644_v30, %v4643_v15  ;;  %v4630_v1 = vsel %vm470_vm0, %v4434_v21, 0.0  ;;  %v6473_v21 = vld [vmem:[%s7200_s18 + $0x10] sm:$0xff] }
 0x769   : > { %v4631_v37 = vadd.f32 %v4630_v1, %v4629_v28 }
 0x76d   : > { %v6022_v2 = vpop.f32.mrb[132].mxu1 }
 0x76e   : > { %v4665_v31 = vsel %vm470_vm0, %v6022_v2, 0.0  ;;  %v4447_v50 = vpop.f32.mrb[133].mxu1  ;;  %v6475_v2 = vld [vmem:[%s7200_s18 + $0x18] sm:$0xff] }
 0x76f   : > { %v4666_v40 = vadd.f32 %v4665_v31, %v4664_v39  ;;  %v4651_v25 = vsel %vm470_vm0, %v4447_v50, 0.0  ;;  %v6023_v3 = vpop.f32.mrb[134].mxu1 }
 0x770   : > { %v4652_v58 = vadd.f32 %v4651_v25, %v4650_v45  ;;  %v4672_v41 = vsel %vm470_vm0, %v6023_v3, 0.0  ;;  %v4450_v56 = vpop.f32.mrb[135].mxu1 }
 0x771   : > { %v4673_v17 = vadd.f32 %v4672_v41, %v4671_v4  ;;  %v4658_v19 = vsel %vm470_vm0, %v4450_v56, 0.0 }
 0x772   : > { %v4659_v22 = vadd.f32 %v4658_v19, %v4657_v36 }
 0x776   : > { %v6028_v60 = vpop.f32.mrb[144].mxu0 }
 0x777   : > { %v4639_v6 = vsel %vm470_vm0, %v6028_v60, 0.0  ;;  %v4511_v59 = vpop.f32.mrb[145].mxu0 }
 0x778   : > { %v4640_v47 = vadd.f32 %v4639_v6, %v4638_v13  ;;  %v4625_v54 = vsel %vm470_vm0, %v4511_v59, 0.0  ;;  %v6029_v44 = vpop.f32.mrb[146].mxu0 }
 0x779   : > { %v4626_v7 = vadd.f32 %v4625_v54, %v4624_v0  ;;  %v4646_v16 = vsel %vm470_vm0, %v6029_v44, 0.0  ;;  %v4514_v5 = vpop.f32.mrb[147].mxu0 }
 0x77a   : > { %v4647_v38 = vadd.f32 %v4646_v16, %v4645_v26  ;;  %v4632_v35 = vsel %vm470_vm0, %v4514_v5, 0.0  ;;  %v6474_v26 = vld [vmem:[%s7200_s18 + $0x8] sm:$0xff]  ;;  %v6477_v16 = vld [vmem:[%s7200_s18 + $0x30] sm:$0xff] }
 0x77b   : > { %v4633_v18 = vadd.f32 %v4632_v35, %v4631_v37 }
 0x77e   : > { %v6032_v12 = vpop.f32.mrb[148].mxu0 }
 0x77f   : > { %v4667_v9 = vsel %vm470_vm0, %v6032_v12, 0.0  ;;  %v4527_v34 = vpop.f32.mrb[149].mxu0  ;;  %v6479_v12 = vld [vmem:[%s7200_s18 + $0x38] sm:$0xff] }
 0x780   : > { %v4668_v24 = vadd.f32 %v4667_v9, %v4666_v40  ;;  %v4653_v53 = vsel %vm470_vm0, %v4527_v34, 0.0  ;;  %v6033_v57 = vpop.f32.mrb[150].mxu0 }
 0x781   : > { %v4654_v61 = vadd.f32 %v4653_v53, %v4652_v58  ;;  %v4674_v27 = vsel %vm470_vm0, %v6033_v57, 0.0  ;;  %v4530_v14 = vpop.f32.mrb[151].mxu0 }
 0x782   : > { %v4675_v52 = vadd.f32 %v4674_v27, %v4673_v17  ;;  %v4660_v43 = vsel %vm470_vm0, %v4530_v14, 0.0 }
 0x783   : > { %v4661_v8 = vadd.f32 %v4660_v43, %v4659_v22 }
 0x7b5   : > { %v6038_v23 = vpop.f32.mrb[136].mxu1 }
 0x7b6   : > { %v4641_v46 = vsel %vm470_vm0, %v6038_v23, 0.0  ;;  %v4591_v20 = vpop.f32.mrb[137].mxu1 }
 0x7b7   : > { %v4642_v33 = vadd.f32 %v4641_v46, %v4640_v47  ;;  %v4627_v42 = vsel %vm470_vm0, %v4591_v20, 0.0  ;;  %v6039_v29 = vpop.f32.mrb[138].mxu1  ;;  %v6476_v47 = vld [vmem:[%s7200_s18 + $0x20] sm:$0xff] }
 0x7b8   : > { %v4628_v63 = vadd.f32 %v4627_v42, %v4626_v7  ;;  %v4648_v32 = vsel %vm470_vm0, %v6039_v29, 0.0  ;;  %v4594_v11 = vpop.f32.mrb[139].mxu1 }
 0x7b9   : > { %v4649_v10 = vadd.f32 %v4648_v32, %v4647_v38  ;;  %v4634_v55 = vsel %vm470_vm0, %v4594_v11, 0.0  ;;  %v4687_v48 = vadd.f32 %v5412_v49, %v4642_v33  ;;  %v6478_v38 = vld [vmem:[%s7200_s18 + $0x28] sm:$0xff]  ;;  %s6734_s18 = scalar_lea.vmem %s8482_s28, 1024 }
 0x7ba   : > { %v4685_v13 = vadd.f32 %v5412_v49, %v4628_v63  ;;  %v4635_v62 = vadd.f32 %v4634_v55, %v4633_v18  ;;  %p6735_p12 = scmp.ne.s32.totalorder %s8482_s28, %s6734_s18  ;;  %p6742_p8 = scmp.lt.s32.totalorder %s6740_s13, %s6734_s18 }
 0x7bb   : > { %v4688_v0 = vadd.f32 %v5412_v49, %v4649_v10  ;;  %v8367_v28 = vadd.f32 %v6473_v21, %v4687_v48 }
 0x7bc   : > { %v8364_v15 = vadd.f32 %v6472_v51, %v4685_v13  ;;  %v4686_v30 = vadd.f32 %v5412_v49, %v4635_v62  ;;  %v6286_v13 = vld [vmem:[#allocation11] sm:$0xff]   ;;  %v6287_v62 = vld [vmem:[#allocation11 + $0x8] sm:$0xff]   ;;  %p6736_p13 = pnand %p6735_p12, %p8576_p1  ;;  %p6743_p4 = por %p6742_p8, %p6741_p2 }
 0x7bd   : > { %v8375_v39 = vadd.f32 %v6475_v2, %v4688_v0  ;;  %v4707_v50 = vsel %vm470_vm0, %v8367_v28, 0.0  ;;  %6044 = vmatprep.subr.bf16.mxu0 %v6286_v13 }
 0x7be   : > { %v8370_v1 = vadd.f32 %v6474_v26, %v4686_v30  ;;  %v4701_v37 = vsel %vm470_vm0, %v8364_v15, 0.0  ;;  %6045 = vmatpush3.bf16.msra.mxu0 %v6286_v13  ;;  %p6737_p0 = pneg %p6736_p13 }
 0x7bf   : > { %4702 = vadd.xlane.f32.xlu0 %v4701_v37  ;;  %v4710_v45 = vsel %vm470_vm0, %v8375_v39, 0.0  ;;  %6046 = vmatprep.subr.bf16.mxu0 %v6287_v62 }
 0x7c0   : > { %v4704_v31 = vsel %vm470_vm0, %v8370_v1, 0.0  ;;  %p6744_p10 = pnand %p6743_p4, %p6737_p0 }
 0x7c1   : > { %4705 = vadd.xlane.f32.xlu1 %v4704_v31 }
 0x7c2   : > { %6047 = vmatpush3.bf16.msra.mxu0 %v6287_v62 }
 0x7c3   : > { %4708 = vadd.xlane.f32.xlu0 %v4707_v50 }
 0x7c5   : > { %4711 = vadd.xlane.f32.xlu1 %v4710_v45 }
 0x7f3   : > { %v6042_v40 = vpop.f32.mrb[140].mxu1 }
 0x7f4   : > { %v4669_v25 = vsel %vm470_vm0, %v6042_v40, 0.0  ;;  %v4607_v3 = vpop.f32.mrb[141].mxu1 }
 0x7f5   : > { %v4670_v4 = vadd.f32 %v4669_v25, %v4668_v24  ;;  %v4655_v58 = vsel %vm470_vm0, %v4607_v3, 0.0  ;;  %v6043_v41 = vpop.f32.mrb[142].mxu1 }
 0x7f6   : > { %v4656_v56 = vadd.f32 %v4655_v58, %v4654_v61  ;;  %v4676_v36 = vsel %vm470_vm0, %v6043_v41, 0.0  ;;  %v4610_v17 = vpop.f32.mrb[143].mxu1 }
 0x7f7   : > { %v4677_v19 = vadd.f32 %v4676_v36, %v4675_v52  ;;  %v4662_v22 = vsel %vm470_vm0, %v4610_v17, 0.0  ;;  %v4691_v60 = vadd.f32 %v5412_v49, %v4670_v4 }
 0x7f8   : > { %v4689_v6 = vadd.f32 %v5412_v49, %v4656_v56  ;;  %v4663_v59 = vadd.f32 %v4662_v22, %v4661_v8 }
 0x7f9   : > { %v4692_v44 = vadd.f32 %v5412_v49, %v4677_v19  ;;  %v8391_v5 = vadd.f32 %v6477_v16, %v4691_v60 }
 0x7fa   : > { %v8388_v54 = vadd.f32 %v6476_v47, %v4689_v6  ;;  %v4690_v7 = vadd.f32 %v5412_v49, %v4663_v59 }
 0x7fb   : > { %v8399_v9 = vadd.f32 %v6479_v12, %v4692_v44  ;;  %v4719_v24 = vsel %vm470_vm0, %v8391_v5, 0.0 }
 0x7fc   : > { %v8394_v35 = vadd.f32 %v6478_v38, %v4690_v7  ;;  %v4713_v18 = vsel %vm470_vm0, %v8388_v54, 0.0 }
 0x7fd   : > { %4714 = vadd.xlane.f32.xlu0 %v4713_v18  ;;  %v4722_v53 = vsel %vm470_vm0, %v8399_v9, 0.0 }
 0x7fe   : > { %v4716_v34 = vsel %vm470_vm0, %v8394_v35, 0.0 }
 0x7ff   : > { %4717 = vadd.xlane.f32.xlu1 %v4716_v34 }
 0x801   : > { %4720 = vadd.xlane.f32.xlu0 %v4719_v24 }
 0x803   : > { %4723 = vadd.xlane.f32.xlu1 %v4722_v53 }
 0x84c   : > { %v4703_v57 = vpop.xlane.xlu0 %4702 }
 0x84d   : > { %v4725_v61 = vmul.f32 0.03125, %v4703_v57 }
 0x84e   : > { %v4706_v27 = vpop.xlane.xlu1 %4705 }
 0x84f   : > { %v8408_v14 = vsub.f32 %v8364_v15, %v4725_v61  ;;  %v4726_v52 = vmul.f32 0.03125, %v4706_v27 }
 0x850   : > { %v4709_v43 = vpop.xlane.xlu0 %4708 }
 0x851   : > { %v8411_v8 = vsub.f32 %v8370_v1, %v4726_v52  ;;  %v4727_v23 = vmul.f32 0.03125, %v4709_v43  ;;  %v4741_v46 = vmul.f32 %v8408_v14, %v8408_v14 }
 0x852   : > { %v4712_v20 = vpop.xlane.xlu1 %4711 }
 0x853   : > { %v8416_v33 = vsub.f32 %v8367_v28, %v4727_v23  ;;  %v4728_v49 = vmul.f32 0.03125, %v4712_v20  ;;  %v4749_v42 = vsel %vm470_vm0, %v4741_v46, 0.0  ;;  %v4742_v29 = vmul.f32 %v8411_v8, %v8411_v8 }
 0x854   : > { %4750 = vadd.xlane.f32.xlu0 %v4749_v42 }
 0x855   : > { %v8422_v63 = vsub.f32 %v8375_v39, %v4728_v49  ;;  %v4752_v32 = vsel %vm470_vm0, %v4742_v29, 0.0  ;;  %v4743_v11 = vmul.f32 %v8416_v33, %v8416_v33 }
 0x856   : > { %4753 = vadd.xlane.f32.xlu1 %v4752_v32 }
 0x857   : > { %v4755_v10 = vsel %vm470_vm0, %v4743_v11, 0.0  ;;  %v4744_v55 = vmul.f32 %v8422_v63, %v8422_v63 }
 0x858   : > { %4756 = vadd.xlane.f32.xlu0 %v4755_v10 }
 0x859   : > { %v4758_v48 = vsel %vm470_vm0, %v4744_v55, 0.0 }
 0x85a   : > { %4759 = vadd.xlane.f32.xlu1 %v4758_v48 }
 0x88a   : > { %v4715_v51 = vpop.xlane.xlu0 %4714 }
 0x88b   : > { %v4729_v0 = vmul.f32 0.03125, %v4715_v51 }
 0x88c   : > { %v4718_v30 = vpop.xlane.xlu1 %4717 }
 0x88d   : > { %v8432_v21 = vsub.f32 %v8388_v54, %v4729_v0  ;;  %v4730_v26 = vmul.f32 0.03125, %v4718_v30 }
 0x88e   : > { %v4721_v37 = vpop.xlane.xlu0 %4720 }
 0x88f   : > { %v8435_v2 = vsub.f32 %v8394_v35, %v4730_v26  ;;  %v4731_v31 = vmul.f32 0.03125, %v4721_v37  ;;  %v4745_v50 = vmul.f32 %v8432_v21, %v8432_v21 }
 0x890   : > { %v4724_v45 = vpop.xlane.xlu1 %4723 }
 0x891   : > { %v8440_v40 = vsub.f32 %v8391_v5, %v4731_v31  ;;  %v4732_v25 = vmul.f32 0.03125, %v4724_v45  ;;  %v4761_v3 = vsel %vm470_vm0, %v4745_v50, 0.0  ;;  %v4746_v4 = vmul.f32 %v8435_v2, %v8435_v2 }
 0x892   : > { %4762 = vadd.xlane.f32.xlu0 %v4761_v3  ;;  %v6289_v3 = vld [vmem:[#allocation14 + $0x8] sm:$0xff]  }
 0x893   : > { %v4740_v58 = vsub.f32 %v8399_v9, %v4732_v25  ;;  %v4764_v41 = vsel %vm470_vm0, %v4746_v4, 0.0  ;;  %v4747_v56 = vmul.f32 %v8440_v40, %v8440_v40  ;;  %v6288_v25 = vld [vmem:[#allocation14] sm:$0xff]  }
 0x894   : > { %4765 = vadd.xlane.f32.xlu1 %v4764_v41  ;;  %6056 = vmatprep.subr.bf16.mxu1 %v6288_v25  ;;  %v6292_v4 = vld [vmem:[#allocation14 + $0x20] sm:$0xff]   ;;  %v6295_v41 = vld [vmem:[#allocation14 + $0x38] sm:$0xff]  }
 0x895   : > { %v4767_v36 = vsel %vm470_vm0, %v4747_v56, 0.0  ;;  %v4748_v17 = vmul.f32 %v4740_v58, %v4740_v58  ;;  %6057 = vmatpush3.bf16.msra.mxu1 %v6288_v25  ;;  %v5413_v56 = vld [vmem:[#allocation13] ss:$0 sm:$0xff] }
 0x896   : > { %4768 = vadd.xlane.f32.xlu0 %v4767_v36  ;;  %6058 = vmatprep.subr.bf16.mxu1 %v6289_v3 }
 0x897   : > { %v4770_v19 = vsel %vm470_vm0, %v4748_v17, 0.0 }
 0x898   : > { %4771 = vadd.xlane.f32.xlu1 %v4770_v19 }
 0x899   : > { %6059 = vmatpush3.bf16.msra.mxu1 %v6289_v3 }
 0x8e1   : > { %v4751_v22 = vpop.xlane.xlu0 %4750 }
 0x8e2   : > { %v4773_v60 = vmul.f32 0.03125, %v4751_v22 }
 0x8e3   : > { %v4754_v6 = vpop.xlane.xlu1 %4753 }
 0x8e4   : > { %v4781_v59 = vadd.f32 1e-05, %v4773_v60  ;;  %v4774_v47 = vmul.f32 0.03125, %v4754_v6 }
 0x8e5   : > { %v4757_v44 = vpop.xlane.xlu0 %4756 }
 0x8e6   : > { %6440 = vrsqrt.f32 %v4781_v59  ;;  %v4782_v7 = vadd.f32 1e-05, %v4774_v47  ;;  %v4775_v16 = vmul.f32 0.03125, %v4757_v44 }
 0x8e7   : > { %v4760_v38 = vpop.xlane.xlu1 %4759 }
 0x8e8   : > { %6442 = vrsqrt.f32 %v4782_v7  ;;  %v4783_v18 = vadd.f32 1e-05, %v4775_v16  ;;  %v4776_v12 = vmul.f32 0.03125, %v4760_v38 }
 0x8ea   : > { %6444 = vrsqrt.f32 %v4783_v18  ;;  %v4784_v34 = vadd.f32 1e-05, %v4776_v12 }
 0x8ec   : > { %6446 = vrsqrt.f32 %v4784_v34 }
 0x8f0   : > { %v6441_v24 = vpop.eup %6440 }
 0x8f1   : > { %v4797_v57 = vmul.f32 %v6441_v24, %v8408_v14 }
 0x8f2   : > { %v6443_v53 = vpop.eup %6442 }
 0x8f3   : > { %v4798_v61 = vmul.f32 %v6443_v53, %v8411_v8 }
 0x8f4   : > { %v6445_v27 = vpop.eup %6444 }
 0x8f5   : > { %v4805_v52 = vpack.c.bf16 %v4798_v61, %v4797_v57  ;;  %v4799_v23 = vmul.f32 %v6445_v27, %v8416_v33 }
 0x8f6   : > { %v6447_v43 = vpop.eup %6446 }
 0x8f7   : > { %v4800_v46 = vmul.f32 %v6447_v43, %v8422_v63  ;;  %6048 = vmatprep.mubr.msk.bf16.mxu0 %vm470_vm0, %v4805_v52 }
 0x8f9   : > { %v4806_v20 = vpack.c.bf16 %v4800_v46, %v4799_v23 }
 0x8fb   : > { %6049 = vmatmul.mubr.msk.bf16.vlgmr.msra.gmra.mrb[152].mxu0 %vm470_vm0, %v4806_v20 }
 0x91f   : > { %v4763_v49 = vpop.xlane.xlu0 %4762 }
 0x920   : > { %v4777_v42 = vmul.f32 0.03125, %v4763_v49 }
 0x921   : > { %v4766_v29 = vpop.xlane.xlu1 %4765 }
 0x922   : > { %v4785_v32 = vadd.f32 1e-05, %v4777_v42  ;;  %v4778_v11 = vmul.f32 0.03125, %v4766_v29 }
 0x923   : > { %v4769_v14 = vpop.xlane.xlu0 %4768 }
 0x924   : > { %6448 = vrsqrt.f32 %v4785_v32  ;;  %v4786_v8 = vadd.f32 1e-05, %v4778_v11  ;;  %v4779_v10 = vmul.f32 0.03125, %v4769_v14 }
 0x925   : > { %v4772_v55 = vpop.xlane.xlu1 %4771 }
 0x926   : > { %6450 = vrsqrt.f32 %v4786_v8  ;;  %v4787_v48 = vadd.f32 1e-05, %v4779_v10  ;;  %v4780_v33 = vmul.f32 0.03125, %v4772_v55 }
 0x928   : > { %6452 = vrsqrt.f32 %v4787_v48  ;;  %v4788_v63 = vadd.f32 1e-05, %v4780_v33 }
 0x92a   : > { %6454 = vrsqrt.f32 %v4788_v63 }
 0x92e   : > { %v6449_v13 = vpop.eup %6448 }
 0x92f   : > { %v4801_v51 = vmul.f32 %v6449_v13, %v8432_v21  ;;  %v6290_v21 = vld [vmem:[#allocation14 + $0x10] sm:$0xff]  }
 0x930   : > { %v6451_v62 = vpop.eup %6450  ;;  %6060 = vmatprep.subr.bf16.mxu1 %v6290_v21 }
 0x931   : > { %v4802_v0 = vmul.f32 %v6451_v62, %v8435_v2  ;;  %6061 = vmatpush3.bf16.msra.mxu1 %v6290_v21  ;;  %v6291_v2 = vld [vmem:[#allocation14 + $0x18] sm:$0xff]  }
 0x932   : > { %v6453_v30 = vpop.eup %6452  ;;  %6062 = vmatprep.subr.bf16.mxu1 %v6291_v2 }
 0x933   : > { %v4807_v26 = vpack.c.bf16 %v4802_v0, %v4801_v51  ;;  %v4803_v31 = vmul.f32 %v6453_v30, %v8440_v40  ;;  %v6293_v40 = vld [vmem:[#allocation14 + $0x28] sm:$0xff]  }
 0x934   : > { %v6455_v37 = vpop.eup %6454 }
 0x935   : > { %6052 = vmatprep.mubr.msk.bf16.mxu0 %vm470_vm0, %v4807_v26  ;;  %v4804_v50 = vmul.f32 %v6455_v37, %v4740_v58  ;;  %6063 = vmatpush3.bf16.msra.mxu1 %v6291_v2  ;;  %v6294_v58 = vld [vmem:[#allocation14 + $0x30] sm:$0xff]  }
 0x936   : > { %6064 = vmatprep.subr.bf16.mxu1 %v6292_v4 }
 0x937   : > { %v4808_v45 = vpack.c.bf16 %v4804_v50, %v4803_v31 }
 0x939   : > { %6053 = vmatmul.mubr.msk.bf16.gmra.mrb[156].mxu0 %vm470_vm0, %v4808_v45  ;;  %6065 = vmatpush3.bf16.msra.mxu1 %v6292_v4 }
 0x93a   : > { %6066 = vmatprep.subr.bf16.mxu1 %v6293_v40 }
 0x93d   : > { %6067 = vmatpush3.bf16.msra.mxu1 %v6293_v40 }
 0x93e   : > { %6068 = vmatprep.subr.bf16.mxu1 %v6294_v58 }
 0x941   : > { %6069 = vmatpush3.bf16.msra.mxu1 %v6294_v58 }
 0x942   : > { %6070 = vmatprep.subr.bf16.mxu1 %v6295_v41 }
 0x945   : > { %6071 = vmatpush3.bf16.msra.mxu1 %v6295_v41 }
 0x9ce   : > { %v6050_v36 = vpop.f32.mrb[152].mxu0 }
 0x9cf   : > { %v4887_v17 = vadd.f32 %v6050_v36, %v5413_v56  ;;  %v4878_v19 = vpop.f32.mrb[153].mxu0 }
 0x9d0   : > { %v4879_v22 = vadd.f32 %v5413_v56, %v4878_v19  ;;  %v6051_v60 = vpop.f32.mrb[154].mxu0 }
 0x9d1   : > { %v4919_v6 = vmul.f32 %v4887_v17, %v4887_v17  ;;  %v4890_v59 = vadd.f32 %v6051_v60, %v5413_v56  ;;  %v4881_v47 = vpop.f32.mrb[155].mxu0  ;;  %v4911_v48 = vmul.f32 0.5, %v4887_v17 }
 0x9d2   : > { %v4917_v44 = vmul.f32 %v4879_v22, %v4879_v22  ;;  %v4882_v7 = vadd.f32 %v5413_v56, %v4881_v47  ;;  %v4909_v13 = vmul.f32 0.5, %v4879_v22 }
 0x9d3   : > { %v4927_v16 = vmul.f32 %v4919_v6, %v4887_v17  ;;  %v4920_v38 = vmul.f32 %v4890_v59, %v4890_v59  ;;  %v4912_v33 = vmul.f32 0.5, %v4890_v59 }
 0x9d4   : > { %v4925_v18 = vmul.f32 %v4917_v44, %v4879_v22  ;;  %v4918_v12 = vmul.f32 %v4882_v7, %v4882_v7  ;;  %v4910_v62 = vmul.f32 0.5, %v4882_v7 }
 0x9d5   : > { %v4935_v34 = vmul.f32 0.044715, %v4927_v16  ;;  %v4928_v24 = vmul.f32 %v4920_v38, %v4890_v59 }
 0x9d6   : > { %v4933_v53 = vmul.f32 0.044715, %v4925_v18  ;;  %v4926_v57 = vmul.f32 %v4918_v12, %v4882_v7 }
 0x9d7   : > { %v4943_v61 = vadd.f32 %v4935_v34, %v4887_v17  ;;  %v4936_v27 = vmul.f32 0.044715, %v4928_v24 }
 0x9d8   : > { %v4941_v52 = vadd.f32 %v4933_v53, %v4879_v22  ;;  %v4934_v43 = vmul.f32 0.044715, %v4926_v57 }
 0x9d9   : > { %v4951_v23 = vmul.f32 0.7978846, %v4943_v61  ;;  %v4944_v46 = vadd.f32 %v4936_v27, %v4890_v59 }
 0x9da   : > { %v4949_v20 = vmul.f32 0.7978846, %v4941_v52  ;;  %v4942_v49 = vadd.f32 %v4934_v43, %v4882_v7 }
 0x9db   : > { %6456 = vtanh.f32 %v4951_v23  ;;  %v4952_v42 = vmul.f32 0.7978846, %v4944_v46 }
 0x9dc   : > { %6458 = vtanh.f32 %v4949_v20  ;;  %v4950_v29 = vmul.f32 0.7978846, %v4942_v49 }
 0x9dd   : > { %6460 = vtanh.f32 %v4952_v42 }
 0x9de   : > { %6462 = vtanh.f32 %v4950_v29 }
 0x9e5   : > { %v6457_v32 = vpop.eup %6456 }
 0x9e6   : > { %v6459_v11 = vpop.eup %6458  ;;  %v4967_v14 = vadd.f32 1.0, %v6457_v32 }
 0x9e7   : > { %v6461_v8 = vpop.eup %6460  ;;  %v4965_v10 = vadd.f32 1.0, %v6459_v11 }
 0x9e8   : > { %v6463_v55 = vpop.eup %6462  ;;  %v4968_v63 = vadd.f32 1.0, %v6461_v8  ;;  %v4975_v0 = vmul.f32 %v4967_v14, %v4911_v48 }
 0x9e9   : > { %v4966_v51 = vadd.f32 1.0, %v6463_v55  ;;  %v4973_v26 = vmul.f32 %v4965_v10, %v4909_v13 }
 0x9ea   : > { %v4976_v30 = vmul.f32 %v4968_v63, %v4912_v33  ;;  %v5420_v63 = vld [vmem:[#allocation16] ss:$0 sm:$0xff] }
 0x9eb   : > { %v4974_v37 = vmul.f32 %v4966_v51, %v4910_v62 }
 0x9ec   : > { %v4982_v31 = vpack.c.bf16 %v4976_v30, %v4975_v0 }
 0x9ed   : > { %v4981_v50 = vpack.c.bf16 %v4974_v37, %v4973_v26 }
 0x9ef   : > { %6072 = vmatprep.mubr.bf16.mxu1 %v4981_v50 }
 0x9f0   : > { %6073 = vmatmul.mubr.bf16.vlgmr.msra.gmra.mrb[144].mxu1 %v4982_v31 }
 0xa0c   : > { %v6054_v45 = vpop.f32.mrb[156].mxu0 }
 0xa0d   : > { %v4903_v25 = vadd.f32 %v6054_v45, %v5413_v56  ;;  %v4894_v3 = vpop.f32.mrb[157].mxu0 }
 0xa0e   : > { %v4895_v21 = vadd.f32 %v5413_v56, %v4894_v3  ;;  %v6055_v2 = vpop.f32.mrb[158].mxu0 }
 0xa0f   : > { %v4923_v4 = vmul.f32 %v4903_v25, %v4903_v25  ;;  %v4906_v40 = vadd.f32 %v6055_v2, %v5413_v56  ;;  %v4897_v58 = vpop.f32.mrb[159].mxu0  ;;  %v4915_v20 = vmul.f32 0.5, %v4903_v25 }
 0xa10   : > { %v4921_v41 = vmul.f32 %v4895_v21, %v4895_v21  ;;  %v4898_v36 = vadd.f32 %v5413_v56, %v4897_v58  ;;  %v4913_v29 = vmul.f32 0.5, %v4895_v21 }
 0xa11   : > { %v4931_v17 = vmul.f32 %v4923_v4, %v4903_v25  ;;  %v4924_v19 = vmul.f32 %v4906_v40, %v4906_v40  ;;  %v4916_v49 = vmul.f32 0.5, %v4906_v40 }
 0xa12   : > { %v4929_v22 = vmul.f32 %v4921_v41, %v4895_v21  ;;  %v4922_v60 = vmul.f32 %v4898_v36, %v4898_v36  ;;  %v4914_v32 = vmul.f32 0.5, %v4898_v36 }
 0xa13   : > { %v4939_v6 = vmul.f32 0.044715, %v4931_v17  ;;  %v4932_v59 = vmul.f32 %v4924_v19, %v4906_v40 }
 0xa14   : > { %v4937_v47 = vmul.f32 0.044715, %v4929_v22  ;;  %v4930_v44 = vmul.f32 %v4922_v60, %v4898_v36 }
 0xa15   : > { %v4947_v7 = vadd.f32 %v4939_v6, %v4903_v25  ;;  %v4940_v16 = vmul.f32 0.044715, %v4932_v59 }
 0xa16   : > { %v4945_v38 = vadd.f32 %v4937_v47, %v4895_v21  ;;  %v4938_v18 = vmul.f32 0.044715, %v4930_v44 }
 0xa17   : > { %v4955_v12 = vmul.f32 0.7978846, %v4947_v7  ;;  %v4948_v34 = vadd.f32 %v4940_v16, %v4906_v40 }
 0xa18   : > { %v4953_v24 = vmul.f32 0.7978846, %v4945_v38  ;;  %v4946_v53 = vadd.f32 %v4938_v18, %v4898_v36 }
 0xa19   : > { %6464 = vtanh.f32 %v4955_v12  ;;  %v4956_v57 = vmul.f32 0.7978846, %v4948_v34 }
 0xa1a   : > { %6466 = vtanh.f32 %v4953_v24  ;;  %v4954_v56 = vmul.f32 0.7978846, %v4946_v53 }
 0xa1b   : > { %6468 = vtanh.f32 %v4956_v57 }
 0xa1c   : > { %6470 = vtanh.f32 %v4954_v56 }
 0xa23   : > { %v6465_v61 = vpop.eup %6464 }
 0xa24   : > { %v6467_v27 = vpop.eup %6466  ;;  %v4971_v52 = vadd.f32 1.0, %v6465_v61 }
 0xa25   : > { %v6469_v43 = vpop.eup %6468  ;;  %v4969_v23 = vadd.f32 1.0, %v6467_v27 }
 0xa26   : > { %v6471_v46 = vpop.eup %6470  ;;  %v4972_v42 = vadd.f32 1.0, %v6469_v43  ;;  %v4979_v14 = vmul.f32 %v4971_v52, %v4915_v20 }
 0xa27   : > { %v4970_v11 = vadd.f32 1.0, %v6471_v46  ;;  %v4977_v10 = vmul.f32 %v4969_v23, %v4913_v29 }
 0xa28   : > { %v4980_v8 = vmul.f32 %v4972_v42, %v4916_v49 }
 0xa29   : > { %v4978_v55 = vmul.f32 %v4970_v11, %v4914_v32 }
 0xa2a   : > { %v4984_v48 = vpack.c.bf16 %v4980_v8, %v4979_v14 }
 0xa2b   : > { %v4983_v33 = vpack.c.bf16 %v4978_v55, %v4977_v10 }
 0xa2d   : > { %6076 = vmatprep.mubr.bf16.mxu1 %v4983_v33 }
 0xa2e   : > { %6077 = vmatmul.mubr.bf16.gmra.mrb[148].mxu1 %v4984_v48 }
 0xac3   : > { %v6074_v13 = vpop.f32.mrb[144].mxu1 }
 0xac4   : > { %v5099_v62 = vadd.f32 %v6074_v13, %v5420_v63  ;;  %v5090_v51 = vpop.f32.mrb[145].mxu1 }
 0xac5   : > { %v5091_v0 = vadd.f32 %v5420_v63, %v5090_v51  ;;  %v6075_v30 = vpop.f32.mrb[146].mxu1 }
 0xac6   : > { %v5123_v26 = vadd.f32 %v5099_v62, %v8367_v28  ;;  %v5102_v37 = vadd.f32 %v6075_v30, %v5420_v63  ;;  %v5093_v31 = vpop.f32.mrb[147].mxu1 }
 0xac7   : > { %v5121_v50 = vadd.f32 %v5091_v0, %v8364_v15  ;;  %v5094_v45 = vadd.f32 %v5420_v63, %v5093_v31 }
 0xac8   : > { %5131 = vst.msk [vmem:[%s458_s14 + $0x10] sm:$0xff] %vm470_vm0, %v5123_v26  ;;  %v5124_v25 = vadd.f32 %v5102_v37, %v8375_v39 }
 0xac9   : > { %5129 = vst.msk [vmem:[%s458_s14] sm:$0xff] %vm470_vm0, %v5121_v50  ;;  %v5122_v3 = vadd.f32 %v5094_v45, %v8370_v1 }
 0xaca   : > { %5132 = vst.msk [vmem:[%s458_s14 + $0x18] sm:$0xff] %vm470_vm0, %v5124_v25 }
 0xacb   : > { %5130 = vst.msk [vmem:[%s458_s14 + $0x8] sm:$0xff] %vm470_vm0, %v5122_v3 }
 0xb01   : > { %v6078_v28 = vpop.f32.mrb[148].mxu1 }
 0xb02   : > { %v5115_v21 = vadd.f32 %v6078_v28, %v5420_v63  ;;  %v5106_v2 = vpop.f32.mrb[149].mxu1 }
 0xb03   : > { %v5107_v4 = vadd.f32 %v5420_v63, %v5106_v2  ;;  %v6079_v15 = vpop.f32.mrb[150].mxu1 }
 0xb04   : > { %v5127_v40 = vadd.f32 %v5115_v21, %v8391_v5  ;;  %v5118_v39 = vadd.f32 %v6079_v15, %v5420_v63  ;;  %v5109_v58 = vpop.f32.mrb[151].mxu1 }
 0xb05   : > { %v5125_v41 = vadd.f32 %v5107_v4, %v8388_v54  ;;  %v5110_v1 = vadd.f32 %v5420_v63, %v5109_v58 }
 0xb06   : > { %5135 = vst.msk [vmem:[%s458_s14 + $0x30] sm:$0xff] %vm470_vm0, %v5127_v40  ;;  %v5128_v36 = vadd.f32 %v5118_v39, %v8399_v9 }
 0xb07   : > { %5133 = vst.msk [vmem:[%s458_s14 + $0x20] sm:$0xff] %vm470_vm0, %v5125_v41  ;;  %v5126_v5 = vadd.f32 %v5110_v1, %v8394_v35 }
 0xb08   : > { %5136 = vst.msk [vmem:[%s458_s14 + $0x38] sm:$0xff] %vm470_vm0, %v5128_v36 }
 0xb09   : > { %5134 = vst.msk [vmem:[%s458_s14 + $0x28] sm:$0xff] %vm470_vm0, %v5126_v5 }
 0xb0a   : > { %6747 = shalt.err (!%p6744_p10)
}
 0xb0b   : > { %s6748_s1 = scalar_lea.hbm %s8480_s21, 1024  ;;  %s6752_s26 = scalar_lea.hbm %s8575_s22, 2048 }
 0xb0c   : > { %p6749_p11 = scmp.ne.s32.totalorder %s8480_s21, %s6748_s1  ;;  %p6753_p7 = scmp.lt.u32.totalorder %s8480_s21, %s8575_s22 }
 0xb0d   : > { %p6754_p6 = scmp.lt.u32.totalorder %s6752_s26, %s6748_s1  ;;  %p6756_p12 = scmp.lt.u32.totalorder %s6748_s1, %s8480_s21 }
 0xb0e   : > { %p6750_p3 = pnand %p6749_p11, %p8576_p1 }
 0xb0f   : > { %p6755_p9 = por %p6754_p6, %p6753_p7 }
 0xb10   : > { %p6751_p5 = pneg %p6750_p3 }
 0xb11   : > { %p6757_p13 = por %p6756_p12, %p6755_p9 }
 0xb13   : > { %p6758_p0 = pnand %p6757_p13, %p6751_p5 }
 0xb15   : > { %6761 = shalt.err (!%p6758_p0)
}
 0xb16   : > { %s6839_s18 = smov 128   ;;  %s6840_s16 = smov 8  }
 0xb17   : > { %6118 = dma.vmem_to_hbm [thread:$0]  (%p8576_p1), %s8482_s28, 1024, %s8480_s21, %s5138_s15, %s6839_s18, %s6839_s18, %s6840_s16  }
 0xb18 PF: > { %s5166_s20 = sand.u32 1, %s6804_s30   ;;  %p8577_p2 = scmp.ne.s32.totalorder %s8557_s24, 0 }
 0xb19   : > { %p8578_p8 = scmp.ge.s32.totalorder %s6816_s12, 2  ;;  %s5167_s13 = scalar_lea.sflag [#allocation4], %s5166_s20 }
 0xb1b   : > { %p6150_p4 = pnand %p8578_p8, %p8577_p2 }
 0xb1d   : > { %6799 = dma.done.wait (!%p6150_p4), %s5167_s13, 1024  }
 0xb1e   : > { %6801 = vsyncadd (!%p6150_p4), %s5167_s13, 4294966272  ;;  %p26_p10 = scmp.ge.s32.totalorder %s7115_s19, 4   ;;  %s8579_s30 = smov %s6808_s10 }
 0xb1f   : > { %s8580_s10 = smov %s6812_s11  ;;  %s8581_s11 = smov %s7126_s17 }
 0xb20   : > { %s8582_s12 = smov %s7115_s19  ;;  %28 = sbr.rel (!%p26_p10) target bundleno = 12 (0xc), region = 133 }
 0xb27   :  { %5172 = vsyncpa [#allocation3], 1 }
 0xb28   :  { %5174 = vsyncpa [#allocation3 + $0x1], 1 }
 0xb29   :  { %5175 = vsyncpa [#allocation6], 1 }
 0xb2a   :  { %5176 = vsyncpa [#allocation9], 1 }
 0xb2b   :  { %5177 = vsyncpa [#allocation12], 1 }
 0xb2c   :  { %5178 = vsyncpa [#allocation15], 1 }
 0xb2d   :  { %5179 = vsyncpa [#allocation4], 1 }
 0xb2e   :  { %5181 = vsyncpa [#allocation4 + $0x1], 1 }

</bundles_post_ra>
